<compile_context>
chip_gen: v7x
topology: tpu7x:2x2x1
jax: 0.10.0
libtpu: 0.0.40
codegen_flags: <defaults>
</compile_context>

<pallas_src>
import jax
import jax.numpy as jnp
from jax.experimental import pallas as pl
from jax.experimental.pallas import tpu as pltpu


# ------------------------- parameter packing layout ------------------------- #
def _round_up(n, m):
    return -(-n // m) * m


def param_layout(H, L):
    """Row offsets inside the f32 bias slab (pb) and bf16 weight slab (pw)."""
    assert H % 8 == 0
    offs = {}
    r = 0
    offs["emb"] = r; r += 8                       # Wn, bn, We, be (+4 pad rows)
    offs["b1"] = r;  r += _round_up(L, 8)
    offs["b2"] = r;  r += _round_up(L, 8)
    offs["eps"] = r; r += _round_up(L, 8)         # eps[l] broadcast along H
    offs["bout"] = r; r += 8                      # bout (+7 pad rows)
    rb = r
    offs["W1"] = 0                                # L stacked [H,H] blocks (bf16)
    offs["W2"] = L * H
    offs["Wout"] = 2 * L * H
    rw = (2 * L + 1) * H
    return offs, rb, rw


def pack_params(params, *, H, O, L):
    """Pack weights into one bf16 slab (MXU operands) + one f32 slab (biases)."""
    assert O == H, "Wout is folded into the width-H weight slab (module default 128/128)"
    offs, RB, RW = param_layout(H, L)
    zH = lambda n: jnp.zeros((n, H), jnp.float32)
    padL = _round_up(L, 8) - L

    pb = jnp.concatenate([
        params["Wn"].astype(jnp.float32), params["bn"].astype(jnp.float32),
        params["We"].astype(jnp.float32), params["be"].astype(jnp.float32), zH(4),
        params["b1"].reshape(L, H).astype(jnp.float32), zH(padL),
        params["b2"].reshape(L, H).astype(jnp.float32), zH(padL),
        jnp.broadcast_to(params["eps"].astype(jnp.float32)[:, None], (L, H)), zH(padL),
        params["bout"].astype(jnp.float32), zH(7),
    ], axis=0)
    assert pb.shape == (RB, H)

    pw = jnp.concatenate([
        params["W1"].reshape(L * H, H),
        params["W2"].reshape(L * H, H),
        params["Wout"],
    ], axis=0).astype(jnp.bfloat16)
    assert pw.shape == (RW, H)
    return pw, pb, offs


# ----------------------------- Pallas kernel -------------------------------- #
def make_kernel(*, H, L, GN, GE, offs):
    OE, OB1, OB2 = offs["emb"], offs["b1"], offs["b2"]
    OEPS, OBOUT = offs["eps"], offs["bout"]
    OW1, OW2, OWOUT = offs["W1"], offs["W2"], offs["Wout"]
    f32, bf16 = jnp.float32, jnp.bfloat16

    def kernel(xe_ref, G_ref, ST_ref, pool_ref, pw_ref, pb_ref, out_ref):
        # xe_ref:   [1, GN+GE, 1]  packed raw node + edge scalars (f32)
        # G_ref:    [1, GE, GN]    block-diag one-hot src gather       (bf16)
        # ST_ref:   [1, GN, GE]    block-diag one-hot dst scatter-add  (bf16)
        # pool_ref: [GB*F, GN]     block-diag freq-band mean pooling   (bf16)
        # pw_ref:   [(2L+1)*H, H]  W1 | W2 | Wout                      (bf16)
        # pb_ref:   [RB, H]        Wn/bn/We/be | b1 | b2 | eps | bout  (f32)
        # out_ref:  [1, GB*F, O]

        xr = xe_ref[0, 0:GN, :]                       # [GN, 1]
        er = xe_ref[0, GN:GN + GE, :]                 # [GE, 1]
        # Node / edge embeddings (in_features == 1 -> broadcast multiply, f32).
        x = xr * pb_ref[OE + 0:OE + 1, :] + pb_ref[OE + 1:OE + 2, :]   # [GN, H]
        e = er * pb_ref[OE + 2:OE + 3, :] + pb_ref[OE + 3:OE + 4, :]   # [GE, H]

        G = G_ref[0]     # [GE, GN] bf16 (exact 0/1)
        ST = ST_ref[0]   # [GN, GE] bf16 (exact 0/1)

        for l in range(L):  # static unroll (L = 4)
            # GINE message: m_e = relu(x[src_e] + edge_attr_e)
            msg = jnp.maximum(
                jnp.dot(G, x.astype(bf16), preferred_element_type=f32) + e, 0.0)
            # Aggregate over incoming edges (scatter-add as one-hot matmul).
            agg = jnp.dot(ST, msg.astype(bf16), preferred_element_type=f32)
            # (1 + eps_l) * x + agg   (eps stored as a broadcast f32 row: exact)
            h = x + pb_ref[OEPS + l:OEPS + l + 1, :] * x + agg
            # MLP: Linear -> ReLU -> Linear (bf16 operands, f32 accumulate).
            h = jnp.maximum(
                jnp.dot(h.astype(bf16), pw_ref[OW1 + l * H:OW1 + (l + 1) * H, :],
                        preferred_element_type=f32)
                + pb_ref[OB1 + l:OB1 + l + 1, :], 0.0)
            h = (jnp.dot(h.astype(bf16), pw_ref[OW2 + l * H:OW2 + (l + 1) * H, :],
                         preferred_element_type=f32)
                 + pb_ref[OB2 + l:OB2 + l + 1, :])
            # Residual; dropout is identity in eval mode.
            x = x + jnp.maximum(h, 0.0)

        # Freq-band mean pooling first, then the output projection in pooled
        # space (Pool rows sum to 1 exactly -> bias commutes exactly).
        pooled = jnp.dot(pool_ref[...], x.astype(bf16),
                         preferred_element_type=f32)                    # [GB*F, H]
        out_ref[0] = (jnp.dot(pooled.astype(bf16), pw_ref[OWOUT:OWOUT + H, :],
                              preferred_element_type=f32)
                      + pb_ref[OBOUT:OBOUT + 1, :])                     # [GB*F, O]

    return kernel


# ------------------------------- wrapper ------------------------------------ #
def connectome_encoder(xe, G3, ST3, Pool, pw, pb, *, batch, graphs_per_step,
                       num_freqband, nodes_per_graph, edges_per_graph,
                       H, O, L, offs):
    B, GB, F = batch, graphs_per_step, num_freqband
    assert B % GB == 0
    S = B // GB
    Nb, Eb = nodes_per_graph, edges_per_graph
    GN, GE, GF = GB * Nb, GB * Eb, GB * F
    assert GN % 8 == 0 and GE % 8 == 0, "per-step node/edge rows must be 8-aligned"
    RW, RB = pw.shape[0], pb.shape[0]

    kernel = make_kernel(H=H, L=L, GN=GN, GE=GE, offs=offs)

    def resident(shape, imap, single):
        # Grid-invariant operand: constant index_map (no re-DMA across steps);
        # single-buffer it when the jax build supports pipeline_mode.
        if single:
            return pl.BlockSpec(shape, imap, pipeline_mode=pl.Buffered(1))
        return pl.BlockSpec(shape, imap)

    def build_call(single_buffer):
        in_specs = [
            pl.BlockSpec((1, GN + GE, 1), lambda g: (g, 0, 0)),   # packed x/e scalars
            pl.BlockSpec((1, GE, GN), lambda g: (g, 0, 0)),       # G (block-diag)
            pl.BlockSpec((1, GN, GE), lambda g: (g, 0, 0)),       # ST (block-diag)
            resident((GF, GN), lambda g: (0, 0), single_buffer),  # Pool
            resident((RW, H), lambda g: (0, 0), single_buffer),   # bf16 weights
            resident((RB, H), lambda g: (0, 0), single_buffer),   # f32 biases/eps
        ]
        out_specs = pl.BlockSpec((1, GF, O), lambda g: (g, 0, 0))

        # Advisory cost + explicit scoped-VMEM limit (with headroom).
        flops = S * (L * (4 * GE * GN * H + 4 * GN * H * H)
                     + 2 * GF * GN * H + 2 * GF * H * O)
        bytes_accessed = (xe.size * 4 + G3.size * 2 + ST3.size * 2 + Pool.size * 2
                          + pw.size * 2 + pb.size * 4 + S * GF * O * 4)
        block_bytes = (2 * (GN + GE) * 4            # xe, double-buffered f32
                       + 2 * 2 * GE * GN * 2        # G + ST, double-buffered bf16
                       + GF * GN * 2                # Pool (resident)
                       + RW * H * 2 + RB * H * 4    # param slabs (resident)
                       + 2 * GF * O * 4)            # output, double-buffered
        vmem_limit = int(min(max(4 * block_bytes + (8 << 20), 32 << 20), 64 << 20))

        return pl.pallas_call(
            kernel,
            out_shape=jax.ShapeDtypeStruct((S, GF, O), jnp.float32),
            grid=(S,),
            in_specs=in_specs,
            out_specs=out_specs,
            compiler_params=pltpu.CompilerParams(
                dimension_semantics=("parallel",),
                vmem_limit_bytes=vmem_limit),
            cost_estimate=pl.CostEstimate(flops=flops, transcendentals=0,
                                          bytes_accessed=bytes_accessed),
        )

    try:
        out = build_call(True)(xe, G3, ST3, Pool, pw, pb)
    except Exception:
        # pipeline_mode=pl.Buffered(1) not supported by this jax/Mosaic build:
        # fall back to default double-buffering (identical numerics).
        out = build_call(False)(xe, G3, ST3, Pool, pw, pb)

    # (S, GB*F, O) -> (B, F, O); graphs are assigned to steps contiguously.
    return out.reshape(B, F, O)


# ------------------- static graph operands (built once) --------------------- #
def choose_graphs_per_step(batch):
    """All graphs in one grid step on single-TC chips (v5e/v6e: the grid is a
    serial loop); split into 2 parallel steps on v7x (2 TensorCores/chip)."""
    try:
        kind = jax.devices()[0].device_kind.lower()
    except Exception:
        kind = ""
    two_tc = ("v7" in kind) or ("7x" in kind)
    if two_tc and batch % 2 == 0 and batch >= 2:
        return batch // 2
    return batch


def pack_node_edge_inputs(x_raw, e_raw, *, batch, graphs_per_step,
                          nodes_per_graph, edges_per_graph):
    """Merge node and edge scalar inputs into one [S, GB*(Nb+Eb), 1] array."""
    GB = graphs_per_step
    S = batch // GB
    GN, GE = GB * nodes_per_graph, GB * edges_per_graph
    return jnp.concatenate(
        [x_raw.reshape(S, GN, 1), e_raw.reshape(S, GE, 1)], axis=1)


def build_graph_operands(src_local, dst_local, *, batch, graphs_per_step,
                         nodes_per_graph, edges_per_graph, num_freqband,
                         nodes_per_band):
    B, GB = batch, graphs_per_step
    S = B // GB
    Nb, Eb, F, P = nodes_per_graph, edges_per_graph, num_freqband, nodes_per_band
    GN, GE = GB * Nb, GB * Eb
    # Slot of each graph within its grid step (graphs assigned contiguously).
    slot = (jnp.arange(B) % GB)[:, None]
    src_g = (src_local + slot * Nb).reshape(S, GE)
    dst_g = (dst_local + slot * Nb).reshape(S, GE)
    # 0/1 one-hots and 1/P = 1/8 pooling weights are exactly representable in
    # bf16 -> halves DMA/VMEM and hits the MXU bf16 path on v5e/v6e/v7x.
    G = jax.nn.one_hot(src_g, GN, dtype=jnp.bfloat16)                       # [S,GE,GN]
    ST = jnp.swapaxes(jax.nn.one_hot(dst_g, GN, dtype=jnp.bfloat16), 1, 2)  # [S,GN,GE]
    # Block-diagonal per-step pooling matrix (identical for every step).
    Pool = (jax.nn.one_hot(jnp.arange(GN) // P, GB * F, dtype=jnp.float32).T
            / float(P)).astype(jnp.bfloat16)                                # [GB*F,GN]
    return G, ST, Pool


# ---------------------------- pure-JAX reference ----------------------------- #
def reference(x_raw, e_raw, src, dst, params, *, batch, num_freqband,
              nodes_per_band):
    x = x_raw @ params["Wn"] + params["bn"]
    e = e_raw @ params["We"] + params["be"]
    L = params["W1"].shape[0]
    for l in range(L):
        msg = jnp.maximum(x[src] + e, 0.0)
        agg = jnp.zeros_like(x).at[dst].add(msg)
        h = (1.0 + params["eps"][l]) * x + agg
        h = jnp.maximum(h @ params["W1"][l] + params["b1"][l], 0.0)
        h = h @ params["W2"][l] + params["b2"][l]
        x = x + jnp.maximum(h, 0.0)
    y = x @ params["Wout"] + params["bout"]
    return y.reshape(batch, num_freqband, nodes_per_band, -1).mean(axis=2)


# --------------------------------- main -------------------------------------- #
if __name__ == "__main__":
    B = 2        # batch (one connectome graph per batch element)
    F = 3        # num_freqband (small test; module default is 9)
    P = 8        # nodes per freq band
    Nb = F * P   # nodes per graph = 24
    Eb = 32      # edges per graph
    H = 128      # node/edge hidden features (module default -> lane-dense)
    O = 128      # output features (module default)
    L = 4        # num GNN layers

    key = jax.random.PRNGKey(0)
    keys = jax.random.split(key, 16)

    # Synthetic inputs: per-graph local edge indices (PyG-style batching).
    x_raw = jax.random.normal(keys[0], (B * Nb, 1), dtype=jnp.float32)
    e_raw = jax.random.normal(keys[1], (B * Eb, 1), dtype=jnp.float32)
    src_local = jax.random.randint(keys[2], (B, Eb), 0, Nb)
    dst_local = jax.random.randint(keys[3], (B, Eb), 0, Nb)

    s = 0.1
    params = {
        "Wn":   s * jax.random.normal(keys[4],  (1, H), dtype=jnp.float32),
        "bn":   s * jax.random.normal(keys[5],  (1, H), dtype=jnp.float32),
        "We":   s * jax.random.normal(keys[6],  (1, H), dtype=jnp.float32),
        "be":   s * jax.random.normal(keys[7],  (1, H), dtype=jnp.float32),
        "W1":   s * jax.random.normal(keys[8],  (L, H, H), dtype=jnp.float32),
        "b1":   s * jax.random.normal(keys[9],  (L, 1, H), dtype=jnp.float32),
        "W2":   s * jax.random.normal(keys[10], (L, H, H), dtype=jnp.float32),
        "b2":   s * jax.random.normal(keys[11], (L, 1, H), dtype=jnp.float32),
        "eps":  jnp.array([0.0, 0.01, 0.02, 0.03], dtype=jnp.float32),
        "Wout": s * jax.random.normal(keys[12], (H, O), dtype=jnp.float32),
        "bout": s * jax.random.normal(keys[13], (1, O), dtype=jnp.float32),
    }

    # Static operands and packed inputs/params built once (outside the forward).
    GB = choose_graphs_per_step(B)
    xe = pack_node_edge_inputs(x_raw, e_raw, batch=B, graphs_per_step=GB,
                               nodes_per_graph=Nb, edges_per_graph=Eb)
    G3, ST3, Pool = build_graph_operands(
        src_local, dst_local, batch=B, graphs_per_step=GB, nodes_per_graph=Nb,
        edges_per_graph=Eb, num_freqband=F, nodes_per_band=P)
    pw, pb, offs = pack_params(params, H=H, O=O, L=L)

    out = connectome_encoder(xe, G3, ST3, Pool, pw, pb,
                             batch=B, graphs_per_step=GB, num_freqband=F,
                             nodes_per_graph=Nb, edges_per_graph=Eb,
                             H=H, O=O, L=L, offs=offs)
    out = jax.block_until_ready(out)

    # Reference uses global (flat) node indices, as PyG batching would, in f32.
    src = (src_local + jnp.arange(B)[:, None] * Nb).reshape(-1)
    dst = (dst_local + jnp.arange(B)[:, None] * Nb).reshape(-1)
    ref = reference(x_raw, e_raw, src, dst, params,
                    batch=B, num_freqband=F, nodes_per_band=P)

    assert out.shape == (B, F, O), out.shape
    # Tolerance loosened vs. the 1e-4 f32 check: matmul operands are bf16
    # (f32 accumulation); one-hots, 1/8 pooling, biases and eps remain exact.
    assert jnp.allclose(out, ref, atol=5e-2, rtol=5e-2), \
        float(jnp.max(jnp.abs(out - ref)))

    print("KERNEL_OK")
</pallas_src>

<mosaic_0001>
module attributes {stable_mosaic.version = 11 : i64} {
  func.func @kernel(%arg0: i32, %arg1: memref<1x112x1xf32, #tpu.memory_space<vmem>>, %arg2: memref<1x64x48xbf16, #tpu.memory_space<vmem>>, %arg3: memref<1x48x64xbf16, #tpu.memory_space<vmem>>, %arg4: memref<6x48xbf16, #tpu.memory_space<vmem>>, %arg5: memref<1152x128xbf16, #tpu.memory_space<vmem>>, %arg6: memref<40x128xf32, #tpu.memory_space<vmem>>, %arg7: memref<1x6x128xf32, #tpu.memory_space<vmem>>) attributes {dimension_semantics = [#tpu.dimension_semantics<parallel>], iteration_bounds = array<i64: 1>, scalar_prefetch = 0 : i64, scratch_operands = 0 : i64, tpu.core_type = #tpu.core_type<tc>, window_params = [{transform_indices = @transform_0, window_bounds = array<i64: 1, 112, 1>}, {transform_indices = @transform_1, window_bounds = array<i64: 1, 64, 48>}, {transform_indices = @transform_2, window_bounds = array<i64: 1, 48, 64>}, {pipeline_mode = #tpu.pipeline_mode<synchronous>, transform_indices = @transform_3, window_bounds = array<i64: 6, 48>}, {pipeline_mode = #tpu.pipeline_mode<synchronous>, transform_indices = @transform_4, window_bounds = array<i64: 1152, 128>}, {pipeline_mode = #tpu.pipeline_mode<synchronous>, transform_indices = @transform_5, window_bounds = array<i64: 40, 128>}, {transform_indices = @transform_6, window_bounds = array<i64: 1, 6, 128>}]} {
    %c0 = arith.constant 0 : index
    %c0_0 = arith.constant 0 : index
    %c0_1 = arith.constant 0 : index
    %0 = vector.load %arg1[%c0, %c0_0, %c0_1] : memref<1x112x1xf32, #tpu.memory_space<vmem>>, vector<1x48x1xf32>
    %1 = vector.shape_cast %0 : vector<1x48x1xf32> to vector<48x1xf32>
    %c0_2 = arith.constant 0 : index
    %c48 = arith.constant 48 : index
    %c0_3 = arith.constant 0 : index
    %2 = vector.load %arg1[%c0_2, %c48, %c0_3] : memref<1x112x1xf32, #tpu.memory_space<vmem>>, vector<1x64x1xf32>
    %3 = vector.shape_cast %2 : vector<1x64x1xf32> to vector<64x1xf32>
    %c0_4 = arith.constant 0 : index
    %c0_5 = arith.constant 0 : index
    %4 = vector.load %arg6[%c0_4, %c0_5] : memref<40x128xf32, #tpu.memory_space<vmem>>, vector<1x128xf32>
    %5 = vector.broadcast %1 : vector<48x1xf32> to vector<48x128xf32>
    %6 = vector.broadcast %4 : vector<1x128xf32> to vector<48x128xf32>
    %7 = arith.mulf %5, %6 : vector<48x128xf32>
    %c1 = arith.constant 1 : index
    %c0_6 = arith.constant 0 : index
    %8 = vector.load %arg6[%c1, %c0_6] : memref<40x128xf32, #tpu.memory_space<vmem>>, vector<1x128xf32>
    %9 = vector.broadcast %8 : vector<1x128xf32> to vector<48x128xf32>
    %10 = arith.addf %7, %9 : vector<48x128xf32>
    %c2 = arith.constant 2 : index
    %c0_7 = arith.constant 0 : index
    %11 = vector.load %arg6[%c2, %c0_7] : memref<40x128xf32, #tpu.memory_space<vmem>>, vector<1x128xf32>
    %12 = vector.broadcast %3 : vector<64x1xf32> to vector<64x128xf32>
    %13 = vector.broadcast %11 : vector<1x128xf32> to vector<64x128xf32>
    %14 = arith.mulf %12, %13 : vector<64x128xf32>
    %c3 = arith.constant 3 : index
    %c0_8 = arith.constant 0 : index
    %15 = vector.load %arg6[%c3, %c0_8] : memref<40x128xf32, #tpu.memory_space<vmem>>, vector<1x128xf32>
    %16 = vector.broadcast %15 : vector<1x128xf32> to vector<64x128xf32>
    %17 = arith.addf %14, %16 : vector<64x128xf32>
    %c0_9 = arith.constant 0 : index
    %c0_10 = arith.constant 0 : index
    %c0_11 = arith.constant 0 : index
    %18 = vector.load %arg2[%c0_9, %c0_10, %c0_11] : memref<1x64x48xbf16, #tpu.memory_space<vmem>>, vector<1x64x48xbf16>
    %19 = vector.shape_cast %18 : vector<1x64x48xbf16> to vector<64x48xbf16>
    %c0_12 = arith.constant 0 : index
    %c0_13 = arith.constant 0 : index
    %c0_14 = arith.constant 0 : index
    %20 = vector.load %arg3[%c0_12, %c0_13, %c0_14] : memref<1x48x64xbf16, #tpu.memory_space<vmem>>, vector<1x48x64xbf16>
    %21 = vector.shape_cast %20 : vector<1x48x64xbf16> to vector<48x64xbf16>
    %22 = arith.truncf %10 : vector<48x128xf32> to vector<48x128xbf16>
    %cst = arith.constant dense<0.000000e+00> : vector<64x128xf32>
    %23 = tpu.matmul %19, %22, %cst {dimension_numbers = #tpu.dot_dimension_numbers<[1], [0], [0], [1], [0, 0, 1, 1], [], []>} : vector<64x48xbf16>, vector<48x128xbf16>, vector<64x128xf32> -> vector<64x128xf32>
    %24 = arith.addf %23, %17 : vector<64x128xf32>
    %cst_15 = arith.constant 0.000000e+00 : f32
    %25 = vector.broadcast %cst_15 : f32 to vector<64x128xf32>
    %26 = arith.maximumf %24, %25 : vector<64x128xf32>
    %27 = arith.truncf %26 : vector<64x128xf32> to vector<64x128xbf16>
    %cst_16 = arith.constant dense<0.000000e+00> : vector<48x128xf32>
    %28 = tpu.matmul %21, %27, %cst_16 {dimension_numbers = #tpu.dot_dimension_numbers<[1], [0], [0], [1], [0, 0, 1, 1], [], []>} : vector<48x64xbf16>, vector<64x128xbf16>, vector<48x128xf32> -> vector<48x128xf32>
    %c24 = arith.constant 24 : index
    %c0_17 = arith.constant 0 : index
    %29 = vector.load %arg6[%c24, %c0_17] : memref<40x128xf32, #tpu.memory_space<vmem>>, vector<1x128xf32>
    %30 = vector.broadcast %29 : vector<1x128xf32> to vector<48x128xf32>
    %31 = arith.mulf %30, %10 : vector<48x128xf32>
    %32 = arith.addf %10, %31 : vector<48x128xf32>
    %33 = arith.addf %32, %28 : vector<48x128xf32>
    %34 = arith.truncf %33 : vector<48x128xf32> to vector<48x128xbf16>
    %c0_18 = arith.constant 0 : index
    %c0_19 = arith.constant 0 : index
    %35 = vector.load %arg5[%c0_18, %c0_19] : memref<1152x128xbf16, #tpu.memory_space<vmem>>, vector<128x128xbf16>
    %cst_20 = arith.constant dense<0.000000e+00> : vector<48x128xf32>
    %36 = tpu.matmul %34, %35, %cst_20 {dimension_numbers = #tpu.dot_dimension_numbers<[1], [0], [0], [1], [0, 0, 1, 1], [], []>} : vector<48x128xbf16>, vector<128x128xbf16>, vector<48x128xf32> -> vector<48x128xf32>
    %c8 = arith.constant 8 : index
    %c0_21 = arith.constant 0 : index
    %37 = vector.load %arg6[%c8, %c0_21] : memref<40x128xf32, #tpu.memory_space<vmem>>, vector<1x128xf32>
    %38 = vector.broadcast %37 : vector<1x128xf32> to vector<48x128xf32>
    %39 = arith.addf %36, %38 : vector<48x128xf32>
    %cst_22 = arith.constant 0.000000e+00 : f32
    %40 = vector.broadcast %cst_22 : f32 to vector<48x128xf32>
    %41 = arith.maximumf %39, %40 : vector<48x128xf32>
    %42 = arith.truncf %41 : vector<48x128xf32> to vector<48x128xbf16>
    %c512 = arith.constant 512 : index
    %c0_23 = arith.constant 0 : index
    %43 = vector.load %arg5[%c512, %c0_23] : memref<1152x128xbf16, #tpu.memory_space<vmem>>, vector<128x128xbf16>
    %cst_24 = arith.constant dense<0.000000e+00> : vector<48x128xf32>
    %44 = tpu.matmul %42, %43, %cst_24 {dimension_numbers = #tpu.dot_dimension_numbers<[1], [0], [0], [1], [0, 0, 1, 1], [], []>} : vector<48x128xbf16>, vector<128x128xbf16>, vector<48x128xf32> -> vector<48x128xf32>
    %c16 = arith.constant 16 : index
    %c0_25 = arith.constant 0 : index
    %45 = vector.load %arg6[%c16, %c0_25] : memref<40x128xf32, #tpu.memory_space<vmem>>, vector<1x128xf32>
    %46 = vector.broadcast %45 : vector<1x128xf32> to vector<48x128xf32>
    %47 = arith.addf %44, %46 : vector<48x128xf32>
    %cst_26 = arith.constant 0.000000e+00 : f32
    %48 = vector.broadcast %cst_26 : f32 to vector<48x128xf32>
    %49 = arith.maximumf %47, %48 : vector<48x128xf32>
    %50 = arith.addf %10, %49 : vector<48x128xf32>
    %51 = arith.truncf %50 : vector<48x128xf32> to vector<48x128xbf16>
    %cst_27 = arith.constant dense<0.000000e+00> : vector<64x128xf32>
    %52 = tpu.matmul %19, %51, %cst_27 {dimension_numbers = #tpu.dot_dimension_numbers<[1], [0], [0], [1], [0, 0, 1, 1], [], []>} : vector<64x48xbf16>, vector<48x128xbf16>, vector<64x128xf32> -> vector<64x128xf32>
    %53 = arith.addf %52, %17 : vector<64x128xf32>
    %cst_28 = arith.constant 0.000000e+00 : f32
    %54 = vector.broadcast %cst_28 : f32 to vector<64x128xf32>
    %55 = arith.maximumf %53, %54 : vector<64x128xf32>
    %56 = arith.truncf %55 : vector<64x128xf32> to vector<64x128xbf16>
    %cst_29 = arith.constant dense<0.000000e+00> : vector<48x128xf32>
    %57 = tpu.matmul %21, %56, %cst_29 {dimension_numbers = #tpu.dot_dimension_numbers<[1], [0], [0], [1], [0, 0, 1, 1], [], []>} : vector<48x64xbf16>, vector<64x128xbf16>, vector<48x128xf32> -> vector<48x128xf32>
    %c25 = arith.constant 25 : index
    %c0_30 = arith.constant 0 : index
    %58 = vector.load %arg6[%c25, %c0_30] : memref<40x128xf32, #tpu.memory_space<vmem>>, vector<1x128xf32>
    %59 = vector.broadcast %58 : vector<1x128xf32> to vector<48x128xf32>
    %60 = arith.mulf %59, %50 : vector<48x128xf32>
    %61 = arith.addf %50, %60 : vector<48x128xf32>
    %62 = arith.addf %61, %57 : vector<48x128xf32>
    %63 = arith.truncf %62 : vector<48x128xf32> to vector<48x128xbf16>
    %c128 = arith.constant 128 : index
    %c0_31 = arith.constant 0 : index
    %64 = vector.load %arg5[%c128, %c0_31] : memref<1152x128xbf16, #tpu.memory_space<vmem>>, vector<128x128xbf16>
    %cst_32 = arith.constant dense<0.000000e+00> : vector<48x128xf32>
    %65 = tpu.matmul %63, %64, %cst_32 {dimension_numbers = #tpu.dot_dimension_numbers<[1], [0], [0], [1], [0, 0, 1, 1], [], []>} : vector<48x128xbf16>, vector<128x128xbf16>, vector<48x128xf32> -> vector<48x128xf32>
    %c9 = arith.constant 9 : index
    %c0_33 = arith.constant 0 : index
    %66 = vector.load %arg6[%c9, %c0_33] : memref<40x128xf32, #tpu.memory_space<vmem>>, vector<1x128xf32>
    %67 = vector.broadcast %66 : vector<1x128xf32> to vector<48x128xf32>
    %68 = arith.addf %65, %67 : vector<48x128xf32>
    %cst_34 = arith.constant 0.000000e+00 : f32
    %69 = vector.broadcast %cst_34 : f32 to vector<48x128xf32>
    %70 = arith.maximumf %68, %69 : vector<48x128xf32>
    %71 = arith.truncf %70 : vector<48x128xf32> to vector<48x128xbf16>
    %c640 = arith.constant 640 : index
    %c0_35 = arith.constant 0 : index
    %72 = vector.load %arg5[%c640, %c0_35] : memref<1152x128xbf16, #tpu.memory_space<vmem>>, vector<128x128xbf16>
    %cst_36 = arith.constant dense<0.000000e+00> : vector<48x128xf32>
    %73 = tpu.matmul %71, %72, %cst_36 {dimension_numbers = #tpu.dot_dimension_numbers<[1], [0], [0], [1], [0, 0, 1, 1], [], []>} : vector<48x128xbf16>, vector<128x128xbf16>, vector<48x128xf32> -> vector<48x128xf32>
    %c17 = arith.constant 17 : index
    %c0_37 = arith.constant 0 : index
    %74 = vector.load %arg6[%c17, %c0_37] : memref<40x128xf32, #tpu.memory_space<vmem>>, vector<1x128xf32>
    %75 = vector.broadcast %74 : vector<1x128xf32> to vector<48x128xf32>
    %76 = arith.addf %73, %75 : vector<48x128xf32>
    %cst_38 = arith.constant 0.000000e+00 : f32
    %77 = vector.broadcast %cst_38 : f32 to vector<48x128xf32>
    %78 = arith.maximumf %76, %77 : vector<48x128xf32>
    %79 = arith.addf %50, %78 : vector<48x128xf32>
    %80 = arith.truncf %79 : vector<48x128xf32> to vector<48x128xbf16>
    %cst_39 = arith.constant dense<0.000000e+00> : vector<64x128xf32>
    %81 = tpu.matmul %19, %80, %cst_39 {dimension_numbers = #tpu.dot_dimension_numbers<[1], [0], [0], [1], [0, 0, 1, 1], [], []>} : vector<64x48xbf16>, vector<48x128xbf16>, vector<64x128xf32> -> vector<64x128xf32>
    %82 = arith.addf %81, %17 : vector<64x128xf32>
    %cst_40 = arith.constant 0.000000e+00 : f32
    %83 = vector.broadcast %cst_40 : f32 to vector<64x128xf32>
    %84 = arith.maximumf %82, %83 : vector<64x128xf32>
    %85 = arith.truncf %84 : vector<64x128xf32> to vector<64x128xbf16>
    %cst_41 = arith.constant dense<0.000000e+00> : vector<48x128xf32>
    %86 = tpu.matmul %21, %85, %cst_41 {dimension_numbers = #tpu.dot_dimension_numbers<[1], [0], [0], [1], [0, 0, 1, 1], [], []>} : vector<48x64xbf16>, vector<64x128xbf16>, vector<48x128xf32> -> vector<48x128xf32>
    %c26 = arith.constant 26 : index
    %c0_42 = arith.constant 0 : index
    %87 = vector.load %arg6[%c26, %c0_42] : memref<40x128xf32, #tpu.memory_space<vmem>>, vector<1x128xf32>
    %88 = vector.broadcast %87 : vector<1x128xf32> to vector<48x128xf32>
    %89 = arith.mulf %88, %79 : vector<48x128xf32>
    %90 = arith.addf %79, %89 : vector<48x128xf32>
    %91 = arith.addf %90, %86 : vector<48x128xf32>
    %92 = arith.truncf %91 : vector<48x128xf32> to vector<48x128xbf16>
    %c256 = arith.constant 256 : index
    %c0_43 = arith.constant 0 : index
    %93 = vector.load %arg5[%c256, %c0_43] : memref<1152x128xbf16, #tpu.memory_space<vmem>>, vector<128x128xbf16>
    %cst_44 = arith.constant dense<0.000000e+00> : vector<48x128xf32>
    %94 = tpu.matmul %92, %93, %cst_44 {dimension_numbers = #tpu.dot_dimension_numbers<[1], [0], [0], [1], [0, 0, 1, 1], [], []>} : vector<48x128xbf16>, vector<128x128xbf16>, vector<48x128xf32> -> vector<48x128xf32>
    %c10 = arith.constant 10 : index
    %c0_45 = arith.constant 0 : index
    %95 = vector.load %arg6[%c10, %c0_45] : memref<40x128xf32, #tpu.memory_space<vmem>>, vector<1x128xf32>
    %96 = vector.broadcast %95 : vector<1x128xf32> to vector<48x128xf32>
    %97 = arith.addf %94, %96 : vector<48x128xf32>
    %cst_46 = arith.constant 0.000000e+00 : f32
    %98 = vector.broadcast %cst_46 : f32 to vector<48x128xf32>
    %99 = arith.maximumf %97, %98 : vector<48x128xf32>
    %100 = arith.truncf %99 : vector<48x128xf32> to vector<48x128xbf16>
    %c768 = arith.constant 768 : index
    %c0_47 = arith.constant 0 : index
    %101 = vector.load %arg5[%c768, %c0_47] : memref<1152x128xbf16, #tpu.memory_space<vmem>>, vector<128x128xbf16>
    %cst_48 = arith.constant dense<0.000000e+00> : vector<48x128xf32>
    %102 = tpu.matmul %100, %101, %cst_48 {dimension_numbers = #tpu.dot_dimension_numbers<[1], [0], [0], [1], [0, 0, 1, 1], [], []>} : vector<48x128xbf16>, vector<128x128xbf16>, vector<48x128xf32> -> vector<48x128xf32>
    %c18 = arith.constant 18 : index
    %c0_49 = arith.constant 0 : index
    %103 = vector.load %arg6[%c18, %c0_49] : memref<40x128xf32, #tpu.memory_space<vmem>>, vector<1x128xf32>
    %104 = vector.broadcast %103 : vector<1x128xf32> to vector<48x128xf32>
    %105 = arith.addf %102, %104 : vector<48x128xf32>
    %cst_50 = arith.constant 0.000000e+00 : f32
    %106 = vector.broadcast %cst_50 : f32 to vector<48x128xf32>
    %107 = arith.maximumf %105, %106 : vector<48x128xf32>
    %108 = arith.addf %79, %107 : vector<48x128xf32>
    %109 = arith.truncf %108 : vector<48x128xf32> to vector<48x128xbf16>
    %cst_51 = arith.constant dense<0.000000e+00> : vector<64x128xf32>
    %110 = tpu.matmul %19, %109, %cst_51 {dimension_numbers = #tpu.dot_dimension_numbers<[1], [0], [0], [1], [0, 0, 1, 1], [], []>} : vector<64x48xbf16>, vector<48x128xbf16>, vector<64x128xf32> -> vector<64x128xf32>
    %111 = arith.addf %110, %17 : vector<64x128xf32>
    %cst_52 = arith.constant 0.000000e+00 : f32
    %112 = vector.broadcast %cst_52 : f32 to vector<64x128xf32>
    %113 = arith.maximumf %111, %112 : vector<64x128xf32>
    %114 = arith.truncf %113 : vector<64x128xf32> to vector<64x128xbf16>
    %cst_53 = arith.constant dense<0.000000e+00> : vector<48x128xf32>
    %115 = tpu.matmul %21, %114, %cst_53 {dimension_numbers = #tpu.dot_dimension_numbers<[1], [0], [0], [1], [0, 0, 1, 1], [], []>} : vector<48x64xbf16>, vector<64x128xbf16>, vector<48x128xf32> -> vector<48x128xf32>
    %c27 = arith.constant 27 : index
    %c0_54 = arith.constant 0 : index
    %116 = vector.load %arg6[%c27, %c0_54] : memref<40x128xf32, #tpu.memory_space<vmem>>, vector<1x128xf32>
    %117 = vector.broadcast %116 : vector<1x128xf32> to vector<48x128xf32>
    %118 = arith.mulf %117, %108 : vector<48x128xf32>
    %119 = arith.addf %108, %118 : vector<48x128xf32>
    %120 = arith.addf %119, %115 : vector<48x128xf32>
    %121 = arith.truncf %120 : vector<48x128xf32> to vector<48x128xbf16>
    %c384 = arith.constant 384 : index
    %c0_55 = arith.constant 0 : index
    %122 = vector.load %arg5[%c384, %c0_55] : memref<1152x128xbf16, #tpu.memory_space<vmem>>, vector<128x128xbf16>
    %cst_56 = arith.constant dense<0.000000e+00> : vector<48x128xf32>
    %123 = tpu.matmul %121, %122, %cst_56 {dimension_numbers = #tpu.dot_dimension_numbers<[1], [0], [0], [1], [0, 0, 1, 1], [], []>} : vector<48x128xbf16>, vector<128x128xbf16>, vector<48x128xf32> -> vector<48x128xf32>
    %c11 = arith.constant 11 : index
    %c0_57 = arith.constant 0 : index
    %124 = vector.load %arg6[%c11, %c0_57] : memref<40x128xf32, #tpu.memory_space<vmem>>, vector<1x128xf32>
    %125 = vector.broadcast %124 : vector<1x128xf32> to vector<48x128xf32>
    %126 = arith.addf %123, %125 : vector<48x128xf32>
    %cst_58 = arith.constant 0.000000e+00 : f32
    %127 = vector.broadcast %cst_58 : f32 to vector<48x128xf32>
    %128 = arith.maximumf %126, %127 : vector<48x128xf32>
    %129 = arith.truncf %128 : vector<48x128xf32> to vector<48x128xbf16>
    %c896 = arith.constant 896 : index
    %c0_59 = arith.constant 0 : index
    %130 = vector.load %arg5[%c896, %c0_59] : memref<1152x128xbf16, #tpu.memory_space<vmem>>, vector<128x128xbf16>
    %cst_60 = arith.constant dense<0.000000e+00> : vector<48x128xf32>
    %131 = tpu.matmul %129, %130, %cst_60 {dimension_numbers = #tpu.dot_dimension_numbers<[1], [0], [0], [1], [0, 0, 1, 1], [], []>} : vector<48x128xbf16>, vector<128x128xbf16>, vector<48x128xf32> -> vector<48x128xf32>
    %c19 = arith.constant 19 : index
    %c0_61 = arith.constant 0 : index
    %132 = vector.load %arg6[%c19, %c0_61] : memref<40x128xf32, #tpu.memory_space<vmem>>, vector<1x128xf32>
    %133 = vector.broadcast %132 : vector<1x128xf32> to vector<48x128xf32>
    %134 = arith.addf %131, %133 : vector<48x128xf32>
    %cst_62 = arith.constant 0.000000e+00 : f32
    %135 = vector.broadcast %cst_62 : f32 to vector<48x128xf32>
    %136 = arith.maximumf %134, %135 : vector<48x128xf32>
    %137 = arith.addf %108, %136 : vector<48x128xf32>
    %c0_63 = arith.constant 0 : index
    %c0_64 = arith.constant 0 : index
    %138 = vector.load %arg4[%c0_63, %c0_64] : memref<6x48xbf16, #tpu.memory_space<vmem>>, vector<6x48xbf16>
    %139 = arith.truncf %137 : vector<48x128xf32> to vector<48x128xbf16>
    %cst_65 = arith.constant dense<0.000000e+00> : vector<6x128xf32>
    %140 = tpu.matmul %138, %139, %cst_65 {dimension_numbers = #tpu.dot_dimension_numbers<[1], [0], [0], [1], [0, 0, 1, 1], [], []>} : vector<6x48xbf16>, vector<48x128xbf16>, vector<6x128xf32> -> vector<6x128xf32>
    %141 = arith.truncf %140 : vector<6x128xf32> to vector<6x128xbf16>
    %c1024 = arith.constant 1024 : index
    %c0_66 = arith.constant 0 : index
    %142 = vector.load %arg5[%c1024, %c0_66] : memref<1152x128xbf16, #tpu.memory_space<vmem>>, vector<128x128xbf16>
    %cst_67 = arith.constant dense<0.000000e+00> : vector<6x128xf32>
    %143 = tpu.matmul %141, %142, %cst_67 {dimension_numbers = #tpu.dot_dimension_numbers<[1], [0], [0], [1], [0, 0, 1, 1], [], []>} : vector<6x128xbf16>, vector<128x128xbf16>, vector<6x128xf32> -> vector<6x128xf32>
    %c32 = arith.constant 32 : index
    %c0_68 = arith.constant 0 : index
    %144 = vector.load %arg6[%c32, %c0_68] : memref<40x128xf32, #tpu.memory_space<vmem>>, vector<1x128xf32>
    %145 = vector.broadcast %144 : vector<1x128xf32> to vector<6x128xf32>
    %146 = arith.addf %143, %145 : vector<6x128xf32>
    %c0_69 = arith.constant 0 : index
    %c0_70 = arith.constant 0 : index
    %c0_71 = arith.constant 0 : index
    %147 = vector.load %arg7[%c0_69, %c0_70, %c0_71] : memref<1x6x128xf32, #tpu.memory_space<vmem>>, vector<1x6x128xf32>
    %148 = vector.shape_cast %147 : vector<1x6x128xf32> to vector<6x128xf32>
    %149 = vector.shape_cast %146 : vector<6x128xf32> to vector<1x6x128xf32>
    tpu.vector_store %arg7[%c0_69, %c0_70, %c0_71], %149 {strides = array<i32>} : memref<1x6x128xf32, #tpu.memory_space<vmem>>, vector<1x6x128xf32>,
    return
  }
  func.func @transform_0(%arg0: i32) -> (i32, i32, i32) {
    %c0_i32 = arith.constant 0 : i32
    %c0_i32_0 = arith.constant 0 : i32
    %c0_i32_1 = arith.constant 0 : i32
    return %arg0, %c0_i32, %c0_i32_0 : i32, i32, i32
  }
  func.func @transform_1(%arg0: i32) -> (i32, i32, i32) {
    %c0_i32 = arith.constant 0 : i32
    %c0_i32_0 = arith.constant 0 : i32
    %c0_i32_1 = arith.constant 0 : i32
    return %arg0, %c0_i32, %c0_i32_0 : i32, i32, i32
  }
  func.func @transform_2(%arg0: i32) -> (i32, i32, i32) {
    %c0_i32 = arith.constant 0 : i32
    %c0_i32_0 = arith.constant 0 : i32
    %c0_i32_1 = arith.constant 0 : i32
    return %arg0, %c0_i32, %c0_i32_0 : i32, i32, i32
  }
  func.func @transform_3(%arg0: i32) -> (i32, i32) {
    %c0_i32 = arith.constant 0 : i32
    %c0_i32_0 = arith.constant 0 : i32
    %c0_i32_1 = arith.constant 0 : i32
    return %c0_i32, %c0_i32_0 : i32, i32
  }
  func.func @transform_4(%arg0: i32) -> (i32, i32) {
    %c0_i32 = arith.constant 0 : i32
    %c0_i32_0 = arith.constant 0 : i32
    %c0_i32_1 = arith.constant 0 : i32
    return %c0_i32, %c0_i32_0 : i32, i32
  }
  func.func @transform_5(%arg0: i32) -> (i32, i32) {
    %c0_i32 = arith.constant 0 : i32
    %c0_i32_0 = arith.constant 0 : i32
    %c0_i32_1 = arith.constant 0 : i32
    return %c0_i32, %c0_i32_0 : i32, i32
  }
  func.func @transform_6(%arg0: i32) -> (i32, i32, i32) {
    %c0_i32 = arith.constant 0 : i32
    %c0_i32_0 = arith.constant 0 : i32
    %c0_i32_1 = arith.constant 0 : i32
    return %arg0, %c0_i32, %c0_i32_0 : i32, i32, i32
  }
}

module attributes {stable_mosaic.version = 11 : i64} {
  func.func @kernel(%arg0: i32, %arg1: memref<1x112x1xf32, #tpu.memory_space<vmem>>, %arg2: memref<1x64x48xbf16, #tpu.memory_space<vmem>>, %arg3: memref<1x48x64xbf16, #tpu.memory_space<vmem>>, %arg4: memref<6x48xbf16, #tpu.memory_space<vmem>>, %arg5: memref<1152x128xbf16, #tpu.memory_space<vmem>>, %arg6: memref<40x128xf32, #tpu.memory_space<vmem>>, %arg7: memref<1x6x128xf32, #tpu.memory_space<vmem>>) attributes {dimension_semantics = [#tpu.dimension_semantics<parallel>], iteration_bounds = array<i64: 1>, scalar_prefetch = 0 : i64, scratch_operands = 0 : i64, tpu.core_type = #tpu.core_type<tc>, window_params = [{transform_indices = @transform_0, window_bounds = array<i64: 1, 112, 1>}, {transform_indices = @transform_1, window_bounds = array<i64: 1, 64, 48>}, {transform_indices = @transform_2, window_bounds = array<i64: 1, 48, 64>}, {pipeline_mode = #tpu.pipeline_mode<synchronous>, transform_indices = @transform_3, window_bounds = array<i64: 6, 48>}, {pipeline_mode = #tpu.pipeline_mode<synchronous>, transform_indices = @transform_4, window_bounds = array<i64: 1152, 128>}, {pipeline_mode = #tpu.pipeline_mode<synchronous>, transform_indices = @transform_5, window_bounds = array<i64: 40, 128>}, {transform_indices = @transform_6, window_bounds = array<i64: 1, 6, 128>}]} {
    %c0 = arith.constant 0 : index
    %c0_0 = arith.constant 0 : index
    %c0_1 = arith.constant 0 : index
    %0 = vector.load %arg1[%c0, %c0_0, %c0_1] : memref<1x112x1xf32, #tpu.memory_space<vmem>>, vector<1x48x1xf32>
    %1 = vector.shape_cast %0 : vector<1x48x1xf32> to vector<48x1xf32>
    %c0_2 = arith.constant 0 : index
    %c48 = arith.constant 48 : index
    %c0_3 = arith.constant 0 : index
    %2 = vector.load %arg1[%c0_2, %c48, %c0_3] : memref<1x112x1xf32, #tpu.memory_space<vmem>>, vector<1x64x1xf32>
    %3 = vector.shape_cast %2 : vector<1x64x1xf32> to vector<64x1xf32>
    %c0_4 = arith.constant 0 : index
    %c0_5 = arith.constant 0 : index
    %4 = vector.load %arg6[%c0_4, %c0_5] : memref<40x128xf32, #tpu.memory_space<vmem>>, vector<1x128xf32>
    %5 = vector.broadcast %1 : vector<48x1xf32> to vector<48x128xf32>
    %6 = vector.broadcast %4 : vector<1x128xf32> to vector<48x128xf32>
    %7 = arith.mulf %5, %6 : vector<48x128xf32>
    %c1 = arith.constant 1 : index
    %c0_6 = arith.constant 0 : index
    %8 = vector.load %arg6[%c1, %c0_6] : memref<40x128xf32, #tpu.memory_space<vmem>>, vector<1x128xf32>
    %9 = vector.broadcast %8 : vector<1x128xf32> to vector<48x128xf32>
    %10 = arith.addf %7, %9 : vector<48x128xf32>
    %c2 = arith.constant 2 : index
    %c0_7 = arith.constant 0 : index
    %11 = vector.load %arg6[%c2, %c0_7] : memref<40x128xf32, #tpu.memory_space<vmem>>, vector<1x128xf32>
    %12 = vector.broadcast %3 : vector<64x1xf32> to vector<64x128xf32>
    %13 = vector.broadcast %11 : vector<1x128xf32> to vector<64x128xf32>
    %14 = arith.mulf %12, %13 : vector<64x128xf32>
    %c3 = arith.constant 3 : index
    %c0_8 = arith.constant 0 : index
    %15 = vector.load %arg6[%c3, %c0_8] : memref<40x128xf32, #tpu.memory_space<vmem>>, vector<1x128xf32>
    %16 = vector.broadcast %15 : vector<1x128xf32> to vector<64x128xf32>
    %17 = arith.addf %14, %16 : vector<64x128xf32>
    %c0_9 = arith.constant 0 : index
    %c0_10 = arith.constant 0 : index
    %c0_11 = arith.constant 0 : index
    %18 = vector.load %arg2[%c0_9, %c0_10, %c0_11] : memref<1x64x48xbf16, #tpu.memory_space<vmem>>, vector<1x64x48xbf16>
    %19 = vector.shape_cast %18 : vector<1x64x48xbf16> to vector<64x48xbf16>
    %c0_12 = arith.constant 0 : index
    %c0_13 = arith.constant 0 : index
    %c0_14 = arith.constant 0 : index
    %20 = vector.load %arg3[%c0_12, %c0_13, %c0_14] : memref<1x48x64xbf16, #tpu.memory_space<vmem>>, vector<1x48x64xbf16>
    %21 = vector.shape_cast %20 : vector<1x48x64xbf16> to vector<48x64xbf16>
    %22 = arith.truncf %10 : vector<48x128xf32> to vector<48x128xbf16>
    %cst = arith.constant dense<0.000000e+00> : vector<64x128xf32>
    %23 = tpu.matmul %19, %22, %cst {dimension_numbers = #tpu.dot_dimension_numbers<[1], [0], [0], [1], [0, 0, 1, 1], [], []>} : vector<64x48xbf16>, vector<48x128xbf16>, vector<64x128xf32> -> vector<64x128xf32>
    %24 = arith.addf %23, %17 : vector<64x128xf32>
    %cst_15 = arith.constant 0.000000e+00 : f32
    %25 = vector.broadcast %cst_15 : f32 to vector<64x128xf32>
    %26 = arith.maximumf %24, %25 : vector<64x128xf32>
    %27 = arith.truncf %26 : vector<64x128xf32> to vector<64x128xbf16>
    %cst_16 = arith.constant dense<0.000000e+00> : vector<48x128xf32>
    %28 = tpu.matmul %21, %27, %cst_16 {dimension_numbers = #tpu.dot_dimension_numbers<[1], [0], [0], [1], [0, 0, 1, 1], [], []>} : vector<48x64xbf16>, vector<64x128xbf16>, vector<48x128xf32> -> vector<48x128xf32>
    %c24 = arith.constant 24 : index
    %c0_17 = arith.constant 0 : index
    %29 = vector.load %arg6[%c24, %c0_17] : memref<40x128xf32, #tpu.memory_space<vmem>>, vector<1x128xf32>
    %30 = vector.broadcast %29 : vector<1x128xf32> to vector<48x128xf32>
    %31 = arith.mulf %30, %10 : vector<48x128xf32>
    %32 = arith.addf %10, %31 : vector<48x128xf32>
    %33 = arith.addf %32, %28 : vector<48x128xf32>
    %34 = arith.truncf %33 : vector<48x128xf32> to vector<48x128xbf16>
    %c0_18 = arith.constant 0 : index
    %c0_19 = arith.constant 0 : index
    %35 = vector.load %arg5[%c0_18, %c0_19] : memref<1152x128xbf16, #tpu.memory_space<vmem>>, vector<128x128xbf16>
    %cst_20 = arith.constant dense<0.000000e+00> : vector<48x128xf32>
    %36 = tpu.matmul %34, %35, %cst_20 {dimension_numbers = #tpu.dot_dimension_numbers<[1], [0], [0], [1], [0, 0, 1, 1], [], []>} : vector<48x128xbf16>, vector<128x128xbf16>, vector<48x128xf32> -> vector<48x128xf32>
    %c8 = arith.constant 8 : index
    %c0_21 = arith.constant 0 : index
    %37 = vector.load %arg6[%c8, %c0_21] : memref<40x128xf32, #tpu.memory_space<vmem>>, vector<1x128xf32>
    %38 = vector.broadcast %37 : vector<1x128xf32> to vector<48x128xf32>
    %39 = arith.addf %36, %38 : vector<48x128xf32>
    %cst_22 = arith.constant 0.000000e+00 : f32
    %40 = vector.broadcast %cst_22 : f32 to vector<48x128xf32>
    %41 = arith.maximumf %39, %40 : vector<48x128xf32>
    %42 = arith.truncf %41 : vector<48x128xf32> to vector<48x128xbf16>
    %c512 = arith.constant 512 : index
    %c0_23 = arith.constant 0 : index
    %43 = vector.load %arg5[%c512, %c0_23] : memref<1152x128xbf16, #tpu.memory_space<vmem>>, vector<128x128xbf16>
    %cst_24 = arith.constant dense<0.000000e+00> : vector<48x128xf32>
    %44 = tpu.matmul %42, %43, %cst_24 {dimension_numbers = #tpu.dot_dimension_numbers<[1], [0], [0], [1], [0, 0, 1, 1], [], []>} : vector<48x128xbf16>, vector<128x128xbf16>, vector<48x128xf32> -> vector<48x128xf32>
    %c16 = arith.constant 16 : index
    %c0_25 = arith.constant 0 : index
    %45 = vector.load %arg6[%c16, %c0_25] : memref<40x128xf32, #tpu.memory_space<vmem>>, vector<1x128xf32>
    %46 = vector.broadcast %45 : vector<1x128xf32> to vector<48x128xf32>
    %47 = arith.addf %44, %46 : vector<48x128xf32>
    %cst_26 = arith.constant 0.000000e+00 : f32
    %48 = vector.broadcast %cst_26 : f32 to vector<48x128xf32>
    %49 = arith.maximumf %47, %48 : vector<48x128xf32>
    %50 = arith.addf %10, %49 : vector<48x128xf32>
    %51 = arith.truncf %50 : vector<48x128xf32> to vector<48x128xbf16>
    %cst_27 = arith.constant dense<0.000000e+00> : vector<64x128xf32>
    %52 = tpu.matmul %19, %51, %cst_27 {dimension_numbers = #tpu.dot_dimension_numbers<[1], [0], [0], [1], [0, 0, 1, 1], [], []>} : vector<64x48xbf16>, vector<48x128xbf16>, vector<64x128xf32> -> vector<64x128xf32>
    %53 = arith.addf %52, %17 : vector<64x128xf32>
    %cst_28 = arith.constant 0.000000e+00 : f32
    %54 = vector.broadcast %cst_28 : f32 to vector<64x128xf32>
    %55 = arith.maximumf %53, %54 : vector<64x128xf32>
    %56 = arith.truncf %55 : vector<64x128xf32> to vector<64x128xbf16>
    %cst_29 = arith.constant dense<0.000000e+00> : vector<48x128xf32>
    %57 = tpu.matmul %21, %56, %cst_29 {dimension_numbers = #tpu.dot_dimension_numbers<[1], [0], [0], [1], [0, 0, 1, 1], [], []>} : vector<48x64xbf16>, vector<64x128xbf16>, vector<48x128xf32> -> vector<48x128xf32>
    %c25 = arith.constant 25 : index
    %c0_30 = arith.constant 0 : index
    %58 = vector.load %arg6[%c25, %c0_30] : memref<40x128xf32, #tpu.memory_space<vmem>>, vector<1x128xf32>
    %59 = vector.broadcast %58 : vector<1x128xf32> to vector<48x128xf32>
    %60 = arith.mulf %59, %50 : vector<48x128xf32>
    %61 = arith.addf %50, %60 : vector<48x128xf32>
    %62 = arith.addf %61, %57 : vector<48x128xf32>
    %63 = arith.truncf %62 : vector<48x128xf32> to vector<48x128xbf16>
    %c128 = arith.constant 128 : index
    %c0_31 = arith.constant 0 : index
    %64 = vector.load %arg5[%c128, %c0_31] : memref<1152x128xbf16, #tpu.memory_space<vmem>>, vector<128x128xbf16>
    %cst_32 = arith.constant dense<0.000000e+00> : vector<48x128xf32>
    %65 = tpu.matmul %63, %64, %cst_32 {dimension_numbers = #tpu.dot_dimension_numbers<[1], [0], [0], [1], [0, 0, 1, 1], [], []>} : vector<48x128xbf16>, vector<128x128xbf16>, vector<48x128xf32> -> vector<48x128xf32>
    %c9 = arith.constant 9 : index
    %c0_33 = arith.constant 0 : index
    %66 = vector.load %arg6[%c9, %c0_33] : memref<40x128xf32, #tpu.memory_space<vmem>>, vector<1x128xf32>
    %67 = vector.broadcast %66 : vector<1x128xf32> to vector<48x128xf32>
    %68 = arith.addf %65, %67 : vector<48x128xf32>
    %cst_34 = arith.constant 0.000000e+00 : f32
    %69 = vector.broadcast %cst_34 : f32 to vector<48x128xf32>
    %70 = arith.maximumf %68, %69 : vector<48x128xf32>
    %71 = arith.truncf %70 : vector<48x128xf32> to vector<48x128xbf16>
    %c640 = arith.constant 640 : index
    %c0_35 = arith.constant 0 : index
    %72 = vector.load %arg5[%c640, %c0_35] : memref<1152x128xbf16, #tpu.memory_space<vmem>>, vector<128x128xbf16>
    %cst_36 = arith.constant dense<0.000000e+00> : vector<48x128xf32>
    %73 = tpu.matmul %71, %72, %cst_36 {dimension_numbers = #tpu.dot_dimension_numbers<[1], [0], [0], [1], [0, 0, 1, 1], [], []>} : vector<48x128xbf16>, vector<128x128xbf16>, vector<48x128xf32> -> vector<48x128xf32>
    %c17 = arith.constant 17 : index
    %c0_37 = arith.constant 0 : index
    %74 = vector.load %arg6[%c17, %c0_37] : memref<40x128xf32, #tpu.memory_space<vmem>>, vector<1x128xf32>
    %75 = vector.broadcast %74 : vector<1x128xf32> to vector<48x128xf32>
    %76 = arith.addf %73, %75 : vector<48x128xf32>
    %cst_38 = arith.constant 0.000000e+00 : f32
    %77 = vector.broadcast %cst_38 : f32 to vector<48x128xf32>
    %78 = arith.maximumf %76, %77 : vector<48x128xf32>
    %79 = arith.addf %50, %78 : vector<48x128xf32>
    %80 = arith.truncf %79 : vector<48x128xf32> to vector<48x128xbf16>
    %cst_39 = arith.constant dense<0.000000e+00> : vector<64x128xf32>
    %81 = tpu.matmul %19, %80, %cst_39 {dimension_numbers = #tpu.dot_dimension_numbers<[1], [0], [0], [1], [0, 0, 1, 1], [], []>} : vector<64x48xbf16>, vector<48x128xbf16>, vector<64x128xf32> -> vector<64x128xf32>
    %82 = arith.addf %81, %17 : vector<64x128xf32>
    %cst_40 = arith.constant 0.000000e+00 : f32
    %83 = vector.broadcast %cst_40 : f32 to vector<64x128xf32>
    %84 = arith.maximumf %82, %83 : vector<64x128xf32>
    %85 = arith.truncf %84 : vector<64x128xf32> to vector<64x128xbf16>
    %cst_41 = arith.constant dense<0.000000e+00> : vector<48x128xf32>
    %86 = tpu.matmul %21, %85, %cst_41 {dimension_numbers = #tpu.dot_dimension_numbers<[1], [0], [0], [1], [0, 0, 1, 1], [], []>} : vector<48x64xbf16>, vector<64x128xbf16>, vector<48x128xf32> -> vector<48x128xf32>
    %c26 = arith.constant 26 : index
    %c0_42 = arith.constant 0 : index
    %87 = vector.load %arg6[%c26, %c0_42] : memref<40x128xf32, #tpu.memory_space<vmem>>, vector<1x128xf32>
    %88 = vector.broadcast %87 : vector<1x128xf32> to vector<48x128xf32>
    %89 = arith.mulf %88, %79 : vector<48x128xf32>
    %90 = arith.addf %79, %89 : vector<48x128xf32>
    %91 = arith.addf %90, %86 : vector<48x128xf32>
    %92 = arith.truncf %91 : vector<48x128xf32> to vector<48x128xbf16>
    %c256 = arith.constant 256 : index
    %c0_43 = arith.constant 0 : index
    %93 = vector.load %arg5[%c256, %c0_43] : memref<1152x128xbf16, #tpu.memory_space<vmem>>, vector<128x128xbf16>
    %cst_44 = arith.constant dense<0.000000e+00> : vector<48x128xf32>
    %94 = tpu.matmul %92, %93, %cst_44 {dimension_numbers = #tpu.dot_dimension_numbers<[1], [0], [0], [1], [0, 0, 1, 1], [], []>} : vector<48x128xbf16>, vector<128x128xbf16>, vector<48x128xf32> -> vector<48x128xf32>
    %c10 = arith.constant 10 : index
    %c0_45 = arith.constant 0 : index
    %95 = vector.load %arg6[%c10, %c0_45] : memref<40x128xf32, #tpu.memory_space<vmem>>, vector<1x128xf32>
    %96 = vector.broadcast %95 : vector<1x128xf32> to vector<48x128xf32>
    %97 = arith.addf %94, %96 : vector<48x128xf32>
    %cst_46 = arith.constant 0.000000e+00 : f32
    %98 = vector.broadcast %cst_46 : f32 to vector<48x128xf32>
    %99 = arith.maximumf %97, %98 : vector<48x128xf32>
    %100 = arith.truncf %99 : vector<48x128xf32> to vector<48x128xbf16>
    %c768 = arith.constant 768 : index
    %c0_47 = arith.constant 0 : index
    %101 = vector.load %arg5[%c768, %c0_47] : memref<1152x128xbf16, #tpu.memory_space<vmem>>, vector<128x128xbf16>
    %cst_48 = arith.constant dense<0.000000e+00> : vector<48x128xf32>
    %102 = tpu.matmul %100, %101, %cst_48 {dimension_numbers = #tpu.dot_dimension_numbers<[1], [0], [0], [1], [0, 0, 1, 1], [], []>} : vector<48x128xbf16>, vector<128x128xbf16>, vector<48x128xf32> -> vector<48x128xf32>
    %c18 = arith.constant 18 : index
    %c0_49 = arith.constant 0 : index
    %103 = vector.load %arg6[%c18, %c0_49] : memref<40x128xf32, #tpu.memory_space<vmem>>, vector<1x128xf32>
    %104 = vector.broadcast %103 : vector<1x128xf32> to vector<48x128xf32>
    %105 = arith.addf %102, %104 : vector<48x128xf32>
    %cst_50 = arith.constant 0.000000e+00 : f32
    %106 = vector.broadcast %cst_50 : f32 to vector<48x128xf32>
    %107 = arith.maximumf %105, %106 : vector<48x128xf32>
    %108 = arith.addf %79, %107 : vector<48x128xf32>
    %109 = arith.truncf %108 : vector<48x128xf32> to vector<48x128xbf16>
    %cst_51 = arith.constant dense<0.000000e+00> : vector<64x128xf32>
    %110 = tpu.matmul %19, %109, %cst_51 {dimension_numbers = #tpu.dot_dimension_numbers<[1], [0], [0], [1], [0, 0, 1, 1], [], []>} : vector<64x48xbf16>, vector<48x128xbf16>, vector<64x128xf32> -> vector<64x128xf32>
    %111 = arith.addf %110, %17 : vector<64x128xf32>
    %cst_52 = arith.constant 0.000000e+00 : f32
    %112 = vector.broadcast %cst_52 : f32 to vector<64x128xf32>
    %113 = arith.maximumf %111, %112 : vector<64x128xf32>
    %114 = arith.truncf %113 : vector<64x128xf32> to vector<64x128xbf16>
    %cst_53 = arith.constant dense<0.000000e+00> : vector<48x128xf32>
    %115 = tpu.matmul %21, %114, %cst_53 {dimension_numbers = #tpu.dot_dimension_numbers<[1], [0], [0], [1], [0, 0, 1, 1], [], []>} : vector<48x64xbf16>, vector<64x128xbf16>, vector<48x128xf32> -> vector<48x128xf32>
    %c27 = arith.constant 27 : index
    %c0_54 = arith.constant 0 : index
    %116 = vector.load %arg6[%c27, %c0_54] : memref<40x128xf32, #tpu.memory_space<vmem>>, vector<1x128xf32>
    %117 = vector.broadcast %116 : vector<1x128xf32> to vector<48x128xf32>
    %118 = arith.mulf %117, %108 : vector<48x128xf32>
    %119 = arith.addf %108, %118 : vector<48x128xf32>
    %120 = arith.addf %119, %115 : vector<48x128xf32>
    %121 = arith.truncf %120 : vector<48x128xf32> to vector<48x128xbf16>
    %c384 = arith.constant 384 : index
    %c0_55 = arith.constant 0 : index
    %122 = vector.load %arg5[%c384, %c0_55] : memref<1152x128xbf16, #tpu.memory_space<vmem>>, vector<128x128xbf16>
    %cst_56 = arith.constant dense<0.000000e+00> : vector<48x128xf32>
    %123 = tpu.matmul %121, %122, %cst_56 {dimension_numbers = #tpu.dot_dimension_numbers<[1], [0], [0], [1], [0, 0, 1, 1], [], []>} : vector<48x128xbf16>, vector<128x128xbf16>, vector<48x128xf32> -> vector<48x128xf32>
    %c11 = arith.constant 11 : index
    %c0_57 = arith.constant 0 : index
    %124 = vector.load %arg6[%c11, %c0_57] : memref<40x128xf32, #tpu.memory_space<vmem>>, vector<1x128xf32>
    %125 = vector.broadcast %124 : vector<1x128xf32> to vector<48x128xf32>
    %126 = arith.addf %123, %125 : vector<48x128xf32>
    %cst_58 = arith.constant 0.000000e+00 : f32
    %127 = vector.broadcast %cst_58 : f32 to vector<48x128xf32>
    %128 = arith.maximumf %126, %127 : vector<48x128xf32>
    %129 = arith.truncf %128 : vector<48x128xf32> to vector<48x128xbf16>
    %c896 = arith.constant 896 : index
    %c0_59 = arith.constant 0 : index
    %130 = vector.load %arg5[%c896, %c0_59] : memref<1152x128xbf16, #tpu.memory_space<vmem>>, vector<128x128xbf16>
    %cst_60 = arith.constant dense<0.000000e+00> : vector<48x128xf32>
    %131 = tpu.matmul %129, %130, %cst_60 {dimension_numbers = #tpu.dot_dimension_numbers<[1], [0], [0], [1], [0, 0, 1, 1], [], []>} : vector<48x128xbf16>, vector<128x128xbf16>, vector<48x128xf32> -> vector<48x128xf32>
    %c19 = arith.constant 19 : index
    %c0_61 = arith.constant 0 : index
    %132 = vector.load %arg6[%c19, %c0_61] : memref<40x128xf32, #tpu.memory_space<vmem>>, vector<1x128xf32>
    %133 = vector.broadcast %132 : vector<1x128xf32> to vector<48x128xf32>
    %134 = arith.addf %131, %133 : vector<48x128xf32>
    %cst_62 = arith.constant 0.000000e+00 : f32
    %135 = vector.broadcast %cst_62 : f32 to vector<48x128xf32>
    %136 = arith.maximumf %134, %135 : vector<48x128xf32>
    %137 = arith.addf %108, %136 : vector<48x128xf32>
    %c0_63 = arith.constant 0 : index
    %c0_64 = arith.constant 0 : index
    %138 = vector.load %arg4[%c0_63, %c0_64] : memref<6x48xbf16, #tpu.memory_space<vmem>>, vector<6x48xbf16>
    %139 = arith.truncf %137 : vector<48x128xf32> to vector<48x128xbf16>
    %cst_65 = arith.constant dense<0.000000e+00> : vector<6x128xf32>
    %140 = tpu.matmul %138, %139, %cst_65 {dimension_numbers = #tpu.dot_dimension_numbers<[1], [0], [0], [1], [0, 0, 1, 1], [], []>} : vector<6x48xbf16>, vector<48x128xbf16>, vector<6x128xf32> -> vector<6x128xf32>
    %141 = arith.truncf %140 : vector<6x128xf32> to vector<6x128xbf16>
    %c1024 = arith.constant 1024 : index
    %c0_66 = arith.constant 0 : index
    %142 = vector.load %arg5[%c1024, %c0_66] : memref<1152x128xbf16, #tpu.memory_space<vmem>>, vector<128x128xbf16>
    %cst_67 = arith.constant dense<0.000000e+00> : vector<6x128xf32>
    %143 = tpu.matmul %141, %142, %cst_67 {dimension_numbers = #tpu.dot_dimension_numbers<[1], [0], [0], [1], [0, 0, 1, 1], [], []>} : vector<6x128xbf16>, vector<128x128xbf16>, vector<6x128xf32> -> vector<6x128xf32>
    %c32 = arith.constant 32 : index
    %c0_68 = arith.constant 0 : index
    %144 = vector.load %arg6[%c32, %c0_68] : memref<40x128xf32, #tpu.memory_space<vmem>>, vector<1x128xf32>
    %145 = vector.broadcast %144 : vector<1x128xf32> to vector<6x128xf32>
    %146 = arith.addf %143, %145 : vector<6x128xf32>
    %c0_69 = arith.constant 0 : index
    %c0_70 = arith.constant 0 : index
    %c0_71 = arith.constant 0 : index
    %147 = vector.load %arg7[%c0_69, %c0_70, %c0_71] : memref<1x6x128xf32, #tpu.memory_space<vmem>>, vector<1x6x128xf32>
    %148 = vector.shape_cast %147 : vector<1x6x128xf32> to vector<6x128xf32>
    %149 = vector.shape_cast %146 : vector<6x128xf32> to vector<1x6x128xf32>
    tpu.vector_store %arg7[%c0_69, %c0_70, %c0_71], %149 {strides = array<i32>} : memref<1x6x128xf32, #tpu.memory_space<vmem>>, vector<1x6x128xf32>,
    return
  }
  func.func @transform_0(%arg0: i32) -> (i32, i32, i32) {
    %c0_i32 = arith.constant 0 : i32
    %c0_i32_0 = arith.constant 0 : i32
    %c0_i32_1 = arith.constant 0 : i32
    return %arg0, %c0_i32, %c0_i32_0 : i32, i32, i32
  }
  func.func @transform_1(%arg0: i32) -> (i32, i32, i32) {
    %c0_i32 = arith.constant 0 : i32
    %c0_i32_0 = arith.constant 0 : i32
    %c0_i32_1 = arith.constant 0 : i32
    return %arg0, %c0_i32, %c0_i32_0 : i32, i32, i32
  }
  func.func @transform_2(%arg0: i32) -> (i32, i32, i32) {
    %c0_i32 = arith.constant 0 : i32
    %c0_i32_0 = arith.constant 0 : i32
    %c0_i32_1 = arith.constant 0 : i32
    return %arg0, %c0_i32, %c0_i32_0 : i32, i32, i32
  }
  func.func @transform_3(%arg0: i32) -> (i32, i32) {
    %c0_i32 = arith.constant 0 : i32
    %c0_i32_0 = arith.constant 0 : i32
    %c0_i32_1 = arith.constant 0 : i32
    return %c0_i32, %c0_i32_0 : i32, i32
  }
  func.func @transform_4(%arg0: i32) -> (i32, i32) {
    %c0_i32 = arith.constant 0 : i32
    %c0_i32_0 = arith.constant 0 : i32
    %c0_i32_1 = arith.constant 0 : i32
    return %c0_i32, %c0_i32_0 : i32, i32
  }
  func.func @transform_5(%arg0: i32) -> (i32, i32) {
    %c0_i32 = arith.constant 0 : i32
    %c0_i32_0 = arith.constant 0 : i32
    %c0_i32_1 = arith.constant 0 : i32
    return %c0_i32, %c0_i32_0 : i32, i32
  }
  func.func @transform_6(%arg0: i32) -> (i32, i32, i32) {
    %c0_i32 = arith.constant 0 : i32
    %c0_i32_0 = arith.constant 0 : i32
    %c0_i32_1 = arith.constant 0 : i32
    return %arg0, %c0_i32, %c0_i32_0 : i32, i32, i32
  }
}

</mosaic_0001>

<bundles_post_ra>
// kernel: tpu_custom_call.1
= control target key start
LH: loop header
LB: loop body
LE: loop exit
PB: predicated region body
PF: predicated region fallthrough
CT: control target
= control target key end

     0   :  { %11 = vsyncpa [#allocation3], 0  ;;  %s2939_s21 = smov [#allocation2]   ;;  %s3559_s0 = inlined_call_operand.vmem [shape: f32[1,112,1], index: 0, kind: input, shape index: {}]   ;;  %s3560_s1 = inlined_call_operand.vmem [shape: bf16[1,64,48], index: 1, kind: input, shape index: {}]   ;;  %s3561_s2 = inlined_call_operand.vmem [shape: bf16[1,48,64], index: 2, kind: input, shape index: {}]   ;;  %s3562_s3 = inlined_call_operand.vmem [shape: bf16[6,48], index: 3, kind: input, shape index: {}]   ;;  %s3563_s4 = inlined_call_operand.hbm [shape: bf16[1152,128], index: 4, kind: input, shape index: {}]   ;;  %s3564_s5 = inlined_call_operand.vmem [shape: f32[40,128], index: 5, kind: input, shape index: {}]   ;;  %s3565_s6 = inlined_call_operand.vmem [shape: f32[1,6,128], index: 6, kind: output, shape index: {}]  }
   0x1   :  { %s25_s22 = sshll.u32 %s2939_s21, 4  ;;  %s2915_s25 = scalar_lea.hbm %s3563_s4, 9216  ;;  %s26_s22 = int_to_ptr.vmem [resolvable:$true] %s25_s22 }
   0x2   :  { %p2916_p0 = scmp.ne.s32.totalorder %s3563_s4, %s2915_s25  ;;  %p2919_p1 = scmp.lt.u32.totalorder %s2915_s25, %s3563_s4 }
   0x4   :  { %p2921_p2 = pnand %p2919_p1, %p2916_p0 }
   0x6   :  { %2924 = shalt.err (!%p2921_p2)
}
   0x7   :  { %s2925_s30 = scalar_lea.vmem %s26_s22, 9216  ;;  %p2930_p4 = scmp.lt.s32.totalorder %s26_s22, %s26_s22 }
   0x8   :  { %p2926_p3 = scmp.ne.s32.totalorder %s26_s22, %s2925_s30  ;;  %p2931_p5 = scmp.lt.s32.totalorder %s2925_s30, %s2925_s30 }
   0xa   :  { %p2932_p6 = por %p2931_p5, %p2930_p4 }
   0xc   :  { %p2933_p7 = pnand %p2932_p6, %p2926_p3 }
   0xe   :  { %2936 = shalt.err (!%p2933_p7)
}
   0xf   :  { %s2940_s7 = smov 64   ;;  %s2941_s8 = smov 4  }
  0x10   :  { %31 = dma.hbm_to_vmem [thread:$0]  %s3563_s4, 9216, %s26_s22, [#allocation3], %s2940_s7, %s2940_s7, %s2941_s8  }
  0x11   :  { %2937 = dma.done.wait [#allocation3], 9216  }
  0x12   :  { %2938 = vsyncadd [#allocation3], 4294958080  ;;  %v2942_v0 = vmov 0   ;;  %v40_v1 = vld [vmem:[%s3559_s0 + $0x10] sm:$0xff]  ;;  %v38_v2 = vld [vmem:[%s3559_s0] sm:$0xff]  ;;  %vm207_vm0 = vcmask 392192  }
  0x13   :  { %2828 = vset.pattern.permute.xlu1 %v2942_v0  ;;  %2827 = vset.pattern.permute.xlu0 %v2942_v0  ;;  %v41_v3 = vld [vmem:[%s3559_s0 + $0x18] sm:$0xff]  ;;  %v39_v4 = vld [vmem:[%s3559_s0 + $0x8] sm:$0xff]  ;;  %v42_v6 = vld [vmem:[%s3559_s0 + $0x20] sm:$0xff]  ;;  %v2943_v42 = vmov 0.0   ;;  %vm2944_vm1 = vmmov 0   ;;  %vm312_vm2 = vcmask 523264  }
  0x14   :  { %65 = vperm.xlu1 %2828, %v40_v1   ;;  %55 = vperm.xlu0 %2827, %v38_v2   ;;  %v43_v5 = vld [vmem:[%s3559_s0 + $0x28] sm:$0xff]  ;;  %v45_v7 = vld [vmem:[%s3559_s0 + $0x38] sm:$0xff]  ;;  %v44_v8 = vld [vmem:[%s3559_s0 + $0x30] sm:$0xff] }
  0x15   :  { %v47_v9 = vld [vmem:[%s3559_s0 + $0x48] sm:$0xff]  ;;  %v46_v10 = vld [vmem:[%s3559_s0 + $0x40] sm:$0xff]  ;;  %v49_v11 = vld [vmem:[%s3559_s0 + $0x58] sm:$0xff]  ;;  %2445 = vmatprep.subr.bf16.mxu1 %v2943_v42  ;;  %2453 = vmatprep.mubr.msk.bf16.mxu1 %vm2944_vm1, %v2943_v42 }
  0x16   :  { %v48_v12 = vld [vmem:[%s3559_s0 + $0x50] sm:$0xff]  ;;  %v51_v13 = vld [vmem:[%s3559_s0 + $0x68] sm:$0xff]  ;;  %v3034_v14 = vld [vmem:[%s3560_s1] sm:$0xff]  }
  0x17   :  { %v50_v15 = vld [vmem:[%s3559_s0 + $0x60] sm:$0xff]  ;;  %2437 = vmatprep.mubr.msk.bf16.mxu0 %vm207_vm0, %v3034_v14  ;;  %v3068_v39 = vld [vmem:[%s3560_s1 + $0x8] sm:$0xff]   ;;  %v3073_v40 = vld [vmem:[%s3560_s1 + $0x10] sm:$0xff]  }
  0x18   :  { %70 = vperm.xlu1 %2828, %v41_v3   ;;  %60 = vperm.xlu0 %2827, %v39_v4   ;;  %v2149_v16 = vld [vmem:[%s3564_s5] ss:$0 sm:$0xff]  ;;  %v2150_v20 = vld [vmem:[%s3564_s5 + $0x1] ss:$0 sm:$0xff]  ;;  %v3082_v41 = vld [vmem:[%s3560_s1 + $0x18] sm:$0xff]  }
  0x19   :  { %v2836_v43 = vld [vmem:[#allocation2] sm:$0xff]   ;;  %v2837_v44 = vld [vmem:[#allocation2 + $0x8] sm:$0xff]   ;;  %v2838_v45 = vld [vmem:[#allocation2 + $0x10] sm:$0xff]  }
  0x1a   :  { %v2839_v46 = vld [vmem:[#allocation2 + $0x18] sm:$0xff]   ;;  %v2840_v47 = vld [vmem:[#allocation2 + $0x20] sm:$0xff]   ;;  %v2841_v48 = vld [vmem:[#allocation2 + $0x28] sm:$0xff]  }
  0x1b   :  { %v2151_v53 = vld [vmem:[%s3564_s5 + $0x2] ss:$0 sm:$0xff]  ;;  %v2152_v58 = vld [vmem:[%s3564_s5 + $0x3] ss:$0 sm:$0xff] }
  0x1c   :  { %80 = vperm.xlu1 %2828, %v43_v5   ;;  %75 = vperm.xlu0 %2827, %v42_v6  }
  0x20   :  { %112 = vperm.xlu1 %2828, %v45_v7   ;;  %107 = vperm.xlu0 %2827, %v44_v8  }
  0x24   :  { %122 = vperm.xlu1 %2828, %v47_v9   ;;  %117 = vperm.xlu0 %2827, %v46_v10  }
  0x28   :  { %132 = vperm.xlu1 %2828, %v49_v11   ;;  %127 = vperm.xlu0 %2827, %v48_v12  }
  0x2c   :  { %142 = vperm.xlu1 %2828, %v51_v13   ;;  %137 = vperm.xlu0 %2827, %v50_v15  }
  0x93   :  { %v66_v17 = vpop.permute.xlu1 %65  ;;  %v56_v18 = vpop.permute.xlu0 %55 }
  0x94   :  { %v87_v19 = vmul.f32 %v2149_v16, %v56_v18  ;;  %v89_v23 = vmul.f32 %v2149_v16, %v66_v17 }
  0x96   :  { %v3047_v26 = vadd.f32 %v2150_v20, %v87_v19  ;;  %v3053_v31 = vadd.f32 %v2150_v20, %v89_v23 }
  0x97   :  { %v71_v21 = vpop.permute.xlu1 %70  ;;  %v61_v22 = vpop.permute.xlu0 %60 }
  0x98   :  { %v90_v24 = vmul.f32 %v2149_v16, %v71_v21  ;;  %v88_v25 = vmul.f32 %v2149_v16, %v61_v22 }
  0x9a   :  { %v3049_v27 = vadd.f32 %v2150_v20, %v90_v24  ;;  %v3051_v28 = vadd.f32 %v2150_v20, %v88_v25 }
  0x9b   :  { %v81_v29 = vpop.permute.xlu1 %80  ;;  %v76_v30 = vpop.permute.xlu0 %75 }
  0x9c   :  { %v92_v32 = vmul.f32 %v2149_v16, %v81_v29  ;;  %v91_v33 = vmul.f32 %v2149_v16, %v76_v30  ;;  %v184_v34 = vpack.c.bf16 %v3051_v28, %v3047_v26  ;;  %v185_v37 = vpack.c.bf16 %v3049_v27, %v3053_v31 }
  0x9e   :  { %v3057_v35 = vadd.f32 %v2150_v20, %v92_v32  ;;  %v3059_v36 = vadd.f32 %v2150_v20, %v91_v33  ;;  %2431 = vmatprep.subr.bf16.mxu0 %v184_v34 }
  0x9f   :  { %2432 = vmatpush3.bf16.msra.mxu0 %v184_v34  ;;  %v108_v49 = vpop.permute.xlu0 %107  ;;  %v113_v50 = vpop.permute.xlu1 %112 }
  0xa0   :  { %2433 = vmatprep.subr.bf16.mxu0 %v185_v37  ;;  %v186_v38 = vpack.c.bf16 %v3057_v35, %v3059_v36  ;;  %v149_v56 = vmul.f32 %v2151_v53, %v108_v49  ;;  %v150_v60 = vmul.f32 %v2151_v53, %v113_v50  ;;  %v3134_v50 = vld [vmem:[%s3561_s2] sm:$0xff]  }
  0xa2   :  { %v3106_v62 = vadd.f32 %v2152_v58, %v149_v56  ;;  %v3111_v4 = vadd.f32 %v2152_v58, %v150_v60  ;;  %v2845_v56 = vld [vmem:[#allocation2 + $0x108] sm:$0xff]  }
  0xa3   :  { %2434 = vmatpush3.bf16.msra.mxu0 %v185_v37  ;;  %v118_v51 = vpop.permute.xlu0 %117  ;;  %v123_v52 = vpop.permute.xlu1 %122  ;;  %v2849_v60 = vld [vmem:[#allocation2 + $0x128] sm:$0xff]  }
  0xa4   :  { %2435 = vmatprep.subr.bf16.mxu0 %v186_v38  ;;  %v151_v55 = vmul.f32 %v2151_v53, %v118_v51  ;;  %v152_v59 = vmul.f32 %v2151_v53, %v123_v52  ;;  %v3144_v51 = vld [vmem:[%s3561_s2 + $0x8] sm:$0xff]   ;;  %v3153_v52 = vld [vmem:[%s3561_s2 + $0x10] sm:$0xff]  }
  0xa6   :  { %v3104_v61 = vadd.f32 %v2152_v58, %v151_v55  ;;  %v3108_v1 = vadd.f32 %v2152_v58, %v152_v59  ;;  %v2844_v55 = vld [vmem:[#allocation2 + $0x100] sm:$0xff]  }
  0xa7   :  { %2436 = vmatpush3.bf16.msra.mxu0 %v186_v38  ;;  %v128_v54 = vpop.permute.xlu0 %127  ;;  %v133_v57 = vpop.permute.xlu1 %132  ;;  %v2848_v59 = vld [vmem:[#allocation2 + $0x120] sm:$0xff]  }
  0xa8   :  { %2465 = vmatprep.subr.bf16.mxu0 %v2943_v42  ;;  %v153_v11 = vmul.f32 %v2151_v53, %v128_v54  ;;  %v154_v17 = vmul.f32 %v2151_v53, %v133_v57  ;;  %v2843_v54 = vld [vmem:[#allocation2 + $0x38] sm:$0xff]   ;;  %v2846_v57 = vld [vmem:[#allocation2 + $0x110] sm:$0xff]  }
  0xaa   :  { %2438 = vmatmul.mubr.msk.bf16.vlgmr.msra.gmra.mrb[0].mxu0 %vm207_vm0, %v3068_v39  ;;  %v3118_v22 = vadd.f32 %v2152_v58, %v153_v11  ;;  %v3123_v32 = vadd.f32 %v2152_v58, %v154_v17 }
  0xab   :  { %2441 = vmatprep.mubr.msk.bf16.mxu0 %vm207_vm0, %v3073_v40  ;;  %2466 = vmatpush3.bf16.msra.mxu0 %v2836_v43  ;;  %v138_v63 = vpop.permute.xlu0 %137  ;;  %v143_v5 = vpop.permute.xlu1 %142 }
  0xac   :  { %2467 = vmatprep.subr.bf16.mxu0 %v2943_v42  ;;  %v155_v8 = vmul.f32 %v2151_v53, %v138_v63  ;;  %v156_v13 = vmul.f32 %v2151_v53, %v143_v5  ;;  %v2842_v53 = vld [vmem:[#allocation2 + $0x30] sm:$0xff]   ;;  %v2167_v63 = vld [vmem:[%s3564_s5 + $0x18] ss:$0 sm:$0xff] }
  0xae   :  { %v3116_v20 = vadd.f32 %v2152_v58, %v155_v8  ;;  %v3120_v25 = vadd.f32 %v2152_v58, %v156_v13  ;;  %v2847_v58 = vld [vmem:[#allocation2 + $0x118] sm:$0xff]   ;;  %v386_v13 = vmul.f32 %v2167_v63, %v3053_v31 }
  0xaf   :  { %2468 = vmatpush3.bf16.msra.mxu0 %v2837_v44 }
  0xb0   :  { %2469 = vmatprep.subr.bf16.mxu0 %v2943_v42  ;;  %v392_v17 = vadd.f32 %v386_v13, %v3053_v31 }
  0xb2   :  { %2442 = vmatmul.mubr.msk.bf16.gmra.mrb[4].mxu0 %vm207_vm0, %v3082_v41 }
  0xb3   :  { %2481 = vmatprep.mubr.msk.bf16.mxu0 %vm2944_vm1, %v2943_v42  ;;  %2470 = vmatpush3.bf16.msra.mxu0 %v2838_v45 }
  0xb4   :  { %2471 = vmatprep.subr.bf16.mxu0 %v2943_v42 }
  0xb7   :  { %2472 = vmatpush3.bf16.msra.mxu0 %v2839_v46 }
  0xb8   :  { %2473 = vmatprep.subr.bf16.mxu0 %v2943_v42 }
  0xbb   :  { %2474 = vmatpush3.bf16.msra.mxu0 %v2840_v47 }
  0xbc   :  { %2475 = vmatprep.subr.bf16.mxu0 %v2943_v42 }
  0xbf   :  { %2476 = vmatpush3.bf16.msra.mxu0 %v2841_v48 }
  0xc0   :  { %2477 = vmatprep.subr.bf16.mxu0 %v2943_v42 }
  0xc3   :  { %2478 = vmatpush3.bf16.msra.mxu0 %v2842_v53  ;;  %v2850_v53 = vld [vmem:[#allocation2 + $0x130] sm:$0xff]  }
  0xc4   :  { %2479 = vmatprep.subr.bf16.mxu0 %v2943_v42 }
  0xc7   :  { %2480 = vmatpush3.bf16.msra.mxu0 %v2843_v54  ;;  %v2851_v54 = vld [vmem:[#allocation2 + $0x138] sm:$0xff]  }
 0x17d   :  { %v2439_v0 = vpop.f32.mrb[0].mxu0 }
 0x17e   :  { %v263_v2 = vadd.f32 %v2439_v0, %v3104_v61  ;;  %v254_v3 = vpop.f32.mrb[1].mxu0  ;;  %v384_v0 = vmul.f32 %v2167_v63, %v3047_v26 }
 0x17f   :  { %v255_v6 = vadd.f32 %v254_v3, %v3106_v62  ;;  %v2440_v7 = vpop.f32.mrb[2].mxu0 }
 0x180   :  { %v266_v9 = vadd.f32 %v2440_v7, %v3108_v1  ;;  %v257_v10 = vpop.f32.mrb[3].mxu0  ;;  %v287_v15 = vmax.f32 %v263_v2, 0.0  ;;  %v385_v2 = vmul.f32 %v2167_v63, %v3051_v28  ;;  %v390_v5 = vadd.f32 %v384_v0, %v3047_v26 }
 0x181   :  { %v258_v12 = vadd.f32 %v257_v10, %v3111_v4  ;;  %v285_v18 = vmax.f32 %v255_v6, 0.0 }
 0x182   :  { %v288_v16 = vmax.f32 %v266_v9, 0.0  ;;  %v391_v7 = vadd.f32 %v385_v2, %v3051_v28 }
 0x183   :  { %v286_v19 = vmax.f32 %v258_v12, 0.0 }
 0x184   :  { %v294_v21 = vpack.c.bf16 %v288_v16, %v287_v15  ;;  %v387_v15 = vmul.f32 %v2167_v63, %v3049_v27 }
 0x185   :  { %v2443_v23 = vpop.f32.mrb[4].mxu0  ;;  %v293_v24 = vpack.c.bf16 %v286_v19, %v285_v18 }
 0x186   :  { %v279_v29 = vadd.f32 %v2443_v23, %v3116_v20  ;;  %v270_v30 = vpop.f32.mrb[5].mxu0  ;;  %v393_v19 = vadd.f32 %v387_v15, %v3049_v27 }
 0x187   :  { %v271_v33 = vadd.f32 %v270_v30, %v3118_v22  ;;  %v2444_v34 = vpop.f32.mrb[6].mxu0  ;;  %2446 = vmatpush3.bf16.msra.mxu1 %v293_v24 }
 0x188   :  { %v282_v37 = vadd.f32 %v2444_v34, %v3120_v25  ;;  %v273_v38 = vpop.f32.mrb[7].mxu0  ;;  %2447 = vmatprep.subr.bf16.mxu1 %v2943_v42  ;;  %v291_v44 = vmax.f32 %v279_v29, 0.0  ;;  %v389_v34 = vmul.f32 %v2167_v63, %v3057_v35 }
 0x189   :  { %v274_v43 = vadd.f32 %v273_v38, %v3123_v32  ;;  %v289_v46 = vmax.f32 %v271_v33, 0.0  ;;  %v388_v33 = vmul.f32 %v2167_v63, %v3059_v36 }
 0x18a   :  { %v292_v45 = vmax.f32 %v282_v37, 0.0 }
 0x18b   :  { %v290_v47 = vmax.f32 %v274_v43, 0.0  ;;  %2448 = vmatpush3.bf16.msra.mxu1 %v294_v21  ;;  %v394_v38 = vadd.f32 %v388_v33, %v3059_v36 }
 0x18c   :  { %v296_v48 = vpack.c.bf16 %v292_v45, %v291_v44  ;;  %2449 = vmatprep.subr.bf16.mxu1 %v2943_v42  ;;  %v395_v44 = vadd.f32 %v389_v34, %v3057_v35 }
 0x18d   :  { %v295_v49 = vpack.c.bf16 %v290_v47, %v289_v46 }
 0x18f   :  { %2450 = vmatpush3.bf16.msra.mxu1 %v295_v49 }
 0x190   :  { %2451 = vmatprep.subr.bf16.mxu1 %v2943_v42 }
 0x193   :  { %2452 = vmatpush3.bf16.msra.mxu1 %v296_v48 }
 0x194   :  { %2493 = vmatprep.subr.bf16.mxu1 %v2943_v42 }
 0x196   :  { %2454 = vmatmul.mubr.msk.bf16.vlgmr.msra.gmra.mrb[0].mxu1 %vm312_vm2, %v3134_v50 }
 0x197   :  { %2457 = vmatprep.mubr.msk.bf16.mxu1 %vm2944_vm1, %v2943_v42  ;;  %2494 = vmatpush3.bf16.msra.mxu1 %v2844_v55  ;;  %v2168_v55 = vld [vmem:[%s3564_s5 + $0x8] ss:$0 sm:$0xff] }
 0x198   :  { %2495 = vmatprep.subr.bf16.mxu1 %v2943_v42 }
 0x19b   :  { %2496 = vmatpush3.bf16.msra.mxu1 %v2845_v56 }
 0x19c   :  { %2497 = vmatprep.subr.bf16.mxu1 %v2943_v42 }
 0x19e   :  { %2458 = vmatmul.mubr.msk.bf16.gmra.mrb[4].mxu1 %vm312_vm2, %v3144_v51 }
 0x19f   :  { %2461 = vmatprep.mubr.msk.bf16.mxu1 %vm2944_vm1, %v2943_v42  ;;  %2498 = vmatpush3.bf16.msra.mxu1 %v2846_v57 }
 0x1a0   :  { %2499 = vmatprep.subr.bf16.mxu1 %v2943_v42 }
 0x1a3   :  { %2500 = vmatpush3.bf16.msra.mxu1 %v2847_v58 }
 0x1a4   :  { %2501 = vmatprep.subr.bf16.mxu1 %v2943_v42 }
 0x1a6   :  { %2462 = vmatmul.mubr.msk.bf16.gmra.mrb[8].mxu1 %vm312_vm2, %v3153_v52 }
 0x1a7   :  { %2509 = vmatprep.mubr.msk.bf16.mxu1 %vm2944_vm1, %v2943_v42  ;;  %2502 = vmatpush3.bf16.msra.mxu1 %v2848_v59 }
 0x1a8   :  { %2503 = vmatprep.subr.bf16.mxu1 %v2943_v42 }
 0x1ab   :  { %2504 = vmatpush3.bf16.msra.mxu1 %v2849_v60 }
 0x1ac   :  { %2505 = vmatprep.subr.bf16.mxu1 %v2943_v42 }
 0x1af   :  { %2506 = vmatpush3.bf16.msra.mxu1 %v2850_v53 }
 0x1b0   :  { %2507 = vmatprep.subr.bf16.mxu1 %v2943_v42 }
 0x1b3   :  { %2508 = vmatpush3.bf16.msra.mxu1 %v2851_v54 }
 0x1b4   :  { %2535 = vmatprep.subr.bf16.mxu1 %v2943_v42 }
 0x269   :  { %v356_v3 = vpop.f32.mrb[0].mxu1 }
 0x26a   :  { %v2455_v6 = vpop.f32.mrb[1].mxu1  ;;  %v396_v9 = vadd.f32 %v390_v5, %v356_v3 }
 0x26b   :  { %v359_v8 = vpop.f32.mrb[2].mxu1 }
 0x26c   :  { %v397_v10 = vadd.f32 %v391_v7, %v359_v8  ;;  %v2456_v11 = vpop.f32.mrb[3].mxu1 }
 0x26e   :  { %v402_v12 = vpack.c.bf16 %v397_v10, %v396_v9 }
 0x270   :  { %2482 = vmatmul.mubr.bf16.vlgmr.msra.gmra.mrb[8].mxu0 %v402_v12 }
 0x271   :  { %v364_v16 = vpop.f32.mrb[4].mxu1  ;;  %2485 = vmatprep.mubr.msk.bf16.mxu0 %vm2944_vm1, %v2943_v42 }
 0x272   :  { %v2459_v18 = vpop.f32.mrb[5].mxu1  ;;  %v398_v23 = vadd.f32 %v392_v17, %v364_v16 }
 0x273   :  { %v367_v21 = vpop.f32.mrb[6].mxu1 }
 0x274   :  { %v399_v24 = vadd.f32 %v393_v19, %v367_v21  ;;  %v2460_v29 = vpop.f32.mrb[7].mxu1 }
 0x275   :  { %v2177_v29 = vld [vmem:[%s3564_s5 + $0x10] ss:$0 sm:$0xff] }
 0x276   :  { %v403_v30 = vpack.c.bf16 %v399_v24, %v398_v23 }
 0x278   :  { %2486 = vmatmul.mubr.bf16.gmra.mrb[12].mxu0 %v403_v30 }
 0x279   :  { %v372_v37 = vpop.f32.mrb[8].mxu1  ;;  %2489 = vmatprep.mubr.msk.bf16.mxu0 %vm2944_vm1, %v2943_v42 }
 0x27a   :  { %v2463_v43 = vpop.f32.mrb[9].mxu1  ;;  %v400_v46 = vadd.f32 %v394_v38, %v372_v37 }
 0x27b   :  { %v375_v45 = vpop.f32.mrb[10].mxu1 }
 0x27c   :  { %v401_v47 = vadd.f32 %v395_v44, %v375_v45  ;;  %v2464_v48 = vpop.f32.mrb[11].mxu1 }
 0x27e   :  { %v404_v49 = vpack.c.bf16 %v401_v47, %v400_v46 }
 0x280   :  { %2490 = vmatmul.mubr.bf16.gmra.mrb[16].mxu0 %v404_v49 }
 0x281   :  { %2527 = vmatprep.mubr.msk.bf16.mxu0 %vm207_vm0, %v3034_v14 }
 0x343   :  { %v508_v56 = vpop.f32.mrb[8].mxu0 }
 0x344   :  { %v509_v57 = vadd.f32 %v2168_v55, %v508_v56  ;;  %v2483_v58 = vpop.f32.mrb[9].mxu0 }
 0x345   :  { %v511_v59 = vpop.f32.mrb[10].mxu0 }
 0x346   :  { %v512_v60 = vadd.f32 %v2168_v55, %v511_v59  ;;  %v2484_v63 = vpop.f32.mrb[11].mxu0  ;;  %v531_v0 = vmax.f32 %v509_v57, 0.0 }
 0x348   :  { %v532_v14 = vmax.f32 %v512_v60, 0.0 }
 0x34a   :  { %v537_v2 = vpack.c.bf16 %v532_v14, %v531_v0 }
 0x34b   :  { %v516_v3 = vpop.f32.mrb[12].mxu0 }
 0x34c   :  { %v517_v5 = vadd.f32 %v2168_v55, %v516_v3  ;;  %v2487_v6 = vpop.f32.mrb[13].mxu0  ;;  %2510 = vmatmul.mubr.bf16.vlgmr.msra.gmra.mrb[12].mxu1 %v537_v2 }
 0x34d   :  { %v519_v7 = vpop.f32.mrb[14].mxu0  ;;  %2513 = vmatprep.mubr.msk.bf16.mxu1 %vm2944_vm1, %v2943_v42 }
 0x34e   :  { %v520_v8 = vadd.f32 %v2168_v55, %v519_v7  ;;  %v2488_v9 = vpop.f32.mrb[15].mxu0  ;;  %v533_v10 = vmax.f32 %v517_v5, 0.0 }
 0x34f   :  { %v2854_v9 = vld [vmem:[#allocation2 + $0x50] sm:$0xff]  }
 0x350   :  { %v534_v11 = vmax.f32 %v520_v8, 0.0 }
 0x352   :  { %v538_v12 = vpack.c.bf16 %v534_v11, %v533_v10  ;;  %v2855_v10 = vld [vmem:[#allocation2 + $0x58] sm:$0xff]   ;;  %v2856_v11 = vld [vmem:[#allocation2 + $0x60] sm:$0xff]  }
 0x353   :  { %v524_v13 = vpop.f32.mrb[16].mxu0 }
 0x354   :  { %v525_v15 = vadd.f32 %v2168_v55, %v524_v13  ;;  %v2491_v16 = vpop.f32.mrb[17].mxu0  ;;  %2514 = vmatmul.mubr.bf16.gmra.mrb[16].mxu1 %v538_v12  ;;  %v2857_v12 = vld [vmem:[#allocation2 + $0x68] sm:$0xff]  }
 0x355   :  { %v527_v17 = vpop.f32.mrb[18].mxu0  ;;  %2517 = vmatprep.mubr.msk.bf16.mxu1 %vm2944_vm1, %v2943_v42 }
 0x356   :  { %v528_v18 = vadd.f32 %v2168_v55, %v527_v17  ;;  %v2492_v19 = vpop.f32.mrb[19].mxu0  ;;  %v535_v21 = vmax.f32 %v525_v15, 0.0 }
 0x358   :  { %v536_v23 = vmax.f32 %v528_v18, 0.0 }
 0x35a   :  { %v539_v24 = vpack.c.bf16 %v536_v23, %v535_v21 }
 0x35c   :  { %2518 = vmatmul.mubr.bf16.gmra.mrb[20].mxu1 %v539_v24 }
 0x35d   :  { %2543 = vmatprep.mubr.msk.bf16.mxu1 %vm2944_vm1, %v2943_v42 }
 0x41f   :  { %v643_v30 = vpop.f32.mrb[12].mxu1 }
 0x420   :  { %v644_v33 = vadd.f32 %v2177_v29, %v643_v30  ;;  %v2511_v34 = vpop.f32.mrb[13].mxu1 }
 0x421   :  { %v646_v37 = vpop.f32.mrb[14].mxu1 }
 0x422   :  { %v666_v38 = vmax.f32 %v644_v33, 0.0  ;;  %v647_v43 = vadd.f32 %v2177_v29, %v646_v37  ;;  %v2512_v44 = vpop.f32.mrb[15].mxu1 }
 0x424   :  { %v667_v45 = vmax.f32 %v647_v43, 0.0  ;;  %v3202_v46 = vadd.f32 %v666_v38, %v3047_v26 }
 0x426   :  { %v3205_v47 = vadd.f32 %v667_v45, %v3051_v28 }
 0x427   :  { %v651_v48 = vpop.f32.mrb[16].mxu1 }
 0x428   :  { %v652_v49 = vadd.f32 %v2177_v29, %v651_v48  ;;  %v2515_v53 = vpop.f32.mrb[17].mxu1  ;;  %v678_v54 = vpack.c.bf16 %v3205_v47, %v3202_v46 }
 0x429   :  { %v654_v55 = vpop.f32.mrb[18].mxu1 }
 0x42a   :  { %v668_v56 = vmax.f32 %v652_v49, 0.0  ;;  %v655_v57 = vadd.f32 %v2177_v29, %v654_v55  ;;  %v2516_v58 = vpop.f32.mrb[19].mxu1  ;;  %2521 = vmatprep.subr.bf16.mxu0 %v678_v54 }
 0x42b   :  { %2522 = vmatpush3.bf16.msra.mxu0 %v678_v54 }
 0x42c   :  { %v669_v59 = vmax.f32 %v655_v57, 0.0  ;;  %v3210_v60 = vadd.f32 %v668_v56, %v3053_v31 }
 0x42e   :  { %v3213_v26 = vadd.f32 %v669_v59, %v3049_v27 }
 0x42f   :  { %v659_v28 = vpop.f32.mrb[20].mxu1 }
 0x430   :  { %v660_v63 = vadd.f32 %v2177_v29, %v659_v28  ;;  %v2519_v0 = vpop.f32.mrb[21].mxu1  ;;  %v679_v14 = vpack.c.bf16 %v3213_v26, %v3210_v60 }
 0x431   :  { %v662_v2 = vpop.f32.mrb[22].mxu1  ;;  %v2859_v0 = vld [vmem:[#allocation2 + $0x78] sm:$0xff]  }
 0x432   :  { %v670_v3 = vmax.f32 %v660_v63, 0.0  ;;  %v663_v5 = vadd.f32 %v2177_v29, %v662_v2  ;;  %v2520_v6 = vpop.f32.mrb[23].mxu1  ;;  %2523 = vmatprep.subr.bf16.mxu0 %v679_v14  ;;  %v2858_v63 = vld [vmem:[#allocation2 + $0x70] sm:$0xff]   ;;  %v2861_v2 = vld [vmem:[#allocation2 + $0x148] sm:$0xff]  }
 0x433   :  { %2524 = vmatpush3.bf16.msra.mxu0 %v679_v14  ;;  %v2860_v14 = vld [vmem:[#allocation2 + $0x140] sm:$0xff]  }
 0x434   :  { %v671_v7 = vmax.f32 %v663_v5, 0.0  ;;  %v3218_v8 = vadd.f32 %v670_v3, %v3059_v36  ;;  %v2853_v36 = vld [vmem:[#allocation2 + $0x48] sm:$0xff]   ;;  %v2862_v3 = vld [vmem:[#allocation2 + $0x150] sm:$0xff]   ;;  %v2863_v5 = vld [vmem:[#allocation2 + $0x158] sm:$0xff]  }
 0x435   :  { %v2864_v6 = vld [vmem:[#allocation2 + $0x160] sm:$0xff]  }
 0x436   :  { %v3221_v31 = vadd.f32 %v671_v7, %v3057_v35  ;;  %v2852_v35 = vld [vmem:[#allocation2 + $0x40] sm:$0xff]   ;;  %v2865_v7 = vld [vmem:[#allocation2 + $0x168] sm:$0xff]  }
 0x438   :  { %v680_v27 = vpack.c.bf16 %v3221_v31, %v3218_v8 }
 0x43a   :  { %2525 = vmatprep.subr.bf16.mxu0 %v680_v27 }
 0x43b   :  { %2526 = vmatpush3.bf16.msra.mxu0 %v680_v27  ;;  %v2193_v27 = vld [vmem:[%s3564_s5 + $0x19] ss:$0 sm:$0xff] }
 0x43c   :  { %2555 = vmatprep.subr.bf16.mxu0 %v2943_v42 }
 0x43e   :  { %2528 = vmatmul.mubr.msk.bf16.vlgmr.msra.gmra.mrb[20].mxu0 %vm207_vm0, %v3068_v39 }
 0x43f   :  { %2531 = vmatprep.mubr.msk.bf16.mxu0 %vm207_vm0, %v3073_v40  ;;  %2556 = vmatpush3.bf16.msra.mxu0 %v2852_v35  ;;  %v820_v35 = vmul.f32 %v2193_v27, %v3202_v46 }
 0x440   :  { %2557 = vmatprep.subr.bf16.mxu0 %v2943_v42 }
 0x443   :  { %2558 = vmatpush3.bf16.msra.mxu0 %v2853_v36  ;;  %v821_v36 = vmul.f32 %v2193_v27, %v3205_v47 }
 0x444   :  { %2559 = vmatprep.subr.bf16.mxu0 %v2943_v42 }
 0x446   :  { %2532 = vmatmul.mubr.msk.bf16.gmra.mrb[24].mxu0 %vm207_vm0, %v3082_v41 }
 0x447   :  { %2571 = vmatprep.mubr.msk.bf16.mxu0 %vm2944_vm1, %v2943_v42  ;;  %2560 = vmatpush3.bf16.msra.mxu0 %v2854_v9 }
 0x448   :  { %2561 = vmatprep.subr.bf16.mxu0 %v2943_v42 }
 0x44b   :  { %2562 = vmatpush3.bf16.msra.mxu0 %v2855_v10  ;;  %v826_v10 = vadd.f32 %v820_v35, %v3202_v46 }
 0x44c   :  { %2563 = vmatprep.subr.bf16.mxu0 %v2943_v42 }
 0x44f   :  { %2564 = vmatpush3.bf16.msra.mxu0 %v2856_v11 }
 0x450   :  { %2565 = vmatprep.subr.bf16.mxu0 %v2943_v42 }
 0x453   :  { %2566 = vmatpush3.bf16.msra.mxu0 %v2857_v12  ;;  %v827_v12 = vadd.f32 %v821_v36, %v3205_v47 }
 0x454   :  { %2567 = vmatprep.subr.bf16.mxu0 %v2943_v42 }
 0x457   :  { %2568 = vmatpush3.bf16.msra.mxu0 %v2858_v63  ;;  %v2866_v63 = vld [vmem:[#allocation2 + $0x170] sm:$0xff]  }
 0x458   :  { %2569 = vmatprep.subr.bf16.mxu0 %v2943_v42 }
 0x45b   :  { %2570 = vmatpush3.bf16.msra.mxu0 %v2859_v0  ;;  %v2867_v0 = vld [vmem:[#allocation2 + $0x178] sm:$0xff]  }
 0x511   :  { %v2529_v13 = vpop.f32.mrb[20].mxu0 }
 0x512   :  { %v724_v15 = vadd.f32 %v2529_v13, %v3104_v61  ;;  %v715_v16 = vpop.f32.mrb[21].mxu0 }
 0x513   :  { %v716_v17 = vadd.f32 %v715_v16, %v3106_v62  ;;  %v2530_v18 = vpop.f32.mrb[22].mxu0 }
 0x514   :  { %v727_v19 = vadd.f32 %v2530_v18, %v3108_v1  ;;  %v718_v21 = vpop.f32.mrb[23].mxu0  ;;  %v748_v24 = vmax.f32 %v724_v15, 0.0 }
 0x515   :  { %v719_v23 = vadd.f32 %v718_v21, %v3111_v4  ;;  %v746_v30 = vmax.f32 %v716_v17, 0.0  ;;  %v823_v21 = vmul.f32 %v2193_v27, %v3213_v26 }
 0x516   :  { %v749_v29 = vmax.f32 %v727_v19, 0.0  ;;  %v822_v19 = vmul.f32 %v2193_v27, %v3210_v60 }
 0x517   :  { %v747_v33 = vmax.f32 %v719_v23, 0.0 }
 0x518   :  { %v755_v34 = vpack.c.bf16 %v749_v29, %v748_v24  ;;  %v828_v24 = vadd.f32 %v822_v19, %v3210_v60 }
 0x519   :  { %v754_v37 = vpack.c.bf16 %v747_v33, %v746_v30  ;;  %v2533_v38 = vpop.f32.mrb[24].mxu0  ;;  %v829_v30 = vadd.f32 %v823_v21, %v3213_v26 }
 0x51a   :  { %v740_v43 = vadd.f32 %v2533_v38, %v3116_v20  ;;  %v731_v44 = vpop.f32.mrb[25].mxu0 }
 0x51b   :  { %v732_v45 = vadd.f32 %v731_v44, %v3118_v22  ;;  %v2534_v48 = vpop.f32.mrb[26].mxu0  ;;  %2536 = vmatpush3.bf16.msra.mxu1 %v754_v37  ;;  %v824_v44 = vmul.f32 %v2193_v27, %v3218_v8 }
 0x51c   :  { %v743_v49 = vadd.f32 %v2534_v48, %v3120_v25  ;;  %v734_v53 = vpop.f32.mrb[27].mxu0  ;;  %2537 = vmatprep.subr.bf16.mxu1 %v2943_v42  ;;  %v752_v55 = vmax.f32 %v740_v43, 0.0 }
 0x51d   :  { %v735_v54 = vadd.f32 %v734_v53, %v3123_v32  ;;  %v750_v57 = vmax.f32 %v732_v45, 0.0  ;;  %v825_v45 = vmul.f32 %v2193_v27, %v3221_v31 }
 0x51e   :  { %v753_v56 = vmax.f32 %v743_v49, 0.0  ;;  %v830_v49 = vadd.f32 %v824_v44, %v3218_v8 }
 0x51f   :  { %v751_v58 = vmax.f32 %v735_v54, 0.0  ;;  %2538 = vmatpush3.bf16.msra.mxu1 %v755_v34  ;;  %v831_v54 = vadd.f32 %v825_v45, %v3221_v31 }
 0x520   :  { %v757_v59 = vpack.c.bf16 %v753_v56, %v752_v55  ;;  %2539 = vmatprep.subr.bf16.mxu1 %v2943_v42 }
 0x521   :  { %v756_v28 = vpack.c.bf16 %v751_v58, %v750_v57 }
 0x523   :  { %2540 = vmatpush3.bf16.msra.mxu1 %v756_v28  ;;  %v3293_v28 = vld [vmem:[%s3560_s1] sm:$0xff]  }
 0x524   :  { %2541 = vmatprep.subr.bf16.mxu1 %v2943_v42 }
 0x527   :  { %2542 = vmatpush3.bf16.msra.mxu1 %v757_v59 }
 0x528   :  { %2583 = vmatprep.subr.bf16.mxu1 %v2943_v42 }
 0x52a   :  { %2544 = vmatmul.mubr.msk.bf16.vlgmr.msra.gmra.mrb[24].mxu1 %vm312_vm2, %v3134_v50 }
 0x52b   :  { %2547 = vmatprep.mubr.msk.bf16.mxu1 %vm2944_vm1, %v2943_v42  ;;  %2584 = vmatpush3.bf16.msra.mxu1 %v2860_v14  ;;  %v2194_v14 = vld [vmem:[%s3564_s5 + $0x9] ss:$0 sm:$0xff] }
 0x52c   :  { %2585 = vmatprep.subr.bf16.mxu1 %v2943_v42 }
 0x52f   :  { %2586 = vmatpush3.bf16.msra.mxu1 %v2861_v2 }
 0x530   :  { %2587 = vmatprep.subr.bf16.mxu1 %v2943_v42 }
 0x532   :  { %2548 = vmatmul.mubr.msk.bf16.gmra.mrb[28].mxu1 %vm312_vm2, %v3144_v51 }
 0x533   :  { %2551 = vmatprep.mubr.msk.bf16.mxu1 %vm2944_vm1, %v2943_v42  ;;  %2588 = vmatpush3.bf16.msra.mxu1 %v2862_v3 }
 0x534   :  { %2589 = vmatprep.subr.bf16.mxu1 %v2943_v42 }
 0x537   :  { %2590 = vmatpush3.bf16.msra.mxu1 %v2863_v5 }
 0x538   :  { %2591 = vmatprep.subr.bf16.mxu1 %v2943_v42 }
 0x53a   :  { %2552 = vmatmul.mubr.msk.bf16.gmra.mrb[32].mxu1 %vm312_vm2, %v3153_v52 }
 0x53b   :  { %2599 = vmatprep.mubr.msk.bf16.mxu1 %vm2944_vm1, %v2943_v42  ;;  %2592 = vmatpush3.bf16.msra.mxu1 %v2864_v6 }
 0x53c   :  { %2593 = vmatprep.subr.bf16.mxu1 %v2943_v42 }
 0x53f   :  { %2594 = vmatpush3.bf16.msra.mxu1 %v2865_v7 }
 0x540   :  { %2595 = vmatprep.subr.bf16.mxu1 %v2943_v42 }
 0x543   :  { %2596 = vmatpush3.bf16.msra.mxu1 %v2866_v63 }
 0x544   :  { %2597 = vmatprep.subr.bf16.mxu1 %v2943_v42 }
 0x547   :  { %2598 = vmatpush3.bf16.msra.mxu1 %v2867_v0 }
 0x548   :  { %2625 = vmatprep.subr.bf16.mxu1 %v2943_v42 }
 0x5fd   :  { %v792_v9 = vpop.f32.mrb[24].mxu1 }
 0x5fe   :  { %v2545_v11 = vpop.f32.mrb[25].mxu1  ;;  %v832_v15 = vadd.f32 %v826_v10, %v792_v9 }
 0x5ff   :  { %v795_v13 = vpop.f32.mrb[26].mxu1 }
 0x600   :  { %v833_v16 = vadd.f32 %v827_v12, %v795_v13  ;;  %v2546_v17 = vpop.f32.mrb[27].mxu1 }
 0x602   :  { %v838_v18 = vpack.c.bf16 %v833_v16, %v832_v15 }
 0x604   :  { %2572 = vmatmul.mubr.bf16.vlgmr.msra.gmra.mrb[28].mxu0 %v838_v18 }
 0x605   :  { %v800_v23 = vpop.f32.mrb[28].mxu1  ;;  %2575 = vmatprep.mubr.msk.bf16.mxu0 %vm2944_vm1, %v2943_v42 }
 0x606   :  { %v2549_v29 = vpop.f32.mrb[29].mxu1  ;;  %v834_v34 = vadd.f32 %v828_v24, %v800_v23 }
 0x607   :  { %v803_v33 = vpop.f32.mrb[30].mxu1 }
 0x608   :  { %v835_v37 = vadd.f32 %v829_v30, %v803_v33  ;;  %v2550_v38 = vpop.f32.mrb[31].mxu1 }
 0x60a   :  { %v839_v43 = vpack.c.bf16 %v835_v37, %v834_v34 }
 0x60c   :  { %2576 = vmatmul.mubr.bf16.gmra.mrb[32].mxu0 %v839_v43  ;;  %v2203_v43 = vld [vmem:[%s3564_s5 + $0x11] ss:$0 sm:$0xff] }
 0x60d   :  { %v808_v48 = vpop.f32.mrb[32].mxu1  ;;  %2579 = vmatprep.mubr.msk.bf16.mxu0 %vm2944_vm1, %v2943_v42 }
 0x60e   :  { %v2553_v53 = vpop.f32.mrb[33].mxu1  ;;  %v836_v56 = vadd.f32 %v830_v49, %v808_v48 }
 0x60f   :  { %v811_v55 = vpop.f32.mrb[34].mxu1 }
 0x610   :  { %v837_v57 = vadd.f32 %v831_v54, %v811_v55  ;;  %v2554_v58 = vpop.f32.mrb[35].mxu1 }
 0x612   :  { %v840_v59 = vpack.c.bf16 %v837_v57, %v836_v56 }
 0x614   :  { %2580 = vmatmul.mubr.bf16.gmra.mrb[36].mxu0 %v840_v59 }
 0x615   :  { %2617 = vmatprep.mubr.msk.bf16.mxu0 %vm207_vm0, %v3293_v28 }
 0x6d7   :  { %v944_v2 = vpop.f32.mrb[28].mxu0 }
 0x6d8   :  { %v945_v3 = vadd.f32 %v2194_v14, %v944_v2  ;;  %v2573_v5 = vpop.f32.mrb[29].mxu0 }
 0x6d9   :  { %v947_v6 = vpop.f32.mrb[30].mxu0 }
 0x6da   :  { %v948_v7 = vadd.f32 %v2194_v14, %v947_v6  ;;  %v2574_v27 = vpop.f32.mrb[31].mxu0  ;;  %v967_v35 = vmax.f32 %v945_v3, 0.0 }
 0x6dc   :  { %v968_v36 = vmax.f32 %v948_v7, 0.0 }
 0x6de   :  { %v973_v9 = vpack.c.bf16 %v968_v36, %v967_v35 }
 0x6df   :  { %v952_v10 = vpop.f32.mrb[32].mxu0 }
 0x6e0   :  { %v953_v11 = vadd.f32 %v2194_v14, %v952_v10  ;;  %v2577_v12 = vpop.f32.mrb[33].mxu0  ;;  %2600 = vmatmul.mubr.bf16.vlgmr.msra.gmra.mrb[36].mxu1 %v973_v9 }
 0x6e1   :  { %v955_v13 = vpop.f32.mrb[34].mxu0  ;;  %2603 = vmatprep.mubr.msk.bf16.mxu1 %vm2944_vm1, %v2943_v42 }
 0x6e2   :  { %v956_v15 = vadd.f32 %v2194_v14, %v955_v13  ;;  %v2578_v16 = vpop.f32.mrb[35].mxu0  ;;  %v969_v17 = vmax.f32 %v953_v11, 0.0 }
 0x6e4   :  { %v970_v18 = vmax.f32 %v956_v15, 0.0 }
 0x6e6   :  { %v974_v19 = vpack.c.bf16 %v970_v18, %v969_v17  ;;  %v2870_v17 = vld [vmem:[#allocation2 + $0x90] sm:$0xff]  }
 0x6e7   :  { %v960_v21 = vpop.f32.mrb[36].mxu0 }
 0x6e8   :  { %v961_v23 = vadd.f32 %v2194_v14, %v960_v21  ;;  %v2581_v24 = vpop.f32.mrb[37].mxu0  ;;  %2604 = vmatmul.mubr.bf16.gmra.mrb[40].mxu1 %v974_v19 }
 0x6e9   :  { %v963_v29 = vpop.f32.mrb[38].mxu0  ;;  %2607 = vmatprep.mubr.msk.bf16.mxu1 %vm2944_vm1, %v2943_v42 }
 0x6ea   :  { %v964_v30 = vadd.f32 %v2194_v14, %v963_v29  ;;  %v2582_v33 = vpop.f32.mrb[39].mxu0  ;;  %v971_v34 = vmax.f32 %v961_v23, 0.0 }
 0x6ec   :  { %v972_v37 = vmax.f32 %v964_v30, 0.0 }
 0x6ee   :  { %v975_v38 = vpack.c.bf16 %v972_v37, %v971_v34 }
 0x6f0   :  { %2608 = vmatmul.mubr.bf16.gmra.mrb[44].mxu1 %v975_v38 }
 0x6f1   :  { %2633 = vmatprep.mubr.msk.bf16.mxu1 %vm2944_vm1, %v2943_v42 }
 0x7b3   :  { %v1079_v44 = vpop.f32.mrb[36].mxu1 }
 0x7b4   :  { %v1080_v45 = vadd.f32 %v2203_v43, %v1079_v44  ;;  %v2601_v48 = vpop.f32.mrb[37].mxu1 }
 0x7b5   :  { %v1082_v49 = vpop.f32.mrb[38].mxu1 }
 0x7b6   :  { %v1102_v53 = vmax.f32 %v1080_v45, 0.0  ;;  %v1083_v54 = vadd.f32 %v2203_v43, %v1082_v49  ;;  %v2602_v55 = vpop.f32.mrb[39].mxu1 }
 0x7b8   :  { %v1103_v56 = vmax.f32 %v1083_v54, 0.0  ;;  %v3312_v57 = vadd.f32 %v1102_v53, %v3202_v46 }
 0x7ba   :  { %v3315_v58 = vadd.f32 %v1103_v56, %v3205_v47 }
 0x7bb   :  { %v1087_v59 = vpop.f32.mrb[40].mxu1 }
 0x7bc   :  { %v1088_v63 = vadd.f32 %v2203_v43, %v1087_v59  ;;  %v2605_v0 = vpop.f32.mrb[41].mxu1  ;;  %v1114_v14 = vpack.c.bf16 %v3315_v58, %v3312_v57 }
 0x7bd   :  { %v1090_v2 = vpop.f32.mrb[42].mxu1 }
 0x7be   :  { %v1104_v3 = vmax.f32 %v1088_v63, 0.0  ;;  %v1091_v5 = vadd.f32 %v2203_v43, %v1090_v2  ;;  %v2606_v6 = vpop.f32.mrb[43].mxu1  ;;  %2611 = vmatprep.subr.bf16.mxu0 %v1114_v14 }
 0x7bf   :  { %2612 = vmatpush3.bf16.msra.mxu0 %v1114_v14 }
 0x7c0   :  { %v1105_v7 = vmax.f32 %v1091_v5, 0.0  ;;  %v3320_v27 = vadd.f32 %v1104_v3, %v3210_v60 }
 0x7c2   :  { %v3323_v46 = vadd.f32 %v1105_v7, %v3213_v26  ;;  %v2874_v7 = vld [vmem:[#allocation2 + $0xb0] sm:$0xff]  }
 0x7c3   :  { %v1095_v47 = vpop.f32.mrb[44].mxu1 }
 0x7c4   :  { %v1096_v35 = vadd.f32 %v2203_v43, %v1095_v47  ;;  %v2609_v36 = vpop.f32.mrb[45].mxu1  ;;  %v1115_v9 = vpack.c.bf16 %v3323_v46, %v3320_v27  ;;  %v2876_v47 = vld [vmem:[#allocation2 + $0x180] sm:$0xff]  }
 0x7c5   :  { %v1098_v10 = vpop.f32.mrb[46].mxu1  ;;  %v2880_v36 = vld [vmem:[#allocation2 + $0x1a0] sm:$0xff]  }
 0x7c6   :  { %v1106_v11 = vmax.f32 %v1096_v35, 0.0  ;;  %v1099_v12 = vadd.f32 %v2203_v43, %v1098_v10  ;;  %v2610_v13 = vpop.f32.mrb[47].mxu1  ;;  %2613 = vmatprep.subr.bf16.mxu0 %v1115_v9  ;;  %v2877_v35 = vld [vmem:[#allocation2 + $0x188] sm:$0xff]   ;;  %v2219_v10 = vld [vmem:[%s3564_s5 + $0x1a] ss:$0 sm:$0xff] }
 0x7c7   :  { %2614 = vmatpush3.bf16.msra.mxu0 %v1115_v9  ;;  %v2881_v9 = vld [vmem:[#allocation2 + $0x1a8] sm:$0xff]  }
 0x7c8   :  { %v1107_v15 = vmax.f32 %v1099_v12, 0.0  ;;  %v3328_v16 = vadd.f32 %v1106_v11, %v3218_v8  ;;  %v2868_v8 = vld [vmem:[#allocation2 + $0x80] sm:$0xff]   ;;  %v1256_v11 = vmul.f32 %v2219_v10, %v3312_v57  ;;  %v1257_v12 = vmul.f32 %v2219_v10, %v3315_v58 }
 0x7ca   :  { %v3331_v60 = vadd.f32 %v1107_v15, %v3221_v31  ;;  %v2869_v31 = vld [vmem:[#allocation2 + $0x88] sm:$0xff]   ;;  %v1262_v15 = vadd.f32 %v1256_v11, %v3312_v57 }
 0x7cc   :  { %v1116_v26 = vpack.c.bf16 %v3331_v60, %v3328_v16 }
 0x7ce   :  { %2615 = vmatprep.subr.bf16.mxu0 %v1116_v26 }
 0x7cf   :  { %2616 = vmatpush3.bf16.msra.mxu0 %v1116_v26 }
 0x7d0   :  { %2645 = vmatprep.subr.bf16.mxu0 %v2943_v42 }
 0x7d2   :  { %2618 = vmatmul.mubr.msk.bf16.vlgmr.msra.gmra.mrb[40].mxu0 %vm207_vm0, %v3068_v39  ;;  %v2871_v39 = vld [vmem:[#allocation2 + $0x98] sm:$0xff]  }
 0x7d3   :  { %2621 = vmatprep.mubr.msk.bf16.mxu0 %vm207_vm0, %v3073_v40  ;;  %2646 = vmatpush3.bf16.msra.mxu0 %v2868_v8  ;;  %v2872_v40 = vld [vmem:[#allocation2 + $0xa0] sm:$0xff]   ;;  %v1263_v8 = vadd.f32 %v1257_v12, %v3315_v58 }
 0x7d4   :  { %2647 = vmatprep.subr.bf16.mxu0 %v2943_v42 }
 0x7d7   :  { %2648 = vmatpush3.bf16.msra.mxu0 %v2869_v31 }
 0x7d8   :  { %2649 = vmatprep.subr.bf16.mxu0 %v2943_v42 }
 0x7da   :  { %2622 = vmatmul.mubr.msk.bf16.gmra.mrb[44].mxu0 %vm207_vm0, %v3082_v41  ;;  %v2873_v41 = vld [vmem:[#allocation2 + $0xa8] sm:$0xff]  }
 0x7db   :  { %2661 = vmatprep.mubr.msk.bf16.mxu0 %vm2944_vm1, %v2943_v42  ;;  %2650 = vmatpush3.bf16.msra.mxu0 %v2870_v17 }
 0x7dc   :  { %2651 = vmatprep.subr.bf16.mxu0 %v2943_v42 }
 0x7df   :  { %2652 = vmatpush3.bf16.msra.mxu0 %v2871_v39 }
 0x7e0   :  { %2653 = vmatprep.subr.bf16.mxu0 %v2943_v42 }
 0x7e3   :  { %2654 = vmatpush3.bf16.msra.mxu0 %v2872_v40 }
 0x7e4   :  { %2655 = vmatprep.subr.bf16.mxu0 %v2943_v42 }
 0x7e7   :  { %2656 = vmatpush3.bf16.msra.mxu0 %v2873_v41 }
 0x7e8   :  { %2657 = vmatprep.subr.bf16.mxu0 %v2943_v42 }
 0x7eb   :  { %2658 = vmatpush3.bf16.msra.mxu0 %v2874_v7 }
 0x7ec   :  { %2659 = vmatprep.subr.bf16.mxu0 %v2943_v42 }
 0x8a5   :  { %v2619_v18 = vpop.f32.mrb[40].mxu0 }
 0x8a6   :  { %v1160_v19 = vadd.f32 %v2619_v18, %v3104_v61  ;;  %v1151_v21 = vpop.f32.mrb[41].mxu0  ;;  %v1258_v18 = vmul.f32 %v2219_v10, %v3320_v27 }
 0x8a7   :  { %v1152_v23 = vadd.f32 %v1151_v21, %v3106_v62  ;;  %v2620_v24 = vpop.f32.mrb[42].mxu0 }
 0x8a8   :  { %v1163_v29 = vadd.f32 %v2620_v24, %v3108_v1  ;;  %v1154_v30 = vpop.f32.mrb[43].mxu0  ;;  %v1184_v34 = vmax.f32 %v1160_v19, 0.0  ;;  %v1259_v19 = vmul.f32 %v2219_v10, %v3323_v46 }
 0x8a9   :  { %v1155_v33 = vadd.f32 %v1154_v30, %v3111_v4  ;;  %v1182_v38 = vmax.f32 %v1152_v23, 0.0  ;;  %v1264_v23 = vadd.f32 %v1258_v18, %v3320_v27 }
 0x8aa   :  { %v1185_v37 = vmax.f32 %v1163_v29, 0.0  ;;  %v1265_v29 = vadd.f32 %v1259_v19, %v3323_v46 }
 0x8ab   :  { %v1183_v43 = vmax.f32 %v1155_v33, 0.0 }
 0x8ac   :  { %v1191_v44 = vpack.c.bf16 %v1185_v37, %v1184_v34 }
 0x8ad   :  { %v1190_v45 = vpack.c.bf16 %v1183_v43, %v1182_v38  ;;  %v2623_v48 = vpop.f32.mrb[44].mxu0  ;;  %v1260_v43 = vmul.f32 %v2219_v10, %v3328_v16 }
 0x8ae   :  { %v1176_v49 = vadd.f32 %v2623_v48, %v3116_v20  ;;  %v1167_v53 = vpop.f32.mrb[45].mxu0 }
 0x8af   :  { %v1168_v54 = vadd.f32 %v1167_v53, %v3118_v22  ;;  %v2624_v55 = vpop.f32.mrb[46].mxu0  ;;  %2626 = vmatpush3.bf16.msra.mxu1 %v1190_v45  ;;  %v1266_v48 = vadd.f32 %v1260_v43, %v3328_v16 }
 0x8b0   :  { %v1179_v56 = vadd.f32 %v2624_v55, %v3120_v25  ;;  %v1170_v59 = vpop.f32.mrb[47].mxu0  ;;  %2627 = vmatprep.subr.bf16.mxu1 %v2943_v42  ;;  %v1188_v0 = vmax.f32 %v1176_v49, 0.0 }
 0x8b1   :  { %v1171_v63 = vadd.f32 %v1170_v59, %v3123_v32  ;;  %v1186_v2 = vmax.f32 %v1168_v54, 0.0 }
 0x8b2   :  { %v1189_v14 = vmax.f32 %v1179_v56, 0.0 }
 0x8b3   :  { %v1187_v3 = vmax.f32 %v1171_v63, 0.0  ;;  %2628 = vmatpush3.bf16.msra.mxu1 %v1191_v44  ;;  %v1261_v44 = vmul.f32 %v2219_v10, %v3331_v60 }
 0x8b4   :  { %v1193_v5 = vpack.c.bf16 %v1189_v14, %v1188_v0  ;;  %2629 = vmatprep.subr.bf16.mxu1 %v2943_v42  ;;  %v2882_v0 = vld [vmem:[#allocation2 + $0x1b0] sm:$0xff]   ;;  %v2883_v14 = vld [vmem:[#allocation2 + $0x1b8] sm:$0xff]  }
 0x8b5   :  { %v1192_v6 = vpack.c.bf16 %v1187_v3, %v1186_v2  ;;  %v1267_v53 = vadd.f32 %v1261_v44, %v3331_v60  ;;  %v2220_v2 = vld [vmem:[%s3564_s5 + $0xa] ss:$0 sm:$0xff] }
 0x8b7   :  { %2630 = vmatpush3.bf16.msra.mxu1 %v1192_v6 }
 0x8b8   :  { %2631 = vmatprep.subr.bf16.mxu1 %v2943_v42 }
 0x8bb   :  { %2632 = vmatpush3.bf16.msra.mxu1 %v1193_v5 }
 0x8bc   :  { %2673 = vmatprep.subr.bf16.mxu1 %v2943_v42 }
 0x8be   :  { %2634 = vmatmul.mubr.msk.bf16.vlgmr.msra.gmra.mrb[48].mxu1 %vm312_vm2, %v3134_v50  ;;  %v2875_v50 = vld [vmem:[#allocation2 + $0xb8] sm:$0xff]  }
 0x8bf   :  { %2637 = vmatprep.mubr.msk.bf16.mxu1 %vm2944_vm1, %v2943_v42  ;;  %2660 = vmatpush3.bf16.msra.mxu0 %v2875_v50 }
 0x8c0   :  { %2674 = vmatpush3.bf16.msra.mxu1 %v2876_v47 }
 0x8c1   :  { %2675 = vmatprep.subr.bf16.mxu1 %v2943_v42 }
 0x8c4   :  { %2676 = vmatpush3.bf16.msra.mxu1 %v2877_v35 }
 0x8c5   :  { %2677 = vmatprep.subr.bf16.mxu1 %v2943_v42 }
 0x8c6   :  { %2638 = vmatmul.mubr.msk.bf16.gmra.mrb[52].mxu1 %vm312_vm2, %v3144_v51  ;;  %v2878_v51 = vld [vmem:[#allocation2 + $0x190] sm:$0xff]  }
 0x8c7   :  { %2641 = vmatprep.mubr.msk.bf16.mxu1 %vm2944_vm1, %v2943_v42 }
 0x8c8   :  { %2678 = vmatpush3.bf16.msra.mxu1 %v2878_v51 }
 0x8c9   :  { %2679 = vmatprep.subr.bf16.mxu1 %v2943_v42 }
 0x8ce   :  { %2642 = vmatmul.mubr.msk.bf16.gmra.mrb[56].mxu1 %vm312_vm2, %v3153_v52  ;;  %v2879_v52 = vld [vmem:[#allocation2 + $0x198] sm:$0xff]  }
 0x8cf   :  { %2689 = vmatprep.mubr.msk.bf16.mxu1 %vm2944_vm1, %v2943_v42  ;;  %2680 = vmatpush3.bf16.msra.mxu1 %v2879_v52 }
 0x8d0   :  { %2681 = vmatprep.subr.bf16.mxu1 %v2943_v42 }
 0x8d3   :  { %2682 = vmatpush3.bf16.msra.mxu1 %v2880_v36 }
 0x8d4   :  { %2683 = vmatprep.subr.bf16.mxu1 %v2943_v42 }
 0x8d7   :  { %2684 = vmatpush3.bf16.msra.mxu1 %v2881_v9 }
 0x8d8   :  { %2685 = vmatprep.subr.bf16.mxu1 %v2943_v42 }
 0x8db   :  { %2686 = vmatpush3.bf16.msra.mxu1 %v2882_v0 }
 0x8dc   :  { %2687 = vmatprep.subr.bf16.mxu1 %v2943_v42 }
 0x8df   :  { %2688 = vmatpush3.bf16.msra.mxu1 %v2883_v14 }
 0x8e0   :  { %2715 = vmatprep.subr.bf16.mxu1 %v2943_v42 }
 0x991   :  { %v1228_v13 = vpop.f32.mrb[48].mxu1 }
 0x992   :  { %v2635_v26 = vpop.f32.mrb[49].mxu1  ;;  %v1268_v17 = vadd.f32 %v1262_v15, %v1228_v13 }
 0x993   :  { %v1231_v31 = vpop.f32.mrb[50].mxu1 }
 0x994   :  { %v1269_v39 = vadd.f32 %v1263_v8, %v1231_v31  ;;  %v2636_v40 = vpop.f32.mrb[51].mxu1 }
 0x996   :  { %v1274_v41 = vpack.c.bf16 %v1269_v39, %v1268_v17 }
 0x998   :  { %2662 = vmatmul.mubr.bf16.vlgmr.msra.gmra.mrb[48].mxu0 %v1274_v41 }
 0x999   :  { %v1236_v21 = vpop.f32.mrb[52].mxu1  ;;  %2665 = vmatprep.mubr.msk.bf16.mxu0 %vm2944_vm1, %v2943_v42 }
 0x99a   :  { %v2639_v24 = vpop.f32.mrb[53].mxu1  ;;  %v1270_v33 = vadd.f32 %v1264_v23, %v1236_v21  ;;  %v2229_v23 = vld [vmem:[%s3564_s5 + $0x12] ss:$0 sm:$0xff] }
 0x99b   :  { %v1239_v30 = vpop.f32.mrb[54].mxu1 }
 0x99c   :  { %v1271_v34 = vadd.f32 %v1265_v29, %v1239_v30  ;;  %v2640_v37 = vpop.f32.mrb[55].mxu1 }
 0x99e   :  { %v1275_v38 = vpack.c.bf16 %v1271_v34, %v1270_v33 }
 0x9a0   :  { %2666 = vmatmul.mubr.bf16.gmra.mrb[52].mxu0 %v1275_v38 }
 0x9a1   :  { %v1244_v45 = vpop.f32.mrb[56].mxu1  ;;  %2669 = vmatprep.mubr.msk.bf16.mxu0 %vm2944_vm1, %v2943_v42 }
 0x9a2   :  { %v2643_v49 = vpop.f32.mrb[57].mxu1  ;;  %v1272_v55 = vadd.f32 %v1266_v48, %v1244_v45 }
 0x9a3   :  { %v1247_v54 = vpop.f32.mrb[58].mxu1 }
 0x9a4   :  { %v1273_v56 = vadd.f32 %v1267_v53, %v1247_v54  ;;  %v2644_v59 = vpop.f32.mrb[59].mxu1 }
 0x9a6   :  { %v1276_v63 = vpack.c.bf16 %v1273_v56, %v1272_v55 }
 0x9a8   :  { %2670 = vmatmul.mubr.bf16.gmra.mrb[56].mxu0 %v1276_v63 }
 0x9a9   :  { %2707 = vmatprep.mubr.msk.bf16.mxu0 %vm207_vm0, %v3293_v28 }
 0xa6b   :  { %v1380_v3 = vpop.f32.mrb[48].mxu0 }
 0xa6c   :  { %v1381_v5 = vadd.f32 %v2220_v2, %v1380_v3  ;;  %v2663_v6 = vpop.f32.mrb[49].mxu0 }
 0xa6d   :  { %v1383_v7 = vpop.f32.mrb[50].mxu0 }
 0xa6e   :  { %v1384_v50 = vadd.f32 %v2220_v2, %v1383_v7  ;;  %v2664_v47 = vpop.f32.mrb[51].mxu0  ;;  %v1403_v35 = vmax.f32 %v1381_v5, 0.0 }
 0xa70   :  { %v1404_v28 = vmax.f32 %v1384_v50, 0.0 }
 0xa72   :  { %v1409_v51 = vpack.c.bf16 %v1404_v28, %v1403_v35 }
 0xa73   :  { %v1388_v52 = vpop.f32.mrb[52].mxu0 }
 0xa74   :  { %v1389_v36 = vadd.f32 %v2220_v2, %v1388_v52  ;;  %v2667_v9 = vpop.f32.mrb[53].mxu0  ;;  %2690 = vmatmul.mubr.bf16.vlgmr.msra.gmra.mrb[60].mxu1 %v1409_v51  ;;  %v2909_v51 = vld [vmem:[%s3560_s1 + $0x8] sm:$0xff]   ;;  %v2884_v52 = vld [vmem:[#allocation2 + $0xc0] sm:$0xff]  }
 0xa75   :  { %v1391_v10 = vpop.f32.mrb[54].mxu0  ;;  %2693 = vmatprep.mubr.msk.bf16.mxu1 %vm2944_vm1, %v2943_v42  ;;  %v2886_v9 = vld [vmem:[#allocation2 + $0xd0] sm:$0xff]  }
 0xa76   :  { %v1392_v11 = vadd.f32 %v2220_v2, %v1391_v10  ;;  %v2668_v12 = vpop.f32.mrb[55].mxu0  ;;  %v1405_v13 = vmax.f32 %v1389_v36, 0.0  ;;  %v2885_v36 = vld [vmem:[#allocation2 + $0xc8] sm:$0xff]   ;;  %v2887_v10 = vld [vmem:[#allocation2 + $0xd8] sm:$0xff]  }
 0xa77   :  { %v2889_v12 = vld [vmem:[#allocation2 + $0xe8] sm:$0xff]  }
 0xa78   :  { %v1406_v15 = vmax.f32 %v1392_v11, 0.0  ;;  %v2888_v11 = vld [vmem:[#allocation2 + $0xe0] sm:$0xff]  }
 0xa7a   :  { %v1410_v26 = vpack.c.bf16 %v1406_v15, %v1405_v13 }
 0xa7b   :  { %v1396_v8 = vpop.f32.mrb[56].mxu0 }
 0xa7c   :  { %v1397_v31 = vadd.f32 %v2220_v2, %v1396_v8  ;;  %v2671_v17 = vpop.f32.mrb[57].mxu0  ;;  %2694 = vmatmul.mubr.bf16.gmra.mrb[64].mxu1 %v1410_v26 }
 0xa7d   :  { %v1399_v39 = vpop.f32.mrb[58].mxu0  ;;  %2697 = vmatprep.mubr.msk.bf16.mxu1 %vm2944_vm1, %v2943_v42 }
 0xa7e   :  { %v1400_v40 = vadd.f32 %v2220_v2, %v1399_v39  ;;  %v2672_v41 = vpop.f32.mrb[59].mxu0  ;;  %v1407_v18 = vmax.f32 %v1397_v31, 0.0 }
 0xa80   :  { %v1408_v19 = vmax.f32 %v1400_v40, 0.0 }
 0xa82   :  { %v1411_v21 = vpack.c.bf16 %v1408_v19, %v1407_v18 }
 0xa84   :  { %2698 = vmatmul.mubr.bf16.gmra.mrb[68].mxu1 %v1411_v21 }
 0xa85   :  { %2723 = vmatprep.mubr.msk.bf16.mxu1 %vm2944_vm1, %v2943_v42 }
 0xb47   :  { %v1515_v24 = vpop.f32.mrb[60].mxu1 }
 0xb48   :  { %v1516_v29 = vadd.f32 %v2229_v23, %v1515_v24  ;;  %v2691_v30 = vpop.f32.mrb[61].mxu1 }
 0xb49   :  { %v1518_v33 = vpop.f32.mrb[62].mxu1 }
 0xb4a   :  { %v1538_v34 = vmax.f32 %v1516_v29, 0.0  ;;  %v1519_v37 = vadd.f32 %v2229_v23, %v1518_v33  ;;  %v2692_v38 = vpop.f32.mrb[63].mxu1 }
 0xb4c   :  { %v1539_v43 = vmax.f32 %v1519_v37, 0.0  ;;  %v3417_v44 = vadd.f32 %v1538_v34, %v3312_v57 }
 0xb4e   :  { %v3420_v45 = vadd.f32 %v1539_v43, %v3315_v58 }
 0xb4f   :  { %v1523_v48 = vpop.f32.mrb[64].mxu1 }
 0xb50   :  { %v1524_v49 = vadd.f32 %v2229_v23, %v1523_v48  ;;  %v2695_v53 = vpop.f32.mrb[65].mxu1  ;;  %v1550_v54 = vpack.c.bf16 %v3420_v45, %v3417_v44 }
 0xb51   :  { %v1526_v55 = vpop.f32.mrb[66].mxu1  ;;  %v2890_v53 = vld [vmem:[#allocation2 + $0xf0] sm:$0xff]  }
 0xb52   :  { %v1540_v56 = vmax.f32 %v1524_v49, 0.0  ;;  %v1527_v59 = vadd.f32 %v2229_v23, %v1526_v55  ;;  %v2696_v63 = vpop.f32.mrb[67].mxu1  ;;  %2701 = vmatprep.subr.bf16.mxu0 %v1550_v54  ;;  %v2892_v55 = vld [vmem:[#allocation2 + $0x1c0] sm:$0xff]  }
 0xb53   :  { %2702 = vmatpush3.bf16.msra.mxu0 %v1550_v54  ;;  %v2891_v54 = vld [vmem:[#allocation2 + $0xf8] sm:$0xff]  }
 0xb54   :  { %v1541_v0 = vmax.f32 %v1527_v59, 0.0  ;;  %v3425_v14 = vadd.f32 %v1540_v56, %v3320_v27  ;;  %v2893_v56 = vld [vmem:[#allocation2 + $0x1c8] sm:$0xff]   ;;  %v2894_v59 = vld [vmem:[#allocation2 + $0x1d0] sm:$0xff]   ;;  %v2895_v63 = vld [vmem:[#allocation2 + $0x1d8] sm:$0xff]  }
 0xb56   :  { %v3428_v57 = vadd.f32 %v1541_v0, %v3323_v46  ;;  %v2896_v0 = vld [vmem:[#allocation2 + $0x1e0] sm:$0xff]  }
 0xb57   :  { %v1531_v58 = vpop.f32.mrb[68].mxu1 }
 0xb58   :  { %v1532_v2 = vadd.f32 %v2229_v23, %v1531_v58  ;;  %v2699_v3 = vpop.f32.mrb[69].mxu1  ;;  %v1551_v5 = vpack.c.bf16 %v3428_v57, %v3425_v14  ;;  %v2897_v58 = vld [vmem:[#allocation2 + $0x1e8] sm:$0xff]  }
 0xb59   :  { %v1534_v6 = vpop.f32.mrb[70].mxu1 }
 0xb5a   :  { %v1542_v7 = vmax.f32 %v1532_v2, 0.0  ;;  %v1535_v50 = vadd.f32 %v2229_v23, %v1534_v6  ;;  %v2700_v47 = vpop.f32.mrb[71].mxu1  ;;  %2703 = vmatprep.subr.bf16.mxu0 %v1551_v5  ;;  %v2245_v2 = vld [vmem:[%s3564_s5 + $0x1b] ss:$0 sm:$0xff] }
 0xb5b   :  { %2704 = vmatpush3.bf16.msra.mxu0 %v1551_v5  ;;  %v1692_v3 = vmul.f32 %v2245_v2, %v3417_v44  ;;  %v1693_v5 = vmul.f32 %v2245_v2, %v3420_v45 }
 0xb5c   :  { %v1543_v35 = vmax.f32 %v1535_v50, 0.0  ;;  %v3433_v28 = vadd.f32 %v1542_v7, %v3328_v16  ;;  %v2910_v16 = vld [vmem:[%s3560_s1 + $0x10] sm:$0xff]  }
 0xb5d   :  { %v1698_v7 = vadd.f32 %v1692_v3, %v3417_v44  ;;  %v1699_v47 = vadd.f32 %v1693_v5, %v3420_v45 }
 0xb5e   :  { %v3436_v27 = vadd.f32 %v1543_v35, %v3331_v60  ;;  %v2911_v60 = vld [vmem:[%s3560_s1 + $0x18] sm:$0xff]  }
 0xb60   :  { %v1552_v46 = vpack.c.bf16 %v3436_v27, %v3433_v28 }
 0xb62   :  { %2705 = vmatprep.subr.bf16.mxu0 %v1552_v46 }
 0xb63   :  { %2706 = vmatpush3.bf16.msra.mxu0 %v1552_v46 }
 0xb64   :  { %2735 = vmatprep.subr.bf16.mxu0 %v2943_v42 }
 0xb66   :  { %2708 = vmatmul.mubr.msk.bf16.vlgmr.msra.gmra.mrb[60].mxu0 %vm207_vm0, %v2909_v51 }
 0xb67   :  { %2711 = vmatprep.mubr.msk.bf16.mxu0 %vm207_vm0, %v2910_v16  ;;  %2736 = vmatpush3.bf16.msra.mxu0 %v2884_v52  ;;  %v1694_v52 = vmul.f32 %v2245_v2, %v3425_v14 }
 0xb68   :  { %2737 = vmatprep.subr.bf16.mxu0 %v2943_v42 }
 0xb6b   :  { %2738 = vmatpush3.bf16.msra.mxu0 %v2885_v36  ;;  %v1695_v36 = vmul.f32 %v2245_v2, %v3428_v57 }
 0xb6c   :  { %2739 = vmatprep.subr.bf16.mxu0 %v2943_v42 }
 0xb6e   :  { %2712 = vmatmul.mubr.msk.bf16.gmra.mrb[64].mxu0 %vm207_vm0, %v2911_v60 }
 0xb6f   :  { %2751 = vmatprep.mubr.msk.bf16.mxu0 %vm2944_vm1, %v2943_v42  ;;  %2740 = vmatpush3.bf16.msra.mxu0 %v2886_v9 }
 0xb70   :  { %2741 = vmatprep.subr.bf16.mxu0 %v2943_v42 }
 0xb73   :  { %2742 = vmatpush3.bf16.msra.mxu0 %v2887_v10  ;;  %v1700_v10 = vadd.f32 %v1694_v52, %v3425_v14  ;;  %v2905_v52 = vld [vmem:[#allocation2 + $0x228] sm:$0xff]  }
 0xb74   :  { %2743 = vmatprep.subr.bf16.mxu0 %v2943_v42 }
 0xb77   :  { %2744 = vmatpush3.bf16.msra.mxu0 %v2888_v11 }
 0xb78   :  { %2745 = vmatprep.subr.bf16.mxu0 %v2943_v42 }
 0xb7b   :  { %2746 = vmatpush3.bf16.msra.mxu0 %v2889_v12  ;;  %v1701_v12 = vadd.f32 %v1695_v36, %v3428_v57  ;;  %v2906_v36 = vld [vmem:[#allocation2 + $0x230] sm:$0xff]  }
 0xb7c   :  { %2747 = vmatprep.subr.bf16.mxu0 %v2943_v42 }
 0xb7f   :  { %2748 = vmatpush3.bf16.msra.mxu0 %v2890_v53 }
 0xb80   :  { %2749 = vmatprep.subr.bf16.mxu0 %v2943_v42 }
 0xb83   :  { %2750 = vmatpush3.bf16.msra.mxu0 %v2891_v54 }
 0xb84   :  { %2791 = vmatprep.subr.bf16.mxu0 %v2943_v42 }
 0xc39   :  { %v2709_v13 = vpop.f32.mrb[60].mxu0 }
 0xc3a   :  { %v1596_v15 = vadd.f32 %v2709_v13, %v3104_v61  ;;  %v1587_v26 = vpop.f32.mrb[61].mxu0 }
 0xc3b   :  { %v1588_v8 = vadd.f32 %v1587_v26, %v3106_v62  ;;  %v2710_v31 = vpop.f32.mrb[62].mxu0 }
 0xc3c   :  { %v1599_v17 = vadd.f32 %v2710_v31, %v3108_v1  ;;  %v1590_v39 = vpop.f32.mrb[63].mxu0  ;;  %v1620_v41 = vmax.f32 %v1596_v15, 0.0 }
 0xc3d   :  { %v1591_v40 = vadd.f32 %v1590_v39, %v3111_v4  ;;  %v1618_v19 = vmax.f32 %v1588_v8, 0.0  ;;  %v1697_v39 = vmul.f32 %v2245_v2, %v3436_v27 }
 0xc3e   :  { %v1621_v18 = vmax.f32 %v1599_v17, 0.0  ;;  %v1696_v17 = vmul.f32 %v2245_v2, %v3433_v28 }
 0xc3f   :  { %v1619_v21 = vmax.f32 %v1591_v40, 0.0 }
 0xc40   :  { %v1627_v23 = vpack.c.bf16 %v1621_v18, %v1620_v41  ;;  %v1702_v41 = vadd.f32 %v1696_v17, %v3433_v28 }
 0xc41   :  { %v1626_v24 = vpack.c.bf16 %v1619_v21, %v1618_v19  ;;  %v2713_v29 = vpop.f32.mrb[64].mxu0  ;;  %v1703_v19 = vadd.f32 %v1697_v39, %v3436_v27 }
 0xc42   :  { %v1612_v30 = vadd.f32 %v2713_v29, %v3116_v20  ;;  %v1603_v33 = vpop.f32.mrb[65].mxu0 }
 0xc43   :  { %v1604_v61 = vadd.f32 %v1603_v33, %v3118_v22  ;;  %v2714_v34 = vpop.f32.mrb[66].mxu0  ;;  %2716 = vmatpush3.bf16.msra.mxu1 %v1626_v24  ;;  %v2912_v22 = vld [vmem:[%s3561_s2] sm:$0xff]   ;;  %v2898_v33 = vld [vmem:[#allocation2 + $0x1f0] sm:$0xff]  }
 0xc44   :  { %v1615_v62 = vadd.f32 %v2714_v34, %v3120_v25  ;;  %v1606_v1 = vpop.f32.mrb[67].mxu0  ;;  %2717 = vmatprep.subr.bf16.mxu1 %v2943_v42  ;;  %v1624_v37 = vmax.f32 %v1612_v30, 0.0  ;;  %v2913_v25 = vld [vmem:[%s3561_s2 + $0x8] sm:$0xff]  }
 0xc45   :  { %v1607_v4 = vadd.f32 %v1606_v1, %v3123_v32  ;;  %v1622_v43 = vmax.f32 %v1604_v61, 0.0  ;;  %v2914_v32 = vld [vmem:[%s3561_s2 + $0x10] sm:$0xff]   ;;  %v2899_v61 = vld [vmem:[#allocation2 + $0x1f8] sm:$0xff]   ;;  %v2246_v34 = vld [vmem:[%s3564_s5 + $0xb] ss:$0 sm:$0xff] }
 0xc46   :  { %v1625_v38 = vmax.f32 %v1615_v62, 0.0 }
 0xc47   :  { %v1623_v48 = vmax.f32 %v1607_v4, 0.0  ;;  %2718 = vmatpush3.bf16.msra.mxu1 %v1627_v23 }
 0xc48   :  { %v1629_v49 = vpack.c.bf16 %v1625_v38, %v1624_v37  ;;  %2719 = vmatprep.subr.bf16.mxu1 %v2943_v42 }
 0xc49   :  { %v1628_v20 = vpack.c.bf16 %v1623_v48, %v1622_v43 }
 0xc4b   :  { %2720 = vmatpush3.bf16.msra.mxu1 %v1628_v20 }
 0xc4c   :  { %2721 = vmatprep.subr.bf16.mxu1 %v2943_v42 }
 0xc4f   :  { %2722 = vmatpush3.bf16.msra.mxu1 %v1629_v49 }
 0xc50   :  { %2763 = vmatprep.subr.bf16.mxu1 %v2943_v42 }
 0xc52   :  { %2724 = vmatmul.mubr.msk.bf16.vlgmr.msra.gmra.mrb[72].mxu1 %vm312_vm2, %v2912_v22 }
 0xc53   :  { %2727 = vmatprep.mubr.msk.bf16.mxu1 %vm2944_vm1, %v2943_v42  ;;  %2764 = vmatpush3.bf16.msra.mxu1 %v2892_v55 }
 0xc54   :  { %2765 = vmatprep.subr.bf16.mxu1 %v2943_v42 }
 0xc57   :  { %2766 = vmatpush3.bf16.msra.mxu1 %v2893_v56 }
 0xc58   :  { %2767 = vmatprep.subr.bf16.mxu1 %v2943_v42 }
 0xc5a   :  { %2728 = vmatmul.mubr.msk.bf16.gmra.mrb[76].mxu1 %vm312_vm2, %v2913_v25 }
 0xc5b   :  { %2731 = vmatprep.mubr.msk.bf16.mxu1 %vm2944_vm1, %v2943_v42  ;;  %2768 = vmatpush3.bf16.msra.mxu1 %v2894_v59 }
 0xc5c   :  { %2769 = vmatprep.subr.bf16.mxu1 %v2943_v42 }
 0xc5f   :  { %2770 = vmatpush3.bf16.msra.mxu1 %v2895_v63 }
 0xc60   :  { %2771 = vmatprep.subr.bf16.mxu1 %v2943_v42 }
 0xc62   :  { %2732 = vmatmul.mubr.msk.bf16.gmra.mrb[80].mxu1 %vm312_vm2, %v2914_v32 }
 0xc63   :  { %2779 = vmatprep.mubr.msk.bf16.mxu1 %vm2944_vm1, %v2943_v42  ;;  %2772 = vmatpush3.bf16.msra.mxu1 %v2896_v0 }
 0xc64   :  { %2773 = vmatprep.subr.bf16.mxu1 %v2943_v42 }
 0xc67   :  { %2774 = vmatpush3.bf16.msra.mxu1 %v2897_v58 }
 0xc68   :  { %2775 = vmatprep.subr.bf16.mxu1 %v2943_v42 }
 0xc6b   :  { %2776 = vmatpush3.bf16.msra.mxu1 %v2898_v33 }
 0xc6c   :  { %2777 = vmatprep.subr.bf16.mxu1 %v2943_v42 }
 0xc6f   :  { %2778 = vmatpush3.bf16.msra.mxu1 %v2899_v61 }
 0xc70   :  { %2801 = vmatprep.subr.bf16.mxu1 %v2943_v42 }
 0xd25   :  { %v1664_v6 = vpop.f32.mrb[72].mxu1 }
 0xd26   :  { %v2725_v50 = vpop.f32.mrb[73].mxu1  ;;  %v1704_v46 = vadd.f32 %v1698_v7, %v1664_v6 }
 0xd27   :  { %v1667_v35 = vpop.f32.mrb[74].mxu1 }
 0xd28   :  { %v1705_v51 = vadd.f32 %v1699_v47, %v1667_v35  ;;  %v2726_v16 = vpop.f32.mrb[75].mxu1  ;;  %v2900_v35 = vld [vmem:[#allocation2 + $0x200] sm:$0xff]  }
 0xd29   :  { %v2903_v16 = vld [vmem:[#allocation2 + $0x218] sm:$0xff]  }
 0xd2a   :  { %v1710_v60 = vpack.c.bf16 %v1705_v51, %v1704_v46  ;;  %v2901_v46 = vld [vmem:[#allocation2 + $0x208] sm:$0xff]   ;;  %v2902_v51 = vld [vmem:[#allocation2 + $0x210] sm:$0xff]  }
 0xd2c   :  { %2752 = vmatmul.mubr.bf16.vlgmr.msra.gmra.mrb[68].mxu0 %v1710_v60  ;;  %v2904_v60 = vld [vmem:[#allocation2 + $0x220] sm:$0xff]  }
 0xd2d   :  { %v1672_v9 = vpop.f32.mrb[76].mxu1  ;;  %2755 = vmatprep.mubr.msk.bf16.mxu0 %vm2944_vm1, %v2943_v42 }
 0xd2e   :  { %v2729_v11 = vpop.f32.mrb[77].mxu1  ;;  %v1706_v15 = vadd.f32 %v1700_v10, %v1672_v9  ;;  %v2255_v9 = vld [vmem:[%s3564_s5 + $0x13] ss:$0 sm:$0xff] }
 0xd2f   :  { %v1675_v13 = vpop.f32.mrb[78].mxu1 }
 0xd30   :  { %v1707_v26 = vadd.f32 %v1701_v12, %v1675_v13  ;;  %v2730_v8 = vpop.f32.mrb[79].mxu1 }
 0xd32   :  { %v1711_v31 = vpack.c.bf16 %v1707_v26, %v1706_v15 }
 0xd34   :  { %2756 = vmatmul.mubr.bf16.gmra.mrb[72].mxu0 %v1711_v31 }
 0xd35   :  { %v1680_v40 = vpop.f32.mrb[80].mxu1  ;;  %2759 = vmatprep.mubr.msk.bf16.mxu0 %vm2944_vm1, %v2943_v42 }
 0xd36   :  { %v2733_v18 = vpop.f32.mrb[81].mxu1  ;;  %v1708_v23 = vadd.f32 %v1702_v41, %v1680_v40 }
 0xd37   :  { %v1683_v21 = vpop.f32.mrb[82].mxu1 }
 0xd38   :  { %v1709_v24 = vadd.f32 %v1703_v19, %v1683_v21  ;;  %v2734_v29 = vpop.f32.mrb[83].mxu1 }
 0xd3a   :  { %v1712_v30 = vpack.c.bf16 %v1709_v24, %v1708_v23 }
 0xd3c   :  { %2760 = vmatmul.mubr.bf16.gmra.mrb[76].mxu0 %v1712_v30 }
 0xd3d   :  { %2797 = vmatprep.mubr.msk.bf16.mxu0 %vm2944_vm1, %v2943_v42 }
 0xdff   :  { %v1816_v62 = vpop.f32.mrb[68].mxu0 }
 0xe00   :  { %v1817_v1 = vadd.f32 %v2246_v34, %v1816_v62  ;;  %v2753_v4 = vpop.f32.mrb[69].mxu0 }
 0xe01   :  { %v1819_v37 = vpop.f32.mrb[70].mxu0 }
 0xe02   :  { %v1820_v38 = vadd.f32 %v2246_v34, %v1819_v37  ;;  %v2754_v43 = vpop.f32.mrb[71].mxu0  ;;  %v1839_v48 = vmax.f32 %v1817_v1, 0.0 }
 0xe04   :  { %v1840_v49 = vmax.f32 %v1820_v38, 0.0 }
 0xe06   :  { %v1845_v20 = vpack.c.bf16 %v1840_v49, %v1839_v48 }
 0xe07   :  { %v1824_v22 = vpop.f32.mrb[72].mxu0 }
 0xe08   :  { %v1825_v25 = vadd.f32 %v2246_v34, %v1824_v22  ;;  %v2757_v32 = vpop.f32.mrb[73].mxu0  ;;  %2780 = vmatmul.mubr.bf16.vlgmr.msra.gmra.mrb[84].mxu1 %v1845_v20 }
 0xe09   :  { %v1827_v53 = vpop.f32.mrb[74].mxu0  ;;  %2783 = vmatprep.mubr.msk.bf16.mxu1 %vm2944_vm1, %v2943_v42  ;;  %2802 = vmatpush3.bf16.msra.mxu1 %v2900_v35 }
 0xe0a   :  { %v1828_v54 = vadd.f32 %v2246_v34, %v1827_v53  ;;  %v2758_v55 = vpop.f32.mrb[75].mxu0  ;;  %v1841_v56 = vmax.f32 %v1825_v25, 0.0  ;;  %2803 = vmatprep.subr.bf16.mxu1 %v2943_v42 }
 0xe0c   :  { %v1842_v59 = vmax.f32 %v1828_v54, 0.0 }
 0xe0d   :  { %2804 = vmatpush3.bf16.msra.mxu1 %v2901_v46 }
 0xe0e   :  { %v1846_v63 = vpack.c.bf16 %v1842_v59, %v1841_v56  ;;  %2805 = vmatprep.subr.bf16.mxu1 %v2943_v42 }
 0xe0f   :  { %v1832_v0 = vpop.f32.mrb[76].mxu0 }
 0xe10   :  { %v1833_v58 = vadd.f32 %v2246_v34, %v1832_v0  ;;  %v2761_v2 = vpop.f32.mrb[77].mxu0  ;;  %2784 = vmatmul.mubr.bf16.gmra.mrb[88].mxu1 %v1846_v63 }
 0xe11   :  { %v1835_v3 = vpop.f32.mrb[78].mxu0  ;;  %2787 = vmatprep.mubr.msk.bf16.mxu1 %vm2944_vm1, %v2943_v42  ;;  %2806 = vmatpush3.bf16.msra.mxu1 %v2902_v51 }
 0xe12   :  { %v1836_v5 = vadd.f32 %v2246_v34, %v1835_v3  ;;  %v2762_v6 = vpop.f32.mrb[79].mxu0  ;;  %v1843_v7 = vmax.f32 %v1833_v58, 0.0  ;;  %2807 = vmatprep.subr.bf16.mxu1 %v2943_v42 }
 0xe14   :  { %v1844_v50 = vmax.f32 %v1836_v5, 0.0 }
 0xe15   :  { %2808 = vmatpush3.bf16.msra.mxu1 %v2903_v16 }
 0xe16   :  { %v1847_v47 = vpack.c.bf16 %v1844_v50, %v1843_v7  ;;  %2809 = vmatprep.subr.bf16.mxu1 %v2943_v42 }
 0xe18   :  { %2788 = vmatmul.mubr.bf16.gmra.mrb[92].mxu1 %v1847_v47 }
 0xe19   :  { %2817 = vmatprep.mubr.msk.bf16.mxu1 %vm2944_vm1, %v2943_v42  ;;  %2810 = vmatpush3.bf16.msra.mxu1 %v2904_v60 }
 0xe1a   :  { %2811 = vmatprep.subr.bf16.mxu1 %v2943_v42 }
 0xe1d   :  { %2812 = vmatpush3.bf16.msra.mxu1 %v2905_v52 }
 0xe1e   :  { %2813 = vmatprep.subr.bf16.mxu1 %v2943_v42 }
 0xe21   :  { %2814 = vmatpush3.bf16.msra.mxu1 %v2906_v36 }
 0xe22   :  { %2815 = vmatprep.subr.bf16.mxu1 %v2943_v42 }
 0xedb   :  { %v1951_v10 = vpop.f32.mrb[84].mxu1 }
 0xedc   :  { %v1952_v11 = vadd.f32 %v2255_v9, %v1951_v10  ;;  %v2781_v12 = vpop.f32.mrb[85].mxu1 }
 0xedd   :  { %v1954_v13 = vpop.f32.mrb[86].mxu1 }
 0xede   :  { %v1974_v15 = vmax.f32 %v1952_v11, 0.0  ;;  %v1955_v26 = vadd.f32 %v2255_v9, %v1954_v13  ;;  %v2782_v8 = vpop.f32.mrb[87].mxu1 }
 0xee0   :  { %v1975_v31 = vmax.f32 %v1955_v26, 0.0  ;;  %v1980_v17 = vadd.f32 %v1974_v15, %v3417_v44 }
 0xee2   :  { %v1981_v39 = vadd.f32 %v1975_v31, %v3420_v45 }
 0xee3   :  { %v1959_v40 = vpop.f32.mrb[88].mxu1 }
 0xee4   :  { %v1987_v41 = vpack.c.bf16 %v1981_v39, %v1980_v17  ;;  %v1960_v18 = vadd.f32 %v2255_v9, %v1959_v40  ;;  %v2785_v19 = vpop.f32.mrb[89].mxu1 }
 0xee5   :  { %v1962_v21 = vpop.f32.mrb[90].mxu1 }
 0xee6   :  { %v1976_v23 = vmax.f32 %v1960_v18, 0.0  ;;  %v1963_v24 = vadd.f32 %v2255_v9, %v1962_v21  ;;  %v2786_v29 = vpop.f32.mrb[91].mxu1  ;;  %2792 = vmatpush3.bf16.msra.mxu0 %v1987_v41 }
 0xee7   :  { %2793 = vmatprep.subr.bf16.mxu0 %v2943_v42 }
 0xee8   :  { %v1977_v30 = vmax.f32 %v1963_v24, 0.0  ;;  %v1982_v33 = vadd.f32 %v1976_v23, %v3425_v14  ;;  %v1986_v14 = vld [vmem:[%s3562_s3] sm:$0x7] }
 0xeea   :  { %v1983_v61 = vadd.f32 %v1977_v30, %v3428_v57  ;;  %v2907_v57 = vld [vmem:[#allocation2 + $0x238] sm:$0xff]  }
 0xeeb   :  { %v1967_v34 = vpop.f32.mrb[92].mxu1  ;;  %2816 = vmatpush3.bf16.msra.mxu1 %v2907_v57 }
 0xeec   :  { %v1988_v44 = vpack.c.bf16 %v1983_v61, %v1982_v33  ;;  %v1968_v62 = vadd.f32 %v2255_v9, %v1967_v34  ;;  %v2789_v45 = vpop.f32.mrb[93].mxu1 }
 0xeed   :  { %v1970_v1 = vpop.f32.mrb[94].mxu1 }
 0xeee   :  { %v1978_v4 = vmax.f32 %v1968_v62, 0.0  ;;  %v1971_v37 = vadd.f32 %v2255_v9, %v1970_v1  ;;  %v2790_v38 = vpop.f32.mrb[95].mxu1  ;;  %2794 = vmatpush3.bf16.msra.mxu0 %v1988_v44 }
 0xeef   :  { %2795 = vmatprep.subr.bf16.mxu0 %v2943_v42 }
 0xef0   :  { %v1979_v43 = vmax.f32 %v1971_v37, 0.0  ;;  %v1984_v48 = vadd.f32 %v1978_v4, %v3433_v28  ;;  %v2265_v28 = vld [vmem:[%s3564_s5 + $0x20] ss:$0 sm:$0xff] }
 0xef2   :  { %v1985_v49 = vadd.f32 %v1979_v43, %v3436_v27 }
 0xef4   :  { %v1989_v20 = vpack.c.bf16 %v1985_v49, %v1984_v48 }
 0xef6   :  { %2796 = vmatpush3.bf16.msra.mxu0 %v1989_v20 }
 0xef9   :  { %2798 = vmatmul.mubr.msk.bf16.vlgmr.msra.gmra.mrb[80].mxu0 %vm207_vm0, %v1986_v14 }
 0xfcc   :  { %v2027_v22 = vpop.f32.mrb[80].mxu0 }
 0xfcd   :  { %v2033_v25 = vpack.c.bf16 %v2027_v22, %v2027_v22  ;;  %v2799_v32 = vpop.f32.mrb[81].mxu0 }
 0xfce   :  { %v2030_v53 = vpop.f32.mrb[82].mxu0 }
 0xfcf   :  { %v2800_v42 = vpop.f32.mrb[83].mxu0  ;;  %2818 = vmatmul.mubr.bf16.vlgmr.msra.gmra.mrb[96].mxu1 %v2033_v25 }
0x10a2   :  { %v2137_v27 = vpop.f32.mrb[96].mxu1 }
0x10a3   :  { %v2138_v54 = vadd.f32 %v2265_v28, %v2137_v27  ;;  %v2819_v55 = vpop.f32.mrb[97].mxu1 }
0x10a4   :  { %v2140_v56 = vpop.f32.mrb[98].mxu1 }
0x10a5   :  { %2143 = vst [vmem:[%s3565_s6] sm:$0x3f] %v2138_v54  ;;  %v2820_v59 = vpop.f32.mrb[99].mxu1 }
0x10a6   :  { %2148 = vsyncpa [#allocation3], 1 }

// kernel: tpu_custom_call.1
= control target key start
LH: loop header
LB: loop body
LE: loop exit
PB: predicated region body
PF: predicated region fallthrough
CT: control target
= control target key end

     0   :  { %11 = vsyncpa [#allocation3], 0  ;;  %s2939_s21 = smov [#allocation2]   ;;  %s3559_s0 = inlined_call_operand.vmem [shape: f32[1,112,1], index: 0, kind: input, shape index: {}]   ;;  %s3560_s1 = inlined_call_operand.vmem [shape: bf16[1,64,48], index: 1, kind: input, shape index: {}]   ;;  %s3561_s2 = inlined_call_operand.vmem [shape: bf16[1,48,64], index: 2, kind: input, shape index: {}]   ;;  %s3562_s3 = inlined_call_operand.vmem [shape: bf16[6,48], index: 3, kind: input, shape index: {}]   ;;  %s3563_s4 = inlined_call_operand.hbm [shape: bf16[1152,128], index: 4, kind: input, shape index: {}]   ;;  %s3564_s5 = inlined_call_operand.vmem [shape: f32[40,128], index: 5, kind: input, shape index: {}]   ;;  %s3565_s6 = inlined_call_operand.vmem [shape: f32[1,6,128], index: 6, kind: output, shape index: {}]  }
   0x1   :  { %s25_s22 = sshll.u32 %s2939_s21, 4  ;;  %s2915_s25 = scalar_lea.hbm %s3563_s4, 9216  ;;  %s26_s22 = int_to_ptr.vmem [resolvable:$true] %s25_s22 }
   0x2   :  { %p2916_p0 = scmp.ne.s32.totalorder %s3563_s4, %s2915_s25  ;;  %p2919_p1 = scmp.lt.u32.totalorder %s2915_s25, %s3563_s4 }
   0x4   :  { %p2921_p2 = pnand %p2919_p1, %p2916_p0 }
   0x6   :  { %2924 = shalt.err (!%p2921_p2)
}
   0x7   :  { %s2925_s30 = scalar_lea.vmem %s26_s22, 9216  ;;  %p2930_p4 = scmp.lt.s32.totalorder %s26_s22, %s26_s22 }
   0x8   :  { %p2926_p3 = scmp.ne.s32.totalorder %s26_s22, %s2925_s30  ;;  %p2931_p5 = scmp.lt.s32.totalorder %s2925_s30, %s2925_s30 }
   0xa   :  { %p2932_p6 = por %p2931_p5, %p2930_p4 }
   0xc   :  { %p2933_p7 = pnand %p2932_p6, %p2926_p3 }
   0xe   :  { %2936 = shalt.err (!%p2933_p7)
}
   0xf   :  { %s2940_s7 = smov 64   ;;  %s2941_s8 = smov 4  }
  0x10   :  { %31 = dma.hbm_to_vmem [thread:$0]  %s3563_s4, 9216, %s26_s22, [#allocation3], %s2940_s7, %s2940_s7, %s2941_s8  }
  0x11   :  { %2937 = dma.done.wait [#allocation3], 9216  }
  0x12   :  { %2938 = vsyncadd [#allocation3], 4294958080  ;;  %v2942_v0 = vmov 0   ;;  %v40_v1 = vld [vmem:[%s3559_s0 + $0x10] sm:$0xff]  ;;  %v38_v2 = vld [vmem:[%s3559_s0] sm:$0xff]  ;;  %vm207_vm0 = vcmask 392192  }
  0x13   :  { %2828 = vset.pattern.permute.xlu1 %v2942_v0  ;;  %2827 = vset.pattern.permute.xlu0 %v2942_v0  ;;  %v41_v3 = vld [vmem:[%s3559_s0 + $0x18] sm:$0xff]  ;;  %v39_v4 = vld [vmem:[%s3559_s0 + $0x8] sm:$0xff]  ;;  %v42_v6 = vld [vmem:[%s3559_s0 + $0x20] sm:$0xff]  ;;  %v2943_v42 = vmov 0.0   ;;  %vm2944_vm1 = vmmov 0   ;;  %vm312_vm2 = vcmask 523264  }
  0x14   :  { %65 = vperm.xlu1 %2828, %v40_v1   ;;  %55 = vperm.xlu0 %2827, %v38_v2   ;;  %v43_v5 = vld [vmem:[%s3559_s0 + $0x28] sm:$0xff]  ;;  %v45_v7 = vld [vmem:[%s3559_s0 + $0x38] sm:$0xff]  ;;  %v44_v8 = vld [vmem:[%s3559_s0 + $0x30] sm:$0xff] }
  0x15   :  { %v47_v9 = vld [vmem:[%s3559_s0 + $0x48] sm:$0xff]  ;;  %v46_v10 = vld [vmem:[%s3559_s0 + $0x40] sm:$0xff]  ;;  %v49_v11 = vld [vmem:[%s3559_s0 + $0x58] sm:$0xff]  ;;  %2445 = vmatprep.subr.bf16.mxu1 %v2943_v42  ;;  %2453 = vmatprep.mubr.msk.bf16.mxu1 %vm2944_vm1, %v2943_v42 }
  0x16   :  { %v48_v12 = vld [vmem:[%s3559_s0 + $0x50] sm:$0xff]  ;;  %v51_v13 = vld [vmem:[%s3559_s0 + $0x68] sm:$0xff]  ;;  %v3034_v14 = vld [vmem:[%s3560_s1] sm:$0xff]  }
  0x17   :  { %v50_v15 = vld [vmem:[%s3559_s0 + $0x60] sm:$0xff]  ;;  %2437 = vmatprep.mubr.msk.bf16.mxu0 %vm207_vm0, %v3034_v14  ;;  %v3068_v39 = vld [vmem:[%s3560_s1 + $0x8] sm:$0xff]   ;;  %v3073_v40 = vld [vmem:[%s3560_s1 + $0x10] sm:$0xff]  }
  0x18   :  { %70 = vperm.xlu1 %2828, %v41_v3   ;;  %60 = vperm.xlu0 %2827, %v39_v4   ;;  %v2149_v16 = vld [vmem:[%s3564_s5] ss:$0 sm:$0xff]  ;;  %v2150_v20 = vld [vmem:[%s3564_s5 + $0x1] ss:$0 sm:$0xff]  ;;  %v3082_v41 = vld [vmem:[%s3560_s1 + $0x18] sm:$0xff]  }
  0x19   :  { %v2836_v43 = vld [vmem:[#allocation2] sm:$0xff]   ;;  %v2837_v44 = vld [vmem:[#allocation2 + $0x8] sm:$0xff]   ;;  %v2838_v45 = vld [vmem:[#allocation2 + $0x10] sm:$0xff]  }
  0x1a   :  { %v2839_v46 = vld [vmem:[#allocation2 + $0x18] sm:$0xff]   ;;  %v2840_v47 = vld [vmem:[#allocation2 + $0x20] sm:$0xff]   ;;  %v2841_v48 = vld [vmem:[#allocation2 + $0x28] sm:$0xff]  }
  0x1b   :  { %v2151_v53 = vld [vmem:[%s3564_s5 + $0x2] ss:$0 sm:$0xff]  ;;  %v2152_v58 = vld [vmem:[%s3564_s5 + $0x3] ss:$0 sm:$0xff] }
  0x1c   :  { %80 = vperm.xlu1 %2828, %v43_v5   ;;  %75 = vperm.xlu0 %2827, %v42_v6  }
  0x20   :  { %112 = vperm.xlu1 %2828, %v45_v7   ;;  %107 = vperm.xlu0 %2827, %v44_v8  }
  0x24   :  { %122 = vperm.xlu1 %2828, %v47_v9   ;;  %117 = vperm.xlu0 %2827, %v46_v10  }
  0x28   :  { %132 = vperm.xlu1 %2828, %v49_v11   ;;  %127 = vperm.xlu0 %2827, %v48_v12  }
  0x2c   :  { %142 = vperm.xlu1 %2828, %v51_v13   ;;  %137 = vperm.xlu0 %2827, %v50_v15  }
  0x93   :  { %v66_v17 = vpop.permute.xlu1 %65  ;;  %v56_v18 = vpop.permute.xlu0 %55 }
  0x94   :  { %v87_v19 = vmul.f32 %v2149_v16, %v56_v18  ;;  %v89_v23 = vmul.f32 %v2149_v16, %v66_v17 }
  0x96   :  { %v3047_v26 = vadd.f32 %v2150_v20, %v87_v19  ;;  %v3053_v31 = vadd.f32 %v2150_v20, %v89_v23 }
  0x97   :  { %v71_v21 = vpop.permute.xlu1 %70  ;;  %v61_v22 = vpop.permute.xlu0 %60 }
  0x98   :  { %v90_v24 = vmul.f32 %v2149_v16, %v71_v21  ;;  %v88_v25 = vmul.f32 %v2149_v16, %v61_v22 }
  0x9a   :  { %v3049_v27 = vadd.f32 %v2150_v20, %v90_v24  ;;  %v3051_v28 = vadd.f32 %v2150_v20, %v88_v25 }
  0x9b   :  { %v81_v29 = vpop.permute.xlu1 %80  ;;  %v76_v30 = vpop.permute.xlu0 %75 }
  0x9c   :  { %v92_v32 = vmul.f32 %v2149_v16, %v81_v29  ;;  %v91_v33 = vmul.f32 %v2149_v16, %v76_v30  ;;  %v184_v34 = vpack.c.bf16 %v3051_v28, %v3047_v26  ;;  %v185_v37 = vpack.c.bf16 %v3049_v27, %v3053_v31 }
  0x9e   :  { %v3057_v35 = vadd.f32 %v2150_v20, %v92_v32  ;;  %v3059_v36 = vadd.f32 %v2150_v20, %v91_v33  ;;  %2431 = vmatprep.subr.bf16.mxu0 %v184_v34 }
  0x9f   :  { %2432 = vmatpush3.bf16.msra.mxu0 %v184_v34  ;;  %v108_v49 = vpop.permute.xlu0 %107  ;;  %v113_v50 = vpop.permute.xlu1 %112 }
  0xa0   :  { %2433 = vmatprep.subr.bf16.mxu0 %v185_v37  ;;  %v186_v38 = vpack.c.bf16 %v3057_v35, %v3059_v36  ;;  %v149_v56 = vmul.f32 %v2151_v53, %v108_v49  ;;  %v150_v60 = vmul.f32 %v2151_v53, %v113_v50  ;;  %v3134_v50 = vld [vmem:[%s3561_s2] sm:$0xff]  }
  0xa2   :  { %v3106_v62 = vadd.f32 %v2152_v58, %v149_v56  ;;  %v3111_v4 = vadd.f32 %v2152_v58, %v150_v60  ;;  %v2845_v56 = vld [vmem:[#allocation2 + $0x108] sm:$0xff]  }
  0xa3   :  { %2434 = vmatpush3.bf16.msra.mxu0 %v185_v37  ;;  %v118_v51 = vpop.permute.xlu0 %117  ;;  %v123_v52 = vpop.permute.xlu1 %122  ;;  %v2849_v60 = vld [vmem:[#allocation2 + $0x128] sm:$0xff]  }
  0xa4   :  { %2435 = vmatprep.subr.bf16.mxu0 %v186_v38  ;;  %v151_v55 = vmul.f32 %v2151_v53, %v118_v51  ;;  %v152_v59 = vmul.f32 %v2151_v53, %v123_v52  ;;  %v3144_v51 = vld [vmem:[%s3561_s2 + $0x8] sm:$0xff]   ;;  %v3153_v52 = vld [vmem:[%s3561_s2 + $0x10] sm:$0xff]  }
  0xa6   :  { %v3104_v61 = vadd.f32 %v2152_v58, %v151_v55  ;;  %v3108_v1 = vadd.f32 %v2152_v58, %v152_v59  ;;  %v2844_v55 = vld [vmem:[#allocation2 + $0x100] sm:$0xff]  }
  0xa7   :  { %2436 = vmatpush3.bf16.msra.mxu0 %v186_v38  ;;  %v128_v54 = vpop.permute.xlu0 %127  ;;  %v133_v57 = vpop.permute.xlu1 %132  ;;  %v2848_v59 = vld [vmem:[#allocation2 + $0x120] sm:$0xff]  }
  0xa8   :  { %2465 = vmatprep.subr.bf16.mxu0 %v2943_v42  ;;  %v153_v11 = vmul.f32 %v2151_v53, %v128_v54  ;;  %v154_v17 = vmul.f32 %v2151_v53, %v133_v57  ;;  %v2843_v54 = vld [vmem:[#allocation2 + $0x38] sm:$0xff]   ;;  %v2846_v57 = vld [vmem:[#allocation2 + $0x110] sm:$0xff]  }
  0xaa   :  { %2438 = vmatmul.mubr.msk.bf16.vlgmr.msra.gmra.mrb[0].mxu0 %vm207_vm0, %v3068_v39  ;;  %v3118_v22 = vadd.f32 %v2152_v58, %v153_v11  ;;  %v3123_v32 = vadd.f32 %v2152_v58, %v154_v17 }
  0xab   :  { %2441 = vmatprep.mubr.msk.bf16.mxu0 %vm207_vm0, %v3073_v40  ;;  %2466 = vmatpush3.bf16.msra.mxu0 %v2836_v43  ;;  %v138_v63 = vpop.permute.xlu0 %137  ;;  %v143_v5 = vpop.permute.xlu1 %142 }
  0xac   :  { %2467 = vmatprep.subr.bf16.mxu0 %v2943_v42  ;;  %v155_v8 = vmul.f32 %v2151_v53, %v138_v63  ;;  %v156_v13 = vmul.f32 %v2151_v53, %v143_v5  ;;  %v2842_v53 = vld [vmem:[#allocation2 + $0x30] sm:$0xff]   ;;  %v2167_v63 = vld [vmem:[%s3564_s5 + $0x18] ss:$0 sm:$0xff] }
  0xae   :  { %v3116_v20 = vadd.f32 %v2152_v58, %v155_v8  ;;  %v3120_v25 = vadd.f32 %v2152_v58, %v156_v13  ;;  %v2847_v58 = vld [vmem:[#allocation2 + $0x118] sm:$0xff]   ;;  %v386_v13 = vmul.f32 %v2167_v63, %v3053_v31 }
  0xaf   :  { %2468 = vmatpush3.bf16.msra.mxu0 %v2837_v44 }
  0xb0   :  { %2469 = vmatprep.subr.bf16.mxu0 %v2943_v42  ;;  %v392_v17 = vadd.f32 %v386_v13, %v3053_v31 }
  0xb2   :  { %2442 = vmatmul.mubr.msk.bf16.gmra.mrb[4].mxu0 %vm207_vm0, %v3082_v41 }
  0xb3   :  { %2481 = vmatprep.mubr.msk.bf16.mxu0 %vm2944_vm1, %v2943_v42  ;;  %2470 = vmatpush3.bf16.msra.mxu0 %v2838_v45 }
  0xb4   :  { %2471 = vmatprep.subr.bf16.mxu0 %v2943_v42 }
  0xb7   :  { %2472 = vmatpush3.bf16.msra.mxu0 %v2839_v46 }
  0xb8   :  { %2473 = vmatprep.subr.bf16.mxu0 %v2943_v42 }
  0xbb   :  { %2474 = vmatpush3.bf16.msra.mxu0 %v2840_v47 }
  0xbc   :  { %2475 = vmatprep.subr.bf16.mxu0 %v2943_v42 }
  0xbf   :  { %2476 = vmatpush3.bf16.msra.mxu0 %v2841_v48 }
  0xc0   :  { %2477 = vmatprep.subr.bf16.mxu0 %v2943_v42 }
  0xc3   :  { %2478 = vmatpush3.bf16.msra.mxu0 %v2842_v53  ;;  %v2850_v53 = vld [vmem:[#allocation2 + $0x130] sm:$0xff]  }
  0xc4   :  { %2479 = vmatprep.subr.bf16.mxu0 %v2943_v42 }
  0xc7   :  { %2480 = vmatpush3.bf16.msra.mxu0 %v2843_v54  ;;  %v2851_v54 = vld [vmem:[#allocation2 + $0x138] sm:$0xff]  }
 0x17d   :  { %v2439_v0 = vpop.f32.mrb[0].mxu0 }
 0x17e   :  { %v263_v2 = vadd.f32 %v2439_v0, %v3104_v61  ;;  %v254_v3 = vpop.f32.mrb[1].mxu0  ;;  %v384_v0 = vmul.f32 %v2167_v63, %v3047_v26 }
 0x17f   :  { %v255_v6 = vadd.f32 %v254_v3, %v3106_v62  ;;  %v2440_v7 = vpop.f32.mrb[2].mxu0 }
 0x180   :  { %v266_v9 = vadd.f32 %v2440_v7, %v3108_v1  ;;  %v257_v10 = vpop.f32.mrb[3].mxu0  ;;  %v287_v15 = vmax.f32 %v263_v2, 0.0  ;;  %v385_v2 = vmul.f32 %v2167_v63, %v3051_v28  ;;  %v390_v5 = vadd.f32 %v384_v0, %v3047_v26 }
 0x181   :  { %v258_v12 = vadd.f32 %v257_v10, %v3111_v4  ;;  %v285_v18 = vmax.f32 %v255_v6, 0.0 }
 0x182   :  { %v288_v16 = vmax.f32 %v266_v9, 0.0  ;;  %v391_v7 = vadd.f32 %v385_v2, %v3051_v28 }
 0x183   :  { %v286_v19 = vmax.f32 %v258_v12, 0.0 }
 0x184   :  { %v294_v21 = vpack.c.bf16 %v288_v16, %v287_v15  ;;  %v387_v15 = vmul.f32 %v2167_v63, %v3049_v27 }
 0x185   :  { %v2443_v23 = vpop.f32.mrb[4].mxu0  ;;  %v293_v24 = vpack.c.bf16 %v286_v19, %v285_v18 }
 0x186   :  { %v279_v29 = vadd.f32 %v2443_v23, %v3116_v20  ;;  %v270_v30 = vpop.f32.mrb[5].mxu0  ;;  %v393_v19 = vadd.f32 %v387_v15, %v3049_v27 }
 0x187   :  { %v271_v33 = vadd.f32 %v270_v30, %v3118_v22  ;;  %v2444_v34 = vpop.f32.mrb[6].mxu0  ;;  %2446 = vmatpush3.bf16.msra.mxu1 %v293_v24 }
 0x188   :  { %v282_v37 = vadd.f32 %v2444_v34, %v3120_v25  ;;  %v273_v38 = vpop.f32.mrb[7].mxu0  ;;  %2447 = vmatprep.subr.bf16.mxu1 %v2943_v42  ;;  %v291_v44 = vmax.f32 %v279_v29, 0.0  ;;  %v389_v34 = vmul.f32 %v2167_v63, %v3057_v35 }
 0x189   :  { %v274_v43 = vadd.f32 %v273_v38, %v3123_v32  ;;  %v289_v46 = vmax.f32 %v271_v33, 0.0  ;;  %v388_v33 = vmul.f32 %v2167_v63, %v3059_v36 }
 0x18a   :  { %v292_v45 = vmax.f32 %v282_v37, 0.0 }
 0x18b   :  { %v290_v47 = vmax.f32 %v274_v43, 0.0  ;;  %2448 = vmatpush3.bf16.msra.mxu1 %v294_v21  ;;  %v394_v38 = vadd.f32 %v388_v33, %v3059_v36 }
 0x18c   :  { %v296_v48 = vpack.c.bf16 %v292_v45, %v291_v44  ;;  %2449 = vmatprep.subr.bf16.mxu1 %v2943_v42  ;;  %v395_v44 = vadd.f32 %v389_v34, %v3057_v35 }
 0x18d   :  { %v295_v49 = vpack.c.bf16 %v290_v47, %v289_v46 }
 0x18f   :  { %2450 = vmatpush3.bf16.msra.mxu1 %v295_v49 }
 0x190   :  { %2451 = vmatprep.subr.bf16.mxu1 %v2943_v42 }
 0x193   :  { %2452 = vmatpush3.bf16.msra.mxu1 %v296_v48 }
 0x194   :  { %2493 = vmatprep.subr.bf16.mxu1 %v2943_v42 }
 0x196   :  { %2454 = vmatmul.mubr.msk.bf16.vlgmr.msra.gmra.mrb[0].mxu1 %vm312_vm2, %v3134_v50 }
 0x197   :  { %2457 = vmatprep.mubr.msk.bf16.mxu1 %vm2944_vm1, %v2943_v42  ;;  %2494 = vmatpush3.bf16.msra.mxu1 %v2844_v55  ;;  %v2168_v55 = vld [vmem:[%s3564_s5 + $0x8] ss:$0 sm:$0xff] }
 0x198   :  { %2495 = vmatprep.subr.bf16.mxu1 %v2943_v42 }
 0x19b   :  { %2496 = vmatpush3.bf16.msra.mxu1 %v2845_v56 }
 0x19c   :  { %2497 = vmatprep.subr.bf16.mxu1 %v2943_v42 }
 0x19e   :  { %2458 = vmatmul.mubr.msk.bf16.gmra.mrb[4].mxu1 %vm312_vm2, %v3144_v51 }
 0x19f   :  { %2461 = vmatprep.mubr.msk.bf16.mxu1 %vm2944_vm1, %v2943_v42  ;;  %2498 = vmatpush3.bf16.msra.mxu1 %v2846_v57 }
 0x1a0   :  { %2499 = vmatprep.subr.bf16.mxu1 %v2943_v42 }
 0x1a3   :  { %2500 = vmatpush3.bf16.msra.mxu1 %v2847_v58 }
 0x1a4   :  { %2501 = vmatprep.subr.bf16.mxu1 %v2943_v42 }
 0x1a6   :  { %2462 = vmatmul.mubr.msk.bf16.gmra.mrb[8].mxu1 %vm312_vm2, %v3153_v52 }
 0x1a7   :  { %2509 = vmatprep.mubr.msk.bf16.mxu1 %vm2944_vm1, %v2943_v42  ;;  %2502 = vmatpush3.bf16.msra.mxu1 %v2848_v59 }
 0x1a8   :  { %2503 = vmatprep.subr.bf16.mxu1 %v2943_v42 }
 0x1ab   :  { %2504 = vmatpush3.bf16.msra.mxu1 %v2849_v60 }
 0x1ac   :  { %2505 = vmatprep.subr.bf16.mxu1 %v2943_v42 }
 0x1af   :  { %2506 = vmatpush3.bf16.msra.mxu1 %v2850_v53 }
 0x1b0   :  { %2507 = vmatprep.subr.bf16.mxu1 %v2943_v42 }
 0x1b3   :  { %2508 = vmatpush3.bf16.msra.mxu1 %v2851_v54 }
 0x1b4   :  { %2535 = vmatprep.subr.bf16.mxu1 %v2943_v42 }
 0x269   :  { %v356_v3 = vpop.f32.mrb[0].mxu1 }
 0x26a   :  { %v2455_v6 = vpop.f32.mrb[1].mxu1  ;;  %v396_v9 = vadd.f32 %v390_v5, %v356_v3 }
 0x26b   :  { %v359_v8 = vpop.f32.mrb[2].mxu1 }
 0x26c   :  { %v397_v10 = vadd.f32 %v391_v7, %v359_v8  ;;  %v2456_v11 = vpop.f32.mrb[3].mxu1 }
 0x26e   :  { %v402_v12 = vpack.c.bf16 %v397_v10, %v396_v9 }
 0x270   :  { %2482 = vmatmul.mubr.bf16.vlgmr.msra.gmra.mrb[8].mxu0 %v402_v12 }
 0x271   :  { %v364_v16 = vpop.f32.mrb[4].mxu1  ;;  %2485 = vmatprep.mubr.msk.bf16.mxu0 %vm2944_vm1, %v2943_v42 }
 0x272   :  { %v2459_v18 = vpop.f32.mrb[5].mxu1  ;;  %v398_v23 = vadd.f32 %v392_v17, %v364_v16 }
 0x273   :  { %v367_v21 = vpop.f32.mrb[6].mxu1 }
 0x274   :  { %v399_v24 = vadd.f32 %v393_v19, %v367_v21  ;;  %v2460_v29 = vpop.f32.mrb[7].mxu1 }
 0x275   :  { %v2177_v29 = vld [vmem:[%s3564_s5 + $0x10] ss:$0 sm:$0xff] }
 0x276   :  { %v403_v30 = vpack.c.bf16 %v399_v24, %v398_v23 }
 0x278   :  { %2486 = vmatmul.mubr.bf16.gmra.mrb[12].mxu0 %v403_v30 }
 0x279   :  { %v372_v37 = vpop.f32.mrb[8].mxu1  ;;  %2489 = vmatprep.mubr.msk.bf16.mxu0 %vm2944_vm1, %v2943_v42 }
 0x27a   :  { %v2463_v43 = vpop.f32.mrb[9].mxu1  ;;  %v400_v46 = vadd.f32 %v394_v38, %v372_v37 }
 0x27b   :  { %v375_v45 = vpop.f32.mrb[10].mxu1 }
 0x27c   :  { %v401_v47 = vadd.f32 %v395_v44, %v375_v45  ;;  %v2464_v48 = vpop.f32.mrb[11].mxu1 }
 0x27e   :  { %v404_v49 = vpack.c.bf16 %v401_v47, %v400_v46 }
 0x280   :  { %2490 = vmatmul.mubr.bf16.gmra.mrb[16].mxu0 %v404_v49 }
 0x281   :  { %2527 = vmatprep.mubr.msk.bf16.mxu0 %vm207_vm0, %v3034_v14 }
 0x343   :  { %v508_v56 = vpop.f32.mrb[8].mxu0 }
 0x344   :  { %v509_v57 = vadd.f32 %v2168_v55, %v508_v56  ;;  %v2483_v58 = vpop.f32.mrb[9].mxu0 }
 0x345   :  { %v511_v59 = vpop.f32.mrb[10].mxu0 }
 0x346   :  { %v512_v60 = vadd.f32 %v2168_v55, %v511_v59  ;;  %v2484_v63 = vpop.f32.mrb[11].mxu0  ;;  %v531_v0 = vmax.f32 %v509_v57, 0.0 }
 0x348   :  { %v532_v14 = vmax.f32 %v512_v60, 0.0 }
 0x34a   :  { %v537_v2 = vpack.c.bf16 %v532_v14, %v531_v0 }
 0x34b   :  { %v516_v3 = vpop.f32.mrb[12].mxu0 }
 0x34c   :  { %v517_v5 = vadd.f32 %v2168_v55, %v516_v3  ;;  %v2487_v6 = vpop.f32.mrb[13].mxu0  ;;  %2510 = vmatmul.mubr.bf16.vlgmr.msra.gmra.mrb[12].mxu1 %v537_v2 }
 0x34d   :  { %v519_v7 = vpop.f32.mrb[14].mxu0  ;;  %2513 = vmatprep.mubr.msk.bf16.mxu1 %vm2944_vm1, %v2943_v42 }
 0x34e   :  { %v520_v8 = vadd.f32 %v2168_v55, %v519_v7  ;;  %v2488_v9 = vpop.f32.mrb[15].mxu0  ;;  %v533_v10 = vmax.f32 %v517_v5, 0.0 }
 0x34f   :  { %v2854_v9 = vld [vmem:[#allocation2 + $0x50] sm:$0xff]  }
 0x350   :  { %v534_v11 = vmax.f32 %v520_v8, 0.0 }
 0x352   :  { %v538_v12 = vpack.c.bf16 %v534_v11, %v533_v10  ;;  %v2855_v10 = vld [vmem:[#allocation2 + $0x58] sm:$0xff]   ;;  %v2856_v11 = vld [vmem:[#allocation2 + $0x60] sm:$0xff]  }
 0x353   :  { %v524_v13 = vpop.f32.mrb[16].mxu0 }
 0x354   :  { %v525_v15 = vadd.f32 %v2168_v55, %v524_v13  ;;  %v2491_v16 = vpop.f32.mrb[17].mxu0  ;;  %2514 = vmatmul.mubr.bf16.gmra.mrb[16].mxu1 %v538_v12  ;;  %v2857_v12 = vld [vmem:[#allocation2 + $0x68] sm:$0xff]  }
 0x355   :  { %v527_v17 = vpop.f32.mrb[18].mxu0  ;;  %2517 = vmatprep.mubr.msk.bf16.mxu1 %vm2944_vm1, %v2943_v42 }
 0x356   :  { %v528_v18 = vadd.f32 %v2168_v55, %v527_v17  ;;  %v2492_v19 = vpop.f32.mrb[19].mxu0  ;;  %v535_v21 = vmax.f32 %v525_v15, 0.0 }
 0x358   :  { %v536_v23 = vmax.f32 %v528_v18, 0.0 }
 0x35a   :  { %v539_v24 = vpack.c.bf16 %v536_v23, %v535_v21 }
 0x35c   :  { %2518 = vmatmul.mubr.bf16.gmra.mrb[20].mxu1 %v539_v24 }
 0x35d   :  { %2543 = vmatprep.mubr.msk.bf16.mxu1 %vm2944_vm1, %v2943_v42 }
 0x41f   :  { %v643_v30 = vpop.f32.mrb[12].mxu1 }
 0x420   :  { %v644_v33 = vadd.f32 %v2177_v29, %v643_v30  ;;  %v2511_v34 = vpop.f32.mrb[13].mxu1 }
 0x421   :  { %v646_v37 = vpop.f32.mrb[14].mxu1 }
 0x422   :  { %v666_v38 = vmax.f32 %v644_v33, 0.0  ;;  %v647_v43 = vadd.f32 %v2177_v29, %v646_v37  ;;  %v2512_v44 = vpop.f32.mrb[15].mxu1 }
 0x424   :  { %v667_v45 = vmax.f32 %v647_v43, 0.0  ;;  %v3202_v46 = vadd.f32 %v666_v38, %v3047_v26 }
 0x426   :  { %v3205_v47 = vadd.f32 %v667_v45, %v3051_v28 }
 0x427   :  { %v651_v48 = vpop.f32.mrb[16].mxu1 }
 0x428   :  { %v652_v49 = vadd.f32 %v2177_v29, %v651_v48  ;;  %v2515_v53 = vpop.f32.mrb[17].mxu1  ;;  %v678_v54 = vpack.c.bf16 %v3205_v47, %v3202_v46 }
 0x429   :  { %v654_v55 = vpop.f32.mrb[18].mxu1 }
 0x42a   :  { %v668_v56 = vmax.f32 %v652_v49, 0.0  ;;  %v655_v57 = vadd.f32 %v2177_v29, %v654_v55  ;;  %v2516_v58 = vpop.f32.mrb[19].mxu1  ;;  %2521 = vmatprep.subr.bf16.mxu0 %v678_v54 }
 0x42b   :  { %2522 = vmatpush3.bf16.msra.mxu0 %v678_v54 }
 0x42c   :  { %v669_v59 = vmax.f32 %v655_v57, 0.0  ;;  %v3210_v60 = vadd.f32 %v668_v56, %v3053_v31 }
 0x42e   :  { %v3213_v26 = vadd.f32 %v669_v59, %v3049_v27 }
 0x42f   :  { %v659_v28 = vpop.f32.mrb[20].mxu1 }
 0x430   :  { %v660_v63 = vadd.f32 %v2177_v29, %v659_v28  ;;  %v2519_v0 = vpop.f32.mrb[21].mxu1  ;;  %v679_v14 = vpack.c.bf16 %v3213_v26, %v3210_v60 }
 0x431   :  { %v662_v2 = vpop.f32.mrb[22].mxu1  ;;  %v2859_v0 = vld [vmem:[#allocation2 + $0x78] sm:$0xff]  }
 0x432   :  { %v670_v3 = vmax.f32 %v660_v63, 0.0  ;;  %v663_v5 = vadd.f32 %v2177_v29, %v662_v2  ;;  %v2520_v6 = vpop.f32.mrb[23].mxu1  ;;  %2523 = vmatprep.subr.bf16.mxu0 %v679_v14  ;;  %v2858_v63 = vld [vmem:[#allocation2 + $0x70] sm:$0xff]   ;;  %v2861_v2 = vld [vmem:[#allocation2 + $0x148] sm:$0xff]  }
 0x433   :  { %2524 = vmatpush3.bf16.msra.mxu0 %v679_v14  ;;  %v2860_v14 = vld [vmem:[#allocation2 + $0x140] sm:$0xff]  }
 0x434   :  { %v671_v7 = vmax.f32 %v663_v5, 0.0  ;;  %v3218_v8 = vadd.f32 %v670_v3, %v3059_v36  ;;  %v2853_v36 = vld [vmem:[#allocation2 + $0x48] sm:$0xff]   ;;  %v2862_v3 = vld [vmem:[#allocation2 + $0x150] sm:$0xff]   ;;  %v2863_v5 = vld [vmem:[#allocation2 + $0x158] sm:$0xff]  }
 0x435   :  { %v2864_v6 = vld [vmem:[#allocation2 + $0x160] sm:$0xff]  }
 0x436   :  { %v3221_v31 = vadd.f32 %v671_v7, %v3057_v35  ;;  %v2852_v35 = vld [vmem:[#allocation2 + $0x40] sm:$0xff]   ;;  %v2865_v7 = vld [vmem:[#allocation2 + $0x168] sm:$0xff]  }
 0x438   :  { %v680_v27 = vpack.c.bf16 %v3221_v31, %v3218_v8 }
 0x43a   :  { %2525 = vmatprep.subr.bf16.mxu0 %v680_v27 }
 0x43b   :  { %2526 = vmatpush3.bf16.msra.mxu0 %v680_v27  ;;  %v2193_v27 = vld [vmem:[%s3564_s5 + $0x19] ss:$0 sm:$0xff] }
 0x43c   :  { %2555 = vmatprep.subr.bf16.mxu0 %v2943_v42 }
 0x43e   :  { %2528 = vmatmul.mubr.msk.bf16.vlgmr.msra.gmra.mrb[20].mxu0 %vm207_vm0, %v3068_v39 }
 0x43f   :  { %2531 = vmatprep.mubr.msk.bf16.mxu0 %vm207_vm0, %v3073_v40  ;;  %2556 = vmatpush3.bf16.msra.mxu0 %v2852_v35  ;;  %v820_v35 = vmul.f32 %v2193_v27, %v3202_v46 }
 0x440   :  { %2557 = vmatprep.subr.bf16.mxu0 %v2943_v42 }
 0x443   :  { %2558 = vmatpush3.bf16.msra.mxu0 %v2853_v36  ;;  %v821_v36 = vmul.f32 %v2193_v27, %v3205_v47 }
 0x444   :  { %2559 = vmatprep.subr.bf16.mxu0 %v2943_v42 }
 0x446   :  { %2532 = vmatmul.mubr.msk.bf16.gmra.mrb[24].mxu0 %vm207_vm0, %v3082_v41 }
 0x447   :  { %2571 = vmatprep.mubr.msk.bf16.mxu0 %vm2944_vm1, %v2943_v42  ;;  %2560 = vmatpush3.bf16.msra.mxu0 %v2854_v9 }
 0x448   :  { %2561 = vmatprep.subr.bf16.mxu0 %v2943_v42 }
 0x44b   :  { %2562 = vmatpush3.bf16.msra.mxu0 %v2855_v10  ;;  %v826_v10 = vadd.f32 %v820_v35, %v3202_v46 }
 0x44c   :  { %2563 = vmatprep.subr.bf16.mxu0 %v2943_v42 }
 0x44f   :  { %2564 = vmatpush3.bf16.msra.mxu0 %v2856_v11 }
 0x450   :  { %2565 = vmatprep.subr.bf16.mxu0 %v2943_v42 }
 0x453   :  { %2566 = vmatpush3.bf16.msra.mxu0 %v2857_v12  ;;  %v827_v12 = vadd.f32 %v821_v36, %v3205_v47 }
 0x454   :  { %2567 = vmatprep.subr.bf16.mxu0 %v2943_v42 }
 0x457   :  { %2568 = vmatpush3.bf16.msra.mxu0 %v2858_v63  ;;  %v2866_v63 = vld [vmem:[#allocation2 + $0x170] sm:$0xff]  }
 0x458   :  { %2569 = vmatprep.subr.bf16.mxu0 %v2943_v42 }
 0x45b   :  { %2570 = vmatpush3.bf16.msra.mxu0 %v2859_v0  ;;  %v2867_v0 = vld [vmem:[#allocation2 + $0x178] sm:$0xff]  }
 0x511   :  { %v2529_v13 = vpop.f32.mrb[20].mxu0 }
 0x512   :  { %v724_v15 = vadd.f32 %v2529_v13, %v3104_v61  ;;  %v715_v16 = vpop.f32.mrb[21].mxu0 }
 0x513   :  { %v716_v17 = vadd.f32 %v715_v16, %v3106_v62  ;;  %v2530_v18 = vpop.f32.mrb[22].mxu0 }
 0x514   :  { %v727_v19 = vadd.f32 %v2530_v18, %v3108_v1  ;;  %v718_v21 = vpop.f32.mrb[23].mxu0  ;;  %v748_v24 = vmax.f32 %v724_v15, 0.0 }
 0x515   :  { %v719_v23 = vadd.f32 %v718_v21, %v3111_v4  ;;  %v746_v30 = vmax.f32 %v716_v17, 0.0  ;;  %v823_v21 = vmul.f32 %v2193_v27, %v3213_v26 }
 0x516   :  { %v749_v29 = vmax.f32 %v727_v19, 0.0  ;;  %v822_v19 = vmul.f32 %v2193_v27, %v3210_v60 }
 0x517   :  { %v747_v33 = vmax.f32 %v719_v23, 0.0 }
 0x518   :  { %v755_v34 = vpack.c.bf16 %v749_v29, %v748_v24  ;;  %v828_v24 = vadd.f32 %v822_v19, %v3210_v60 }
 0x519   :  { %v754_v37 = vpack.c.bf16 %v747_v33, %v746_v30  ;;  %v2533_v38 = vpop.f32.mrb[24].mxu0  ;;  %v829_v30 = vadd.f32 %v823_v21, %v3213_v26 }
 0x51a   :  { %v740_v43 = vadd.f32 %v2533_v38, %v3116_v20  ;;  %v731_v44 = vpop.f32.mrb[25].mxu0 }
 0x51b   :  { %v732_v45 = vadd.f32 %v731_v44, %v3118_v22  ;;  %v2534_v48 = vpop.f32.mrb[26].mxu0  ;;  %2536 = vmatpush3.bf16.msra.mxu1 %v754_v37  ;;  %v824_v44 = vmul.f32 %v2193_v27, %v3218_v8 }
 0x51c   :  { %v743_v49 = vadd.f32 %v2534_v48, %v3120_v25  ;;  %v734_v53 = vpop.f32.mrb[27].mxu0  ;;  %2537 = vmatprep.subr.bf16.mxu1 %v2943_v42  ;;  %v752_v55 = vmax.f32 %v740_v43, 0.0 }
 0x51d   :  { %v735_v54 = vadd.f32 %v734_v53, %v3123_v32  ;;  %v750_v57 = vmax.f32 %v732_v45, 0.0  ;;  %v825_v45 = vmul.f32 %v2193_v27, %v3221_v31 }
 0x51e   :  { %v753_v56 = vmax.f32 %v743_v49, 0.0  ;;  %v830_v49 = vadd.f32 %v824_v44, %v3218_v8 }
 0x51f   :  { %v751_v58 = vmax.f32 %v735_v54, 0.0  ;;  %2538 = vmatpush3.bf16.msra.mxu1 %v755_v34  ;;  %v831_v54 = vadd.f32 %v825_v45, %v3221_v31 }
 0x520   :  { %v757_v59 = vpack.c.bf16 %v753_v56, %v752_v55  ;;  %2539 = vmatprep.subr.bf16.mxu1 %v2943_v42 }
 0x521   :  { %v756_v28 = vpack.c.bf16 %v751_v58, %v750_v57 }
 0x523   :  { %2540 = vmatpush3.bf16.msra.mxu1 %v756_v28  ;;  %v3293_v28 = vld [vmem:[%s3560_s1] sm:$0xff]  }
 0x524   :  { %2541 = vmatprep.subr.bf16.mxu1 %v2943_v42 }
 0x527   :  { %2542 = vmatpush3.bf16.msra.mxu1 %v757_v59 }
 0x528   :  { %2583 = vmatprep.subr.bf16.mxu1 %v2943_v42 }
 0x52a   :  { %2544 = vmatmul.mubr.msk.bf16.vlgmr.msra.gmra.mrb[24].mxu1 %vm312_vm2, %v3134_v50 }
 0x52b   :  { %2547 = vmatprep.mubr.msk.bf16.mxu1 %vm2944_vm1, %v2943_v42  ;;  %2584 = vmatpush3.bf16.msra.mxu1 %v2860_v14  ;;  %v2194_v14 = vld [vmem:[%s3564_s5 + $0x9] ss:$0 sm:$0xff] }
 0x52c   :  { %2585 = vmatprep.subr.bf16.mxu1 %v2943_v42 }
 0x52f   :  { %2586 = vmatpush3.bf16.msra.mxu1 %v2861_v2 }
 0x530   :  { %2587 = vmatprep.subr.bf16.mxu1 %v2943_v42 }
 0x532   :  { %2548 = vmatmul.mubr.msk.bf16.gmra.mrb[28].mxu1 %vm312_vm2, %v3144_v51 }
 0x533   :  { %2551 = vmatprep.mubr.msk.bf16.mxu1 %vm2944_vm1, %v2943_v42  ;;  %2588 = vmatpush3.bf16.msra.mxu1 %v2862_v3 }
 0x534   :  { %2589 = vmatprep.subr.bf16.mxu1 %v2943_v42 }
 0x537   :  { %2590 = vmatpush3.bf16.msra.mxu1 %v2863_v5 }
 0x538   :  { %2591 = vmatprep.subr.bf16.mxu1 %v2943_v42 }
 0x53a   :  { %2552 = vmatmul.mubr.msk.bf16.gmra.mrb[32].mxu1 %vm312_vm2, %v3153_v52 }
 0x53b   :  { %2599 = vmatprep.mubr.msk.bf16.mxu1 %vm2944_vm1, %v2943_v42  ;;  %2592 = vmatpush3.bf16.msra.mxu1 %v2864_v6 }
 0x53c   :  { %2593 = vmatprep.subr.bf16.mxu1 %v2943_v42 }
 0x53f   :  { %2594 = vmatpush3.bf16.msra.mxu1 %v2865_v7 }
 0x540   :  { %2595 = vmatprep.subr.bf16.mxu1 %v2943_v42 }
 0x543   :  { %2596 = vmatpush3.bf16.msra.mxu1 %v2866_v63 }
 0x544   :  { %2597 = vmatprep.subr.bf16.mxu1 %v2943_v42 }
 0x547   :  { %2598 = vmatpush3.bf16.msra.mxu1 %v2867_v0 }
 0x548   :  { %2625 = vmatprep.subr.bf16.mxu1 %v2943_v42 }
 0x5fd   :  { %v792_v9 = vpop.f32.mrb[24].mxu1 }
 0x5fe   :  { %v2545_v11 = vpop.f32.mrb[25].mxu1  ;;  %v832_v15 = vadd.f32 %v826_v10, %v792_v9 }
 0x5ff   :  { %v795_v13 = vpop.f32.mrb[26].mxu1 }
 0x600   :  { %v833_v16 = vadd.f32 %v827_v12, %v795_v13  ;;  %v2546_v17 = vpop.f32.mrb[27].mxu1 }
 0x602   :  { %v838_v18 = vpack.c.bf16 %v833_v16, %v832_v15 }
 0x604   :  { %2572 = vmatmul.mubr.bf16.vlgmr.msra.gmra.mrb[28].mxu0 %v838_v18 }
 0x605   :  { %v800_v23 = vpop.f32.mrb[28].mxu1  ;;  %2575 = vmatprep.mubr.msk.bf16.mxu0 %vm2944_vm1, %v2943_v42 }
 0x606   :  { %v2549_v29 = vpop.f32.mrb[29].mxu1  ;;  %v834_v34 = vadd.f32 %v828_v24, %v800_v23 }
 0x607   :  { %v803_v33 = vpop.f32.mrb[30].mxu1 }
 0x608   :  { %v835_v37 = vadd.f32 %v829_v30, %v803_v33  ;;  %v2550_v38 = vpop.f32.mrb[31].mxu1 }
 0x60a   :  { %v839_v43 = vpack.c.bf16 %v835_v37, %v834_v34 }
 0x60c   :  { %2576 = vmatmul.mubr.bf16.gmra.mrb[32].mxu0 %v839_v43  ;;  %v2203_v43 = vld [vmem:[%s3564_s5 + $0x11] ss:$0 sm:$0xff] }
 0x60d   :  { %v808_v48 = vpop.f32.mrb[32].mxu1  ;;  %2579 = vmatprep.mubr.msk.bf16.mxu0 %vm2944_vm1, %v2943_v42 }
 0x60e   :  { %v2553_v53 = vpop.f32.mrb[33].mxu1  ;;  %v836_v56 = vadd.f32 %v830_v49, %v808_v48 }
 0x60f   :  { %v811_v55 = vpop.f32.mrb[34].mxu1 }
 0x610   :  { %v837_v57 = vadd.f32 %v831_v54, %v811_v55  ;;  %v2554_v58 = vpop.f32.mrb[35].mxu1 }
 0x612   :  { %v840_v59 = vpack.c.bf16 %v837_v57, %v836_v56 }
 0x614   :  { %2580 = vmatmul.mubr.bf16.gmra.mrb[36].mxu0 %v840_v59 }
 0x615   :  { %2617 = vmatprep.mubr.msk.bf16.mxu0 %vm207_vm0, %v3293_v28 }
 0x6d7   :  { %v944_v2 = vpop.f32.mrb[28].mxu0 }
 0x6d8   :  { %v945_v3 = vadd.f32 %v2194_v14, %v944_v2  ;;  %v2573_v5 = vpop.f32.mrb[29].mxu0 }
 0x6d9   :  { %v947_v6 = vpop.f32.mrb[30].mxu0 }
 0x6da   :  { %v948_v7 = vadd.f32 %v2194_v14, %v947_v6  ;;  %v2574_v27 = vpop.f32.mrb[31].mxu0  ;;  %v967_v35 = vmax.f32 %v945_v3, 0.0 }
 0x6dc   :  { %v968_v36 = vmax.f32 %v948_v7, 0.0 }
 0x6de   :  { %v973_v9 = vpack.c.bf16 %v968_v36, %v967_v35 }
 0x6df   :  { %v952_v10 = vpop.f32.mrb[32].mxu0 }
 0x6e0   :  { %v953_v11 = vadd.f32 %v2194_v14, %v952_v10  ;;  %v2577_v12 = vpop.f32.mrb[33].mxu0  ;;  %2600 = vmatmul.mubr.bf16.vlgmr.msra.gmra.mrb[36].mxu1 %v973_v9 }
 0x6e1   :  { %v955_v13 = vpop.f32.mrb[34].mxu0  ;;  %2603 = vmatprep.mubr.msk.bf16.mxu1 %vm2944_vm1, %v2943_v42 }
 0x6e2   :  { %v956_v15 = vadd.f32 %v2194_v14, %v955_v13  ;;  %v2578_v16 = vpop.f32.mrb[35].mxu0  ;;  %v969_v17 = vmax.f32 %v953_v11, 0.0 }
 0x6e4   :  { %v970_v18 = vmax.f32 %v956_v15, 0.0 }
 0x6e6   :  { %v974_v19 = vpack.c.bf16 %v970_v18, %v969_v17  ;;  %v2870_v17 = vld [vmem:[#allocation2 + $0x90] sm:$0xff]  }
 0x6e7   :  { %v960_v21 = vpop.f32.mrb[36].mxu0 }
 0x6e8   :  { %v961_v23 = vadd.f32 %v2194_v14, %v960_v21  ;;  %v2581_v24 = vpop.f32.mrb[37].mxu0  ;;  %2604 = vmatmul.mubr.bf16.gmra.mrb[40].mxu1 %v974_v19 }
 0x6e9   :  { %v963_v29 = vpop.f32.mrb[38].mxu0  ;;  %2607 = vmatprep.mubr.msk.bf16.mxu1 %vm2944_vm1, %v2943_v42 }
 0x6ea   :  { %v964_v30 = vadd.f32 %v2194_v14, %v963_v29  ;;  %v2582_v33 = vpop.f32.mrb[39].mxu0  ;;  %v971_v34 = vmax.f32 %v961_v23, 0.0 }
 0x6ec   :  { %v972_v37 = vmax.f32 %v964_v30, 0.0 }
 0x6ee   :  { %v975_v38 = vpack.c.bf16 %v972_v37, %v971_v34 }
 0x6f0   :  { %2608 = vmatmul.mubr.bf16.gmra.mrb[44].mxu1 %v975_v38 }
 0x6f1   :  { %2633 = vmatprep.mubr.msk.bf16.mxu1 %vm2944_vm1, %v2943_v42 }
 0x7b3   :  { %v1079_v44 = vpop.f32.mrb[36].mxu1 }
 0x7b4   :  { %v1080_v45 = vadd.f32 %v2203_v43, %v1079_v44  ;;  %v2601_v48 = vpop.f32.mrb[37].mxu1 }
 0x7b5   :  { %v1082_v49 = vpop.f32.mrb[38].mxu1 }
 0x7b6   :  { %v1102_v53 = vmax.f32 %v1080_v45, 0.0  ;;  %v1083_v54 = vadd.f32 %v2203_v43, %v1082_v49  ;;  %v2602_v55 = vpop.f32.mrb[39].mxu1 }
 0x7b8   :  { %v1103_v56 = vmax.f32 %v1083_v54, 0.0  ;;  %v3312_v57 = vadd.f32 %v1102_v53, %v3202_v46 }
 0x7ba   :  { %v3315_v58 = vadd.f32 %v1103_v56, %v3205_v47 }
 0x7bb   :  { %v1087_v59 = vpop.f32.mrb[40].mxu1 }
 0x7bc   :  { %v1088_v63 = vadd.f32 %v2203_v43, %v1087_v59  ;;  %v2605_v0 = vpop.f32.mrb[41].mxu1  ;;  %v1114_v14 = vpack.c.bf16 %v3315_v58, %v3312_v57 }
 0x7bd   :  { %v1090_v2 = vpop.f32.mrb[42].mxu1 }
 0x7be   :  { %v1104_v3 = vmax.f32 %v1088_v63, 0.0  ;;  %v1091_v5 = vadd.f32 %v2203_v43, %v1090_v2  ;;  %v2606_v6 = vpop.f32.mrb[43].mxu1  ;;  %2611 = vmatprep.subr.bf16.mxu0 %v1114_v14 }
 0x7bf   :  { %2612 = vmatpush3.bf16.msra.mxu0 %v1114_v14 }
 0x7c0   :  { %v1105_v7 = vmax.f32 %v1091_v5, 0.0  ;;  %v3320_v27 = vadd.f32 %v1104_v3, %v3210_v60 }
 0x7c2   :  { %v3323_v46 = vadd.f32 %v1105_v7, %v3213_v26  ;;  %v2874_v7 = vld [vmem:[#allocation2 + $0xb0] sm:$0xff]  }
 0x7c3   :  { %v1095_v47 = vpop.f32.mrb[44].mxu1 }
 0x7c4   :  { %v1096_v35 = vadd.f32 %v2203_v43, %v1095_v47  ;;  %v2609_v36 = vpop.f32.mrb[45].mxu1  ;;  %v1115_v9 = vpack.c.bf16 %v3323_v46, %v3320_v27  ;;  %v2876_v47 = vld [vmem:[#allocation2 + $0x180] sm:$0xff]  }
 0x7c5   :  { %v1098_v10 = vpop.f32.mrb[46].mxu1  ;;  %v2880_v36 = vld [vmem:[#allocation2 + $0x1a0] sm:$0xff]  }
 0x7c6   :  { %v1106_v11 = vmax.f32 %v1096_v35, 0.0  ;;  %v1099_v12 = vadd.f32 %v2203_v43, %v1098_v10  ;;  %v2610_v13 = vpop.f32.mrb[47].mxu1  ;;  %2613 = vmatprep.subr.bf16.mxu0 %v1115_v9  ;;  %v2877_v35 = vld [vmem:[#allocation2 + $0x188] sm:$0xff]   ;;  %v2219_v10 = vld [vmem:[%s3564_s5 + $0x1a] ss:$0 sm:$0xff] }
 0x7c7   :  { %2614 = vmatpush3.bf16.msra.mxu0 %v1115_v9  ;;  %v2881_v9 = vld [vmem:[#allocation2 + $0x1a8] sm:$0xff]  }
 0x7c8   :  { %v1107_v15 = vmax.f32 %v1099_v12, 0.0  ;;  %v3328_v16 = vadd.f32 %v1106_v11, %v3218_v8  ;;  %v2868_v8 = vld [vmem:[#allocation2 + $0x80] sm:$0xff]   ;;  %v1256_v11 = vmul.f32 %v2219_v10, %v3312_v57  ;;  %v1257_v12 = vmul.f32 %v2219_v10, %v3315_v58 }
 0x7ca   :  { %v3331_v60 = vadd.f32 %v1107_v15, %v3221_v31  ;;  %v2869_v31 = vld [vmem:[#allocation2 + $0x88] sm:$0xff]   ;;  %v1262_v15 = vadd.f32 %v1256_v11, %v3312_v57 }
 0x7cc   :  { %v1116_v26 = vpack.c.bf16 %v3331_v60, %v3328_v16 }
 0x7ce   :  { %2615 = vmatprep.subr.bf16.mxu0 %v1116_v26 }
 0x7cf   :  { %2616 = vmatpush3.bf16.msra.mxu0 %v1116_v26 }
 0x7d0   :  { %2645 = vmatprep.subr.bf16.mxu0 %v2943_v42 }
 0x7d2   :  { %2618 = vmatmul.mubr.msk.bf16.vlgmr.msra.gmra.mrb[40].mxu0 %vm207_vm0, %v3068_v39  ;;  %v2871_v39 = vld [vmem:[#allocation2 + $0x98] sm:$0xff]  }
 0x7d3   :  { %2621 = vmatprep.mubr.msk.bf16.mxu0 %vm207_vm0, %v3073_v40  ;;  %2646 = vmatpush3.bf16.msra.mxu0 %v2868_v8  ;;  %v2872_v40 = vld [vmem:[#allocation2 + $0xa0] sm:$0xff]   ;;  %v1263_v8 = vadd.f32 %v1257_v12, %v3315_v58 }
 0x7d4   :  { %2647 = vmatprep.subr.bf16.mxu0 %v2943_v42 }
 0x7d7   :  { %2648 = vmatpush3.bf16.msra.mxu0 %v2869_v31 }
 0x7d8   :  { %2649 = vmatprep.subr.bf16.mxu0 %v2943_v42 }
 0x7da   :  { %2622 = vmatmul.mubr.msk.bf16.gmra.mrb[44].mxu0 %vm207_vm0, %v3082_v41  ;;  %v2873_v41 = vld [vmem:[#allocation2 + $0xa8] sm:$0xff]  }
 0x7db   :  { %2661 = vmatprep.mubr.msk.bf16.mxu0 %vm2944_vm1, %v2943_v42  ;;  %2650 = vmatpush3.bf16.msra.mxu0 %v2870_v17 }
 0x7dc   :  { %2651 = vmatprep.subr.bf16.mxu0 %v2943_v42 }
 0x7df   :  { %2652 = vmatpush3.bf16.msra.mxu0 %v2871_v39 }
 0x7e0   :  { %2653 = vmatprep.subr.bf16.mxu0 %v2943_v42 }
 0x7e3   :  { %2654 = vmatpush3.bf16.msra.mxu0 %v2872_v40 }
 0x7e4   :  { %2655 = vmatprep.subr.bf16.mxu0 %v2943_v42 }
 0x7e7   :  { %2656 = vmatpush3.bf16.msra.mxu0 %v2873_v41 }
 0x7e8   :  { %2657 = vmatprep.subr.bf16.mxu0 %v2943_v42 }
 0x7eb   :  { %2658 = vmatpush3.bf16.msra.mxu0 %v2874_v7 }
 0x7ec   :  { %2659 = vmatprep.subr.bf16.mxu0 %v2943_v42 }
 0x8a5   :  { %v2619_v18 = vpop.f32.mrb[40].mxu0 }
 0x8a6   :  { %v1160_v19 = vadd.f32 %v2619_v18, %v3104_v61  ;;  %v1151_v21 = vpop.f32.mrb[41].mxu0  ;;  %v1258_v18 = vmul.f32 %v2219_v10, %v3320_v27 }
 0x8a7   :  { %v1152_v23 = vadd.f32 %v1151_v21, %v3106_v62  ;;  %v2620_v24 = vpop.f32.mrb[42].mxu0 }
 0x8a8   :  { %v1163_v29 = vadd.f32 %v2620_v24, %v3108_v1  ;;  %v1154_v30 = vpop.f32.mrb[43].mxu0  ;;  %v1184_v34 = vmax.f32 %v1160_v19, 0.0  ;;  %v1259_v19 = vmul.f32 %v2219_v10, %v3323_v46 }
 0x8a9   :  { %v1155_v33 = vadd.f32 %v1154_v30, %v3111_v4  ;;  %v1182_v38 = vmax.f32 %v1152_v23, 0.0  ;;  %v1264_v23 = vadd.f32 %v1258_v18, %v3320_v27 }
 0x8aa   :  { %v1185_v37 = vmax.f32 %v1163_v29, 0.0  ;;  %v1265_v29 = vadd.f32 %v1259_v19, %v3323_v46 }
 0x8ab   :  { %v1183_v43 = vmax.f32 %v1155_v33, 0.0 }
 0x8ac   :  { %v1191_v44 = vpack.c.bf16 %v1185_v37, %v1184_v34 }
 0x8ad   :  { %v1190_v45 = vpack.c.bf16 %v1183_v43, %v1182_v38  ;;  %v2623_v48 = vpop.f32.mrb[44].mxu0  ;;  %v1260_v43 = vmul.f32 %v2219_v10, %v3328_v16 }
 0x8ae   :  { %v1176_v49 = vadd.f32 %v2623_v48, %v3116_v20  ;;  %v1167_v53 = vpop.f32.mrb[45].mxu0 }
 0x8af   :  { %v1168_v54 = vadd.f32 %v1167_v53, %v3118_v22  ;;  %v2624_v55 = vpop.f32.mrb[46].mxu0  ;;  %2626 = vmatpush3.bf16.msra.mxu1 %v1190_v45  ;;  %v1266_v48 = vadd.f32 %v1260_v43, %v3328_v16 }
 0x8b0   :  { %v1179_v56 = vadd.f32 %v2624_v55, %v3120_v25  ;;  %v1170_v59 = vpop.f32.mrb[47].mxu0  ;;  %2627 = vmatprep.subr.bf16.mxu1 %v2943_v42  ;;  %v1188_v0 = vmax.f32 %v1176_v49, 0.0 }
 0x8b1   :  { %v1171_v63 = vadd.f32 %v1170_v59, %v3123_v32  ;;  %v1186_v2 = vmax.f32 %v1168_v54, 0.0 }
 0x8b2   :  { %v1189_v14 = vmax.f32 %v1179_v56, 0.0 }
 0x8b3   :  { %v1187_v3 = vmax.f32 %v1171_v63, 0.0  ;;  %2628 = vmatpush3.bf16.msra.mxu1 %v1191_v44  ;;  %v1261_v44 = vmul.f32 %v2219_v10, %v3331_v60 }
 0x8b4   :  { %v1193_v5 = vpack.c.bf16 %v1189_v14, %v1188_v0  ;;  %2629 = vmatprep.subr.bf16.mxu1 %v2943_v42  ;;  %v2882_v0 = vld [vmem:[#allocation2 + $0x1b0] sm:$0xff]   ;;  %v2883_v14 = vld [vmem:[#allocation2 + $0x1b8] sm:$0xff]  }
 0x8b5   :  { %v1192_v6 = vpack.c.bf16 %v1187_v3, %v1186_v2  ;;  %v1267_v53 = vadd.f32 %v1261_v44, %v3331_v60  ;;  %v2220_v2 = vld [vmem:[%s3564_s5 + $0xa] ss:$0 sm:$0xff] }
 0x8b7   :  { %2630 = vmatpush3.bf16.msra.mxu1 %v1192_v6 }
 0x8b8   :  { %2631 = vmatprep.subr.bf16.mxu1 %v2943_v42 }
 0x8bb   :  { %2632 = vmatpush3.bf16.msra.mxu1 %v1193_v5 }
 0x8bc   :  { %2673 = vmatprep.subr.bf16.mxu1 %v2943_v42 }
 0x8be   :  { %2634 = vmatmul.mubr.msk.bf16.vlgmr.msra.gmra.mrb[48].mxu1 %vm312_vm2, %v3134_v50  ;;  %v2875_v50 = vld [vmem:[#allocation2 + $0xb8] sm:$0xff]  }
 0x8bf   :  { %2637 = vmatprep.mubr.msk.bf16.mxu1 %vm2944_vm1, %v2943_v42  ;;  %2660 = vmatpush3.bf16.msra.mxu0 %v2875_v50 }
 0x8c0   :  { %2674 = vmatpush3.bf16.msra.mxu1 %v2876_v47 }
 0x8c1   :  { %2675 = vmatprep.subr.bf16.mxu1 %v2943_v42 }
 0x8c4   :  { %2676 = vmatpush3.bf16.msra.mxu1 %v2877_v35 }
 0x8c5   :  { %2677 = vmatprep.subr.bf16.mxu1 %v2943_v42 }
 0x8c6   :  { %2638 = vmatmul.mubr.msk.bf16.gmra.mrb[52].mxu1 %vm312_vm2, %v3144_v51  ;;  %v2878_v51 = vld [vmem:[#allocation2 + $0x190] sm:$0xff]  }
 0x8c7   :  { %2641 = vmatprep.mubr.msk.bf16.mxu1 %vm2944_vm1, %v2943_v42 }
 0x8c8   :  { %2678 = vmatpush3.bf16.msra.mxu1 %v2878_v51 }
 0x8c9   :  { %2679 = vmatprep.subr.bf16.mxu1 %v2943_v42 }
 0x8ce   :  { %2642 = vmatmul.mubr.msk.bf16.gmra.mrb[56].mxu1 %vm312_vm2, %v3153_v52  ;;  %v2879_v52 = vld [vmem:[#allocation2 + $0x198] sm:$0xff]  }
 0x8cf   :  { %2689 = vmatprep.mubr.msk.bf16.mxu1 %vm2944_vm1, %v2943_v42  ;;  %2680 = vmatpush3.bf16.msra.mxu1 %v2879_v52 }
 0x8d0   :  { %2681 = vmatprep.subr.bf16.mxu1 %v2943_v42 }
 0x8d3   :  { %2682 = vmatpush3.bf16.msra.mxu1 %v2880_v36 }
 0x8d4   :  { %2683 = vmatprep.subr.bf16.mxu1 %v2943_v42 }
 0x8d7   :  { %2684 = vmatpush3.bf16.msra.mxu1 %v2881_v9 }
 0x8d8   :  { %2685 = vmatprep.subr.bf16.mxu1 %v2943_v42 }
 0x8db   :  { %2686 = vmatpush3.bf16.msra.mxu1 %v2882_v0 }
 0x8dc   :  { %2687 = vmatprep.subr.bf16.mxu1 %v2943_v42 }
 0x8df   :  { %2688 = vmatpush3.bf16.msra.mxu1 %v2883_v14 }
 0x8e0   :  { %2715 = vmatprep.subr.bf16.mxu1 %v2943_v42 }
 0x991   :  { %v1228_v13 = vpop.f32.mrb[48].mxu1 }
 0x992   :  { %v2635_v26 = vpop.f32.mrb[49].mxu1  ;;  %v1268_v17 = vadd.f32 %v1262_v15, %v1228_v13 }
 0x993   :  { %v1231_v31 = vpop.f32.mrb[50].mxu1 }
 0x994   :  { %v1269_v39 = vadd.f32 %v1263_v8, %v1231_v31  ;;  %v2636_v40 = vpop.f32.mrb[51].mxu1 }
 0x996   :  { %v1274_v41 = vpack.c.bf16 %v1269_v39, %v1268_v17 }
 0x998   :  { %2662 = vmatmul.mubr.bf16.vlgmr.msra.gmra.mrb[48].mxu0 %v1274_v41 }
 0x999   :  { %v1236_v21 = vpop.f32.mrb[52].mxu1  ;;  %2665 = vmatprep.mubr.msk.bf16.mxu0 %vm2944_vm1, %v2943_v42 }
 0x99a   :  { %v2639_v24 = vpop.f32.mrb[53].mxu1  ;;  %v1270_v33 = vadd.f32 %v1264_v23, %v1236_v21  ;;  %v2229_v23 = vld [vmem:[%s3564_s5 + $0x12] ss:$0 sm:$0xff] }
 0x99b   :  { %v1239_v30 = vpop.f32.mrb[54].mxu1 }
 0x99c   :  { %v1271_v34 = vadd.f32 %v1265_v29, %v1239_v30  ;;  %v2640_v37 = vpop.f32.mrb[55].mxu1 }
 0x99e   :  { %v1275_v38 = vpack.c.bf16 %v1271_v34, %v1270_v33 }
 0x9a0   :  { %2666 = vmatmul.mubr.bf16.gmra.mrb[52].mxu0 %v1275_v38 }
 0x9a1   :  { %v1244_v45 = vpop.f32.mrb[56].mxu1  ;;  %2669 = vmatprep.mubr.msk.bf16.mxu0 %vm2944_vm1, %v2943_v42 }
 0x9a2   :  { %v2643_v49 = vpop.f32.mrb[57].mxu1  ;;  %v1272_v55 = vadd.f32 %v1266_v48, %v1244_v45 }
 0x9a3   :  { %v1247_v54 = vpop.f32.mrb[58].mxu1 }
 0x9a4   :  { %v1273_v56 = vadd.f32 %v1267_v53, %v1247_v54  ;;  %v2644_v59 = vpop.f32.mrb[59].mxu1 }
 0x9a6   :  { %v1276_v63 = vpack.c.bf16 %v1273_v56, %v1272_v55 }
 0x9a8   :  { %2670 = vmatmul.mubr.bf16.gmra.mrb[56].mxu0 %v1276_v63 }
 0x9a9   :  { %2707 = vmatprep.mubr.msk.bf16.mxu0 %vm207_vm0, %v3293_v28 }
 0xa6b   :  { %v1380_v3 = vpop.f32.mrb[48].mxu0 }
 0xa6c   :  { %v1381_v5 = vadd.f32 %v2220_v2, %v1380_v3  ;;  %v2663_v6 = vpop.f32.mrb[49].mxu0 }
 0xa6d   :  { %v1383_v7 = vpop.f32.mrb[50].mxu0 }
 0xa6e   :  { %v1384_v50 = vadd.f32 %v2220_v2, %v1383_v7  ;;  %v2664_v47 = vpop.f32.mrb[51].mxu0  ;;  %v1403_v35 = vmax.f32 %v1381_v5, 0.0 }
 0xa70   :  { %v1404_v28 = vmax.f32 %v1384_v50, 0.0 }
 0xa72   :  { %v1409_v51 = vpack.c.bf16 %v1404_v28, %v1403_v35 }
 0xa73   :  { %v1388_v52 = vpop.f32.mrb[52].mxu0 }
 0xa74   :  { %v1389_v36 = vadd.f32 %v2220_v2, %v1388_v52  ;;  %v2667_v9 = vpop.f32.mrb[53].mxu0  ;;  %2690 = vmatmul.mubr.bf16.vlgmr.msra.gmra.mrb[60].mxu1 %v1409_v51  ;;  %v2909_v51 = vld [vmem:[%s3560_s1 + $0x8] sm:$0xff]   ;;  %v2884_v52 = vld [vmem:[#allocation2 + $0xc0] sm:$0xff]  }
 0xa75   :  { %v1391_v10 = vpop.f32.mrb[54].mxu0  ;;  %2693 = vmatprep.mubr.msk.bf16.mxu1 %vm2944_vm1, %v2943_v42  ;;  %v2886_v9 = vld [vmem:[#allocation2 + $0xd0] sm:$0xff]  }
 0xa76   :  { %v1392_v11 = vadd.f32 %v2220_v2, %v1391_v10  ;;  %v2668_v12 = vpop.f32.mrb[55].mxu0  ;;  %v1405_v13 = vmax.f32 %v1389_v36, 0.0  ;;  %v2885_v36 = vld [vmem:[#allocation2 + $0xc8] sm:$0xff]   ;;  %v2887_v10 = vld [vmem:[#allocation2 + $0xd8] sm:$0xff]  }
 0xa77   :  { %v2889_v12 = vld [vmem:[#allocation2 + $0xe8] sm:$0xff]  }
 0xa78   :  { %v1406_v15 = vmax.f32 %v1392_v11, 0.0  ;;  %v2888_v11 = vld [vmem:[#allocation2 + $0xe0] sm:$0xff]  }
 0xa7a   :  { %v1410_v26 = vpack.c.bf16 %v1406_v15, %v1405_v13 }
 0xa7b   :  { %v1396_v8 = vpop.f32.mrb[56].mxu0 }
 0xa7c   :  { %v1397_v31 = vadd.f32 %v2220_v2, %v1396_v8  ;;  %v2671_v17 = vpop.f32.mrb[57].mxu0  ;;  %2694 = vmatmul.mubr.bf16.gmra.mrb[64].mxu1 %v1410_v26 }
 0xa7d   :  { %v1399_v39 = vpop.f32.mrb[58].mxu0  ;;  %2697 = vmatprep.mubr.msk.bf16.mxu1 %vm2944_vm1, %v2943_v42 }
 0xa7e   :  { %v1400_v40 = vadd.f32 %v2220_v2, %v1399_v39  ;;  %v2672_v41 = vpop.f32.mrb[59].mxu0  ;;  %v1407_v18 = vmax.f32 %v1397_v31, 0.0 }
 0xa80   :  { %v1408_v19 = vmax.f32 %v1400_v40, 0.0 }
 0xa82   :  { %v1411_v21 = vpack.c.bf16 %v1408_v19, %v1407_v18 }
 0xa84   :  { %2698 = vmatmul.mubr.bf16.gmra.mrb[68].mxu1 %v1411_v21 }
 0xa85   :  { %2723 = vmatprep.mubr.msk.bf16.mxu1 %vm2944_vm1, %v2943_v42 }
 0xb47   :  { %v1515_v24 = vpop.f32.mrb[60].mxu1 }
 0xb48   :  { %v1516_v29 = vadd.f32 %v2229_v23, %v1515_v24  ;;  %v2691_v30 = vpop.f32.mrb[61].mxu1 }
 0xb49   :  { %v1518_v33 = vpop.f32.mrb[62].mxu1 }
 0xb4a   :  { %v1538_v34 = vmax.f32 %v1516_v29, 0.0  ;;  %v1519_v37 = vadd.f32 %v2229_v23, %v1518_v33  ;;  %v2692_v38 = vpop.f32.mrb[63].mxu1 }
 0xb4c   :  { %v1539_v43 = vmax.f32 %v1519_v37, 0.0  ;;  %v3417_v44 = vadd.f32 %v1538_v34, %v3312_v57 }
 0xb4e   :  { %v3420_v45 = vadd.f32 %v1539_v43, %v3315_v58 }
 0xb4f   :  { %v1523_v48 = vpop.f32.mrb[64].mxu1 }
 0xb50   :  { %v1524_v49 = vadd.f32 %v2229_v23, %v1523_v48  ;;  %v2695_v53 = vpop.f32.mrb[65].mxu1  ;;  %v1550_v54 = vpack.c.bf16 %v3420_v45, %v3417_v44 }
 0xb51   :  { %v1526_v55 = vpop.f32.mrb[66].mxu1  ;;  %v2890_v53 = vld [vmem:[#allocation2 + $0xf0] sm:$0xff]  }
 0xb52   :  { %v1540_v56 = vmax.f32 %v1524_v49, 0.0  ;;  %v1527_v59 = vadd.f32 %v2229_v23, %v1526_v55  ;;  %v2696_v63 = vpop.f32.mrb[67].mxu1  ;;  %2701 = vmatprep.subr.bf16.mxu0 %v1550_v54  ;;  %v2892_v55 = vld [vmem:[#allocation2 + $0x1c0] sm:$0xff]  }
 0xb53   :  { %2702 = vmatpush3.bf16.msra.mxu0 %v1550_v54  ;;  %v2891_v54 = vld [vmem:[#allocation2 + $0xf8] sm:$0xff]  }
 0xb54   :  { %v1541_v0 = vmax.f32 %v1527_v59, 0.0  ;;  %v3425_v14 = vadd.f32 %v1540_v56, %v3320_v27  ;;  %v2893_v56 = vld [vmem:[#allocation2 + $0x1c8] sm:$0xff]   ;;  %v2894_v59 = vld [vmem:[#allocation2 + $0x1d0] sm:$0xff]   ;;  %v2895_v63 = vld [vmem:[#allocation2 + $0x1d8] sm:$0xff]  }
 0xb56   :  { %v3428_v57 = vadd.f32 %v1541_v0, %v3323_v46  ;;  %v2896_v0 = vld [vmem:[#allocation2 + $0x1e0] sm:$0xff]  }
 0xb57   :  { %v1531_v58 = vpop.f32.mrb[68].mxu1 }
 0xb58   :  { %v1532_v2 = vadd.f32 %v2229_v23, %v1531_v58  ;;  %v2699_v3 = vpop.f32.mrb[69].mxu1  ;;  %v1551_v5 = vpack.c.bf16 %v3428_v57, %v3425_v14  ;;  %v2897_v58 = vld [vmem:[#allocation2 + $0x1e8] sm:$0xff]  }
 0xb59   :  { %v1534_v6 = vpop.f32.mrb[70].mxu1 }
 0xb5a   :  { %v1542_v7 = vmax.f32 %v1532_v2, 0.0  ;;  %v1535_v50 = vadd.f32 %v2229_v23, %v1534_v6  ;;  %v2700_v47 = vpop.f32.mrb[71].mxu1  ;;  %2703 = vmatprep.subr.bf16.mxu0 %v1551_v5  ;;  %v2245_v2 = vld [vmem:[%s3564_s5 + $0x1b] ss:$0 sm:$0xff] }
 0xb5b   :  { %2704 = vmatpush3.bf16.msra.mxu0 %v1551_v5  ;;  %v1692_v3 = vmul.f32 %v2245_v2, %v3417_v44  ;;  %v1693_v5 = vmul.f32 %v2245_v2, %v3420_v45 }
 0xb5c   :  { %v1543_v35 = vmax.f32 %v1535_v50, 0.0  ;;  %v3433_v28 = vadd.f32 %v1542_v7, %v3328_v16  ;;  %v2910_v16 = vld [vmem:[%s3560_s1 + $0x10] sm:$0xff]  }
 0xb5d   :  { %v1698_v7 = vadd.f32 %v1692_v3, %v3417_v44  ;;  %v1699_v47 = vadd.f32 %v1693_v5, %v3420_v45 }
 0xb5e   :  { %v3436_v27 = vadd.f32 %v1543_v35, %v3331_v60  ;;  %v2911_v60 = vld [vmem:[%s3560_s1 + $0x18] sm:$0xff]  }
 0xb60   :  { %v1552_v46 = vpack.c.bf16 %v3436_v27, %v3433_v28 }
 0xb62   :  { %2705 = vmatprep.subr.bf16.mxu0 %v1552_v46 }
 0xb63   :  { %2706 = vmatpush3.bf16.msra.mxu0 %v1552_v46 }
 0xb64   :  { %2735 = vmatprep.subr.bf16.mxu0 %v2943_v42 }
 0xb66   :  { %2708 = vmatmul.mubr.msk.bf16.vlgmr.msra.gmra.mrb[60].mxu0 %vm207_vm0, %v2909_v51 }
 0xb67   :  { %2711 = vmatprep.mubr.msk.bf16.mxu0 %vm207_vm0, %v2910_v16  ;;  %2736 = vmatpush3.bf16.msra.mxu0 %v2884_v52  ;;  %v1694_v52 = vmul.f32 %v2245_v2, %v3425_v14 }
 0xb68   :  { %2737 = vmatprep.subr.bf16.mxu0 %v2943_v42 }
 0xb6b   :  { %2738 = vmatpush3.bf16.msra.mxu0 %v2885_v36  ;;  %v1695_v36 = vmul.f32 %v2245_v2, %v3428_v57 }
 0xb6c   :  { %2739 = vmatprep.subr.bf16.mxu0 %v2943_v42 }
 0xb6e   :  { %2712 = vmatmul.mubr.msk.bf16.gmra.mrb[64].mxu0 %vm207_vm0, %v2911_v60 }
 0xb6f   :  { %2751 = vmatprep.mubr.msk.bf16.mxu0 %vm2944_vm1, %v2943_v42  ;;  %2740 = vmatpush3.bf16.msra.mxu0 %v2886_v9 }
 0xb70   :  { %2741 = vmatprep.subr.bf16.mxu0 %v2943_v42 }
 0xb73   :  { %2742 = vmatpush3.bf16.msra.mxu0 %v2887_v10  ;;  %v1700_v10 = vadd.f32 %v1694_v52, %v3425_v14  ;;  %v2905_v52 = vld [vmem:[#allocation2 + $0x228] sm:$0xff]  }
 0xb74   :  { %2743 = vmatprep.subr.bf16.mxu0 %v2943_v42 }
 0xb77   :  { %2744 = vmatpush3.bf16.msra.mxu0 %v2888_v11 }
 0xb78   :  { %2745 = vmatprep.subr.bf16.mxu0 %v2943_v42 }
 0xb7b   :  { %2746 = vmatpush3.bf16.msra.mxu0 %v2889_v12  ;;  %v1701_v12 = vadd.f32 %v1695_v36, %v3428_v57  ;;  %v2906_v36 = vld [vmem:[#allocation2 + $0x230] sm:$0xff]  }
 0xb7c   :  { %2747 = vmatprep.subr.bf16.mxu0 %v2943_v42 }
 0xb7f   :  { %2748 = vmatpush3.bf16.msra.mxu0 %v2890_v53 }
 0xb80   :  { %2749 = vmatprep.subr.bf16.mxu0 %v2943_v42 }
 0xb83   :  { %2750 = vmatpush3.bf16.msra.mxu0 %v2891_v54 }
 0xb84   :  { %2791 = vmatprep.subr.bf16.mxu0 %v2943_v42 }
 0xc39   :  { %v2709_v13 = vpop.f32.mrb[60].mxu0 }
 0xc3a   :  { %v1596_v15 = vadd.f32 %v2709_v13, %v3104_v61  ;;  %v1587_v26 = vpop.f32.mrb[61].mxu0 }
 0xc3b   :  { %v1588_v8 = vadd.f32 %v1587_v26, %v3106_v62  ;;  %v2710_v31 = vpop.f32.mrb[62].mxu0 }
 0xc3c   :  { %v1599_v17 = vadd.f32 %v2710_v31, %v3108_v1  ;;  %v1590_v39 = vpop.f32.mrb[63].mxu0  ;;  %v1620_v41 = vmax.f32 %v1596_v15, 0.0 }
 0xc3d   :  { %v1591_v40 = vadd.f32 %v1590_v39, %v3111_v4  ;;  %v1618_v19 = vmax.f32 %v1588_v8, 0.0  ;;  %v1697_v39 = vmul.f32 %v2245_v2, %v3436_v27 }
 0xc3e   :  { %v1621_v18 = vmax.f32 %v1599_v17, 0.0  ;;  %v1696_v17 = vmul.f32 %v2245_v2, %v3433_v28 }
 0xc3f   :  { %v1619_v21 = vmax.f32 %v1591_v40, 0.0 }
 0xc40   :  { %v1627_v23 = vpack.c.bf16 %v1621_v18, %v1620_v41  ;;  %v1702_v41 = vadd.f32 %v1696_v17, %v3433_v28 }
 0xc41   :  { %v1626_v24 = vpack.c.bf16 %v1619_v21, %v1618_v19  ;;  %v2713_v29 = vpop.f32.mrb[64].mxu0  ;;  %v1703_v19 = vadd.f32 %v1697_v39, %v3436_v27 }
 0xc42   :  { %v1612_v30 = vadd.f32 %v2713_v29, %v3116_v20  ;;  %v1603_v33 = vpop.f32.mrb[65].mxu0 }
 0xc43   :  { %v1604_v61 = vadd.f32 %v1603_v33, %v3118_v22  ;;  %v2714_v34 = vpop.f32.mrb[66].mxu0  ;;  %2716 = vmatpush3.bf16.msra.mxu1 %v1626_v24  ;;  %v2912_v22 = vld [vmem:[%s3561_s2] sm:$0xff]   ;;  %v2898_v33 = vld [vmem:[#allocation2 + $0x1f0] sm:$0xff]  }
 0xc44   :  { %v1615_v62 = vadd.f32 %v2714_v34, %v3120_v25  ;;  %v1606_v1 = vpop.f32.mrb[67].mxu0  ;;  %2717 = vmatprep.subr.bf16.mxu1 %v2943_v42  ;;  %v1624_v37 = vmax.f32 %v1612_v30, 0.0  ;;  %v2913_v25 = vld [vmem:[%s3561_s2 + $0x8] sm:$0xff]  }
 0xc45   :  { %v1607_v4 = vadd.f32 %v1606_v1, %v3123_v32  ;;  %v1622_v43 = vmax.f32 %v1604_v61, 0.0  ;;  %v2914_v32 = vld [vmem:[%s3561_s2 + $0x10] sm:$0xff]   ;;  %v2899_v61 = vld [vmem:[#allocation2 + $0x1f8] sm:$0xff]   ;;  %v2246_v34 = vld [vmem:[%s3564_s5 + $0xb] ss:$0 sm:$0xff] }
 0xc46   :  { %v1625_v38 = vmax.f32 %v1615_v62, 0.0 }
 0xc47   :  { %v1623_v48 = vmax.f32 %v1607_v4, 0.0  ;;  %2718 = vmatpush3.bf16.msra.mxu1 %v1627_v23 }
 0xc48   :  { %v1629_v49 = vpack.c.bf16 %v1625_v38, %v1624_v37  ;;  %2719 = vmatprep.subr.bf16.mxu1 %v2943_v42 }
 0xc49   :  { %v1628_v20 = vpack.c.bf16 %v1623_v48, %v1622_v43 }
 0xc4b   :  { %2720 = vmatpush3.bf16.msra.mxu1 %v1628_v20 }
 0xc4c   :  { %2721 = vmatprep.subr.bf16.mxu1 %v2943_v42 }
 0xc4f   :  { %2722 = vmatpush3.bf16.msra.mxu1 %v1629_v49 }
 0xc50   :  { %2763 = vmatprep.subr.bf16.mxu1 %v2943_v42 }
 0xc52   :  { %2724 = vmatmul.mubr.msk.bf16.vlgmr.msra.gmra.mrb[72].mxu1 %vm312_vm2, %v2912_v22 }
 0xc53   :  { %2727 = vmatprep.mubr.msk.bf16.mxu1 %vm2944_vm1, %v2943_v42  ;;  %2764 = vmatpush3.bf16.msra.mxu1 %v2892_v55 }
 0xc54   :  { %2765 = vmatprep.subr.bf16.mxu1 %v2943_v42 }
 0xc57   :  { %2766 = vmatpush3.bf16.msra.mxu1 %v2893_v56 }
 0xc58   :  { %2767 = vmatprep.subr.bf16.mxu1 %v2943_v42 }
 0xc5a   :  { %2728 = vmatmul.mubr.msk.bf16.gmra.mrb[76].mxu1 %vm312_vm2, %v2913_v25 }
 0xc5b   :  { %2731 = vmatprep.mubr.msk.bf16.mxu1 %vm2944_vm1, %v2943_v42  ;;  %2768 = vmatpush3.bf16.msra.mxu1 %v2894_v59 }
 0xc5c   :  { %2769 = vmatprep.subr.bf16.mxu1 %v2943_v42 }
 0xc5f   :  { %2770 = vmatpush3.bf16.msra.mxu1 %v2895_v63 }
 0xc60   :  { %2771 = vmatprep.subr.bf16.mxu1 %v2943_v42 }
 0xc62   :  { %2732 = vmatmul.mubr.msk.bf16.gmra.mrb[80].mxu1 %vm312_vm2, %v2914_v32 }
 0xc63   :  { %2779 = vmatprep.mubr.msk.bf16.mxu1 %vm2944_vm1, %v2943_v42  ;;  %2772 = vmatpush3.bf16.msra.mxu1 %v2896_v0 }
 0xc64   :  { %2773 = vmatprep.subr.bf16.mxu1 %v2943_v42 }
 0xc67   :  { %2774 = vmatpush3.bf16.msra.mxu1 %v2897_v58 }
 0xc68   :  { %2775 = vmatprep.subr.bf16.mxu1 %v2943_v42 }
 0xc6b   :  { %2776 = vmatpush3.bf16.msra.mxu1 %v2898_v33 }
 0xc6c   :  { %2777 = vmatprep.subr.bf16.mxu1 %v2943_v42 }
 0xc6f   :  { %2778 = vmatpush3.bf16.msra.mxu1 %v2899_v61 }
 0xc70   :  { %2801 = vmatprep.subr.bf16.mxu1 %v2943_v42 }
 0xd25   :  { %v1664_v6 = vpop.f32.mrb[72].mxu1 }
 0xd26   :  { %v2725_v50 = vpop.f32.mrb[73].mxu1  ;;  %v1704_v46 = vadd.f32 %v1698_v7, %v1664_v6 }
 0xd27   :  { %v1667_v35 = vpop.f32.mrb[74].mxu1 }
 0xd28   :  { %v1705_v51 = vadd.f32 %v1699_v47, %v1667_v35  ;;  %v2726_v16 = vpop.f32.mrb[75].mxu1  ;;  %v2900_v35 = vld [vmem:[#allocation2 + $0x200] sm:$0xff]  }
 0xd29   :  { %v2903_v16 = vld [vmem:[#allocation2 + $0x218] sm:$0xff]  }
 0xd2a   :  { %v1710_v60 = vpack.c.bf16 %v1705_v51, %v1704_v46  ;;  %v2901_v46 = vld [vmem:[#allocation2 + $0x208] sm:$0xff]   ;;  %v2902_v51 = vld [vmem:[#allocation2 + $0x210] sm:$0xff]  }
 0xd2c   :  { %2752 = vmatmul.mubr.bf16.vlgmr.msra.gmra.mrb[68].mxu0 %v1710_v60  ;;  %v2904_v60 = vld [vmem:[#allocation2 + $0x220] sm:$0xff]  }
 0xd2d   :  { %v1672_v9 = vpop.f32.mrb[76].mxu1  ;;  %2755 = vmatprep.mubr.msk.bf16.mxu0 %vm2944_vm1, %v2943_v42 }
 0xd2e   :  { %v2729_v11 = vpop.f32.mrb[77].mxu1  ;;  %v1706_v15 = vadd.f32 %v1700_v10, %v1672_v9  ;;  %v2255_v9 = vld [vmem:[%s3564_s5 + $0x13] ss:$0 sm:$0xff] }
 0xd2f   :  { %v1675_v13 = vpop.f32.mrb[78].mxu1 }
 0xd30   :  { %v1707_v26 = vadd.f32 %v1701_v12, %v1675_v13  ;;  %v2730_v8 = vpop.f32.mrb[79].mxu1 }
 0xd32   :  { %v1711_v31 = vpack.c.bf16 %v1707_v26, %v1706_v15 }
 0xd34   :  { %2756 = vmatmul.mubr.bf16.gmra.mrb[72].mxu0 %v1711_v31 }
 0xd35   :  { %v1680_v40 = vpop.f32.mrb[80].mxu1  ;;  %2759 = vmatprep.mubr.msk.bf16.mxu0 %vm2944_vm1, %v2943_v42 }
 0xd36   :  { %v2733_v18 = vpop.f32.mrb[81].mxu1  ;;  %v1708_v23 = vadd.f32 %v1702_v41, %v1680_v40 }
 0xd37   :  { %v1683_v21 = vpop.f32.mrb[82].mxu1 }
 0xd38   :  { %v1709_v24 = vadd.f32 %v1703_v19, %v1683_v21  ;;  %v2734_v29 = vpop.f32.mrb[83].mxu1 }
 0xd3a   :  { %v1712_v30 = vpack.c.bf16 %v1709_v24, %v1708_v23 }
 0xd3c   :  { %2760 = vmatmul.mubr.bf16.gmra.mrb[76].mxu0 %v1712_v30 }
 0xd3d   :  { %2797 = vmatprep.mubr.msk.bf16.mxu0 %vm2944_vm1, %v2943_v42 }
 0xdff   :  { %v1816_v62 = vpop.f32.mrb[68].mxu0 }
 0xe00   :  { %v1817_v1 = vadd.f32 %v2246_v34, %v1816_v62  ;;  %v2753_v4 = vpop.f32.mrb[69].mxu0 }
 0xe01   :  { %v1819_v37 = vpop.f32.mrb[70].mxu0 }
 0xe02   :  { %v1820_v38 = vadd.f32 %v2246_v34, %v1819_v37  ;;  %v2754_v43 = vpop.f32.mrb[71].mxu0  ;;  %v1839_v48 = vmax.f32 %v1817_v1, 0.0 }
 0xe04   :  { %v1840_v49 = vmax.f32 %v1820_v38, 0.0 }
 0xe06   :  { %v1845_v20 = vpack.c.bf16 %v1840_v49, %v1839_v48 }
 0xe07   :  { %v1824_v22 = vpop.f32.mrb[72].mxu0 }
 0xe08   :  { %v1825_v25 = vadd.f32 %v2246_v34, %v1824_v22  ;;  %v2757_v32 = vpop.f32.mrb[73].mxu0  ;;  %2780 = vmatmul.mubr.bf16.vlgmr.msra.gmra.mrb[84].mxu1 %v1845_v20 }
 0xe09   :  { %v1827_v53 = vpop.f32.mrb[74].mxu0  ;;  %2783 = vmatprep.mubr.msk.bf16.mxu1 %vm2944_vm1, %v2943_v42  ;;  %2802 = vmatpush3.bf16.msra.mxu1 %v2900_v35 }
 0xe0a   :  { %v1828_v54 = vadd.f32 %v2246_v34, %v1827_v53  ;;  %v2758_v55 = vpop.f32.mrb[75].mxu0  ;;  %v1841_v56 = vmax.f32 %v1825_v25, 0.0  ;;  %2803 = vmatprep.subr.bf16.mxu1 %v2943_v42 }
 0xe0c   :  { %v1842_v59 = vmax.f32 %v1828_v54, 0.0 }
 0xe0d   :  { %2804 = vmatpush3.bf16.msra.mxu1 %v2901_v46 }
 0xe0e   :  { %v1846_v63 = vpack.c.bf16 %v1842_v59, %v1841_v56  ;;  %2805 = vmatprep.subr.bf16.mxu1 %v2943_v42 }
 0xe0f   :  { %v1832_v0 = vpop.f32.mrb[76].mxu0 }
 0xe10   :  { %v1833_v58 = vadd.f32 %v2246_v34, %v1832_v0  ;;  %v2761_v2 = vpop.f32.mrb[77].mxu0  ;;  %2784 = vmatmul.mubr.bf16.gmra.mrb[88].mxu1 %v1846_v63 }
 0xe11   :  { %v1835_v3 = vpop.f32.mrb[78].mxu0  ;;  %2787 = vmatprep.mubr.msk.bf16.mxu1 %vm2944_vm1, %v2943_v42  ;;  %2806 = vmatpush3.bf16.msra.mxu1 %v2902_v51 }
 0xe12   :  { %v1836_v5 = vadd.f32 %v2246_v34, %v1835_v3  ;;  %v2762_v6 = vpop.f32.mrb[79].mxu0  ;;  %v1843_v7 = vmax.f32 %v1833_v58, 0.0  ;;  %2807 = vmatprep.subr.bf16.mxu1 %v2943_v42 }
 0xe14   :  { %v1844_v50 = vmax.f32 %v1836_v5, 0.0 }
 0xe15   :  { %2808 = vmatpush3.bf16.msra.mxu1 %v2903_v16 }
 0xe16   :  { %v1847_v47 = vpack.c.bf16 %v1844_v50, %v1843_v7  ;;  %2809 = vmatprep.subr.bf16.mxu1 %v2943_v42 }
 0xe18   :  { %2788 = vmatmul.mubr.bf16.gmra.mrb[92].mxu1 %v1847_v47 }
 0xe19   :  { %2817 = vmatprep.mubr.msk.bf16.mxu1 %vm2944_vm1, %v2943_v42  ;;  %2810 = vmatpush3.bf16.msra.mxu1 %v2904_v60 }
 0xe1a   :  { %2811 = vmatprep.subr.bf16.mxu1 %v2943_v42 }
 0xe1d   :  { %2812 = vmatpush3.bf16.msra.mxu1 %v2905_v52 }
 0xe1e   :  { %2813 = vmatprep.subr.bf16.mxu1 %v2943_v42 }
 0xe21   :  { %2814 = vmatpush3.bf16.msra.mxu1 %v2906_v36 }
 0xe22   :  { %2815 = vmatprep.subr.bf16.mxu1 %v2943_v42 }
 0xedb   :  { %v1951_v10 = vpop.f32.mrb[84].mxu1 }
 0xedc   :  { %v1952_v11 = vadd.f32 %v2255_v9, %v1951_v10  ;;  %v2781_v12 = vpop.f32.mrb[85].mxu1 }
 0xedd   :  { %v1954_v13 = vpop.f32.mrb[86].mxu1 }
 0xede   :  { %v1974_v15 = vmax.f32 %v1952_v11, 0.0  ;;  %v1955_v26 = vadd.f32 %v2255_v9, %v1954_v13  ;;  %v2782_v8 = vpop.f32.mrb[87].mxu1 }
 0xee0   :  { %v1975_v31 = vmax.f32 %v1955_v26, 0.0  ;;  %v1980_v17 = vadd.f32 %v1974_v15, %v3417_v44 }
 0xee2   :  { %v1981_v39 = vadd.f32 %v1975_v31, %v3420_v45 }
 0xee3   :  { %v1959_v40 = vpop.f32.mrb[88].mxu1 }
 0xee4   :  { %v1987_v41 = vpack.c.bf16 %v1981_v39, %v1980_v17  ;;  %v1960_v18 = vadd.f32 %v2255_v9, %v1959_v40  ;;  %v2785_v19 = vpop.f32.mrb[89].mxu1 }
 0xee5   :  { %v1962_v21 = vpop.f32.mrb[90].mxu1 }
 0xee6   :  { %v1976_v23 = vmax.f32 %v1960_v18, 0.0  ;;  %v1963_v24 = vadd.f32 %v2255_v9, %v1962_v21  ;;  %v2786_v29 = vpop.f32.mrb[91].mxu1  ;;  %2792 = vmatpush3.bf16.msra.mxu0 %v1987_v41 }
 0xee7   :  { %2793 = vmatprep.subr.bf16.mxu0 %v2943_v42 }
 0xee8   :  { %v1977_v30 = vmax.f32 %v1963_v24, 0.0  ;;  %v1982_v33 = vadd.f32 %v1976_v23, %v3425_v14  ;;  %v1986_v14 = vld [vmem:[%s3562_s3] sm:$0x7] }
 0xeea   :  { %v1983_v61 = vadd.f32 %v1977_v30, %v3428_v57  ;;  %v2907_v57 = vld [vmem:[#allocation2 + $0x238] sm:$0xff]  }
 0xeeb   :  { %v1967_v34 = vpop.f32.mrb[92].mxu1  ;;  %2816 = vmatpush3.bf16.msra.mxu1 %v2907_v57 }
 0xeec   :  { %v1988_v44 = vpack.c.bf16 %v1983_v61, %v1982_v33  ;;  %v1968_v62 = vadd.f32 %v2255_v9, %v1967_v34  ;;  %v2789_v45 = vpop.f32.mrb[93].mxu1 }
 0xeed   :  { %v1970_v1 = vpop.f32.mrb[94].mxu1 }
 0xeee   :  { %v1978_v4 = vmax.f32 %v1968_v62, 0.0  ;;  %v1971_v37 = vadd.f32 %v2255_v9, %v1970_v1  ;;  %v2790_v38 = vpop.f32.mrb[95].mxu1  ;;  %2794 = vmatpush3.bf16.msra.mxu0 %v1988_v44 }
 0xeef   :  { %2795 = vmatprep.subr.bf16.mxu0 %v2943_v42 }
 0xef0   :  { %v1979_v43 = vmax.f32 %v1971_v37, 0.0  ;;  %v1984_v48 = vadd.f32 %v1978_v4, %v3433_v28  ;;  %v2265_v28 = vld [vmem:[%s3564_s5 + $0x20] ss:$0 sm:$0xff] }
 0xef2   :  { %v1985_v49 = vadd.f32 %v1979_v43, %v3436_v27 }
 0xef4   :  { %v1989_v20 = vpack.c.bf16 %v1985_v49, %v1984_v48 }
 0xef6   :  { %2796 = vmatpush3.bf16.msra.mxu0 %v1989_v20 }
 0xef9   :  { %2798 = vmatmul.mubr.msk.bf16.vlgmr.msra.gmra.mrb[80].mxu0 %vm207_vm0, %v1986_v14 }
 0xfcc   :  { %v2027_v22 = vpop.f32.mrb[80].mxu0 }
 0xfcd   :  { %v2033_v25 = vpack.c.bf16 %v2027_v22, %v2027_v22  ;;  %v2799_v32 = vpop.f32.mrb[81].mxu0 }
 0xfce   :  { %v2030_v53 = vpop.f32.mrb[82].mxu0 }
 0xfcf   :  { %v2800_v42 = vpop.f32.mrb[83].mxu0  ;;  %2818 = vmatmul.mubr.bf16.vlgmr.msra.gmra.mrb[96].mxu1 %v2033_v25 }
0x10a2   :  { %v2137_v27 = vpop.f32.mrb[96].mxu1 }
0x10a3   :  { %v2138_v54 = vadd.f32 %v2265_v28, %v2137_v27  ;;  %v2819_v55 = vpop.f32.mrb[97].mxu1 }
0x10a4   :  { %v2140_v56 = vpop.f32.mrb[98].mxu1 }
0x10a5   :  { %2143 = vst [vmem:[%s3565_s6] sm:$0x3f] %v2138_v54  ;;  %v2820_v59 = vpop.f32.mrb[99].mxu1 }
0x10a6   :  { %2148 = vsyncpa [#allocation3], 1 }

</bundles_post_ra>
